<compile_context>
chip_gen: v7x
topology: tpu7x:2x2x1
jax: 0.10.0
libtpu: 0.0.40
codegen_flags: <defaults>
</compile_context>

<pallas_src>
import jax
import jax.numpy as jnp
import numpy as np
from jax.experimental import pallas as pl
from jax.experimental.pallas import tpu as pltpu


# ---------------------------------------------------------------------------
# Pallas kernels
# ---------------------------------------------------------------------------
def _gemm_bias_relu_kernel(x_ref, w_ref, b_ref, o_ref):
    # (tm, K) @ (K, Cout) on the MXU, bf16 operands, f32 accumulate/epilogue.
    y = jnp.dot(x_ref[...], w_ref[...], preferred_element_type=jnp.float32)
    y = jnp.maximum(y + b_ref[...], 0.0)
    o_ref[...] = y.astype(o_ref.dtype)


def _duel_head_kernel(x_ref, w14_ref, b14_ref, w15_ref, b15_ref,
                      w24_ref, b24_ref, w25_ref, b25_ref, o_ref):
    x = x_ref[...]                                                  # (B, 800) bf16
    # value branch: dense14 -> relu -> dense15 (column pre-replicated to A)
    h1 = jnp.dot(x, w14_ref[...], preferred_element_type=jnp.float32) + b14_ref[...]
    h1 = jnp.maximum(h1, 0.0).astype(jnp.bfloat16)
    v = jnp.dot(h1, w15_ref[...], preferred_element_type=jnp.float32) + b15_ref[...]
    # advantage branch: dense24 -> relu -> dense25
    h2 = jnp.dot(x, w24_ref[...], preferred_element_type=jnp.float32) + b24_ref[...]
    h2 = jnp.maximum(h2, 0.0).astype(jnp.bfloat16)
    adv = jnp.dot(h2, w25_ref[...], preferred_element_type=jnp.float32) + b25_ref[...]
    # dueling combine: q = v + adv - mean(adv)
    q = v + adv - jnp.mean(adv, axis=-1, keepdims=True)
    o_ref[...] = q.astype(o_ref.dtype)


# ---------------------------------------------------------------------------
# Conv layer: transpose-free im2col (JAX slices) + fused Pallas GEMM/bias/relu
# ---------------------------------------------------------------------------
def conv2d_relu(x_nhwc, wmat, bias, *, ksize=4, stride=2, pad=1):
    """x_nhwc: (N,H,W,C) bf16; wmat: (KH*KW*C, Cout) bf16; bias: (1, Cout) f32."""
    N, H, W, C = x_nhwc.shape
    K, Cout = wmat.shape
    ho = (H + 2 * pad - ksize) // stride + 1
    wo = (W + 2 * pad - ksize) // stride + 1

    # TODO(synk): the stride-2 patch gather still runs as XLA slices outside the
    # kernel; a fully in-kernel DMA gather would remove this last cols round-trip.
    xp = jnp.pad(x_nhwc, ((0, 0), (pad, pad), (pad, pad), (0, 0)))
    views = []
    for i in range(ksize):
        for j in range(ksize):
            views.append(xp[:, i:i + stride * (ho - 1) + 1:stride,
                               j:j + stride * (wo - 1) + 1:stride, :])
    # concat on the channel axis -> (N, ho, wo, kh*kw*C), already in (i, j, c)
    # order matching the packed weights; no stack/transpose shuffles.
    cols = jnp.concatenate(views, axis=-1).reshape(N * ho * wo, K)

    M = N * ho * wo
    if M % 32 == 0 and M >= 512:        # split across the 2 TCs on v7x
        grid_m, tm = 2, M // 2
    else:
        grid_m, tm = 1, M

    y = pl.pallas_call(
        _gemm_bias_relu_kernel,
        out_shape=jax.ShapeDtypeStruct((M, Cout), jnp.bfloat16),
        grid=(grid_m,),
        in_specs=[
            pl.BlockSpec((tm, K), lambda m: (m, 0)),     # row tile of cols
            pl.BlockSpec((K, Cout), lambda m: (0, 0)),   # full packed weight
            pl.BlockSpec((1, Cout), lambda m: (0, 0)),   # bias row
        ],
        out_specs=pl.BlockSpec((tm, Cout), lambda m: (m, 0)),
        compiler_params=pltpu.CompilerParams(dimension_semantics=("parallel",)),
    )(cols, wmat, bias)
    return y.reshape(N, ho, wo, Cout)


# ---------------------------------------------------------------------------
# Fused dueling head: one pallas_call, all weights resident in VMEM
# ---------------------------------------------------------------------------
def duel_head(x_flat, p):
    """x_flat: (B, 800) bf16 (NHWC-flattened conv3 features)."""
    B = x_flat.shape[0]
    A = p["w25"].shape[1]
    args = (x_flat, p["w14"], p["b14"], p["w15"], p["b15"],
            p["w24"], p["b24"], p["w25"], p["b25"])
    return pl.pallas_call(
        _duel_head_kernel,
        out_shape=jax.ShapeDtypeStruct((B, A), jnp.float32),
        grid=(1,),
        in_specs=[pl.BlockSpec(a.shape, lambda i: (0, 0)) for a in args],
        out_specs=pl.BlockSpec((B, A), lambda i: (0, 0)),
        compiler_params=pltpu.CompilerParams(dimension_semantics=("arbitrary",)),
    )(*args)


# ---------------------------------------------------------------------------
# Parameters: PyTorch-layout init + one-time repack into kernel layouts
# ---------------------------------------------------------------------------
def init_torch_params(key, state_size, action_size):
    ks = jax.random.split(key, 14)

    def u(k, shape, fan_in):
        b = 1.0 / np.sqrt(fan_in)
        return jax.random.uniform(k, shape, jnp.float32, -b, b)

    flat = 10 * 10 * 8
    return {
        "conv1_w": u(ks[0], (2, state_size, 4, 4), state_size * 16),
        "conv1_b": u(ks[1], (2,), state_size * 16),
        "conv2_w": u(ks[2], (4, 2, 4, 4), 2 * 16),
        "conv2_b": u(ks[3], (4,), 2 * 16),
        "conv3_w": u(ks[4], (8, 4, 4, 4), 4 * 16),
        "conv3_b": u(ks[5], (8,), 4 * 16),
        "d14_w": u(ks[6], (flat // 2, flat), flat),
        "d14_b": u(ks[7], (flat // 2,), flat),
        "d15_w": u(ks[8], (1, flat // 2), flat // 2),
        "d15_b": u(ks[9], (1,), flat // 2),
        "d24_w": u(ks[10], (flat // 2, flat), flat),
        "d24_b": u(ks[11], (flat // 2,), flat),
        "d25_w": u(ks[12], (action_size, flat // 2), flat // 2),
        "d25_b": u(ks[13], (action_size,), flat // 2),
    }


def pack_params(tp, action_size):
    def conv_pack(w):   # (Cout, Cin, KH, KW) -> (KH*KW*Cin, Cout) bf16
        co, ci, kh, kw = w.shape
        return jnp.transpose(w, (2, 3, 1, 0)).reshape(kh * kw * ci, co).astype(jnp.bfloat16)

    # Map NHWC-flatten positions of the (10,10,8) conv3 output to the NCHW
    # flatten indices PyTorch's Linear columns use.
    H3, W3, C3 = 10, 10, 8
    perm = np.arange(C3 * H3 * W3).reshape(C3, H3, W3).transpose(1, 2, 0).reshape(-1)

    return {
        "c1_w": conv_pack(tp["conv1_w"]), "c1_b": tp["conv1_b"].reshape(1, -1),
        "c2_w": conv_pack(tp["conv2_w"]), "c2_b": tp["conv2_b"].reshape(1, -1),
        "c3_w": conv_pack(tp["conv3_w"]), "c3_b": tp["conv3_b"].reshape(1, -1),
        "w14": tp["d14_w"][:, perm].T.astype(jnp.bfloat16),
        "b14": tp["d14_b"].reshape(1, -1),
        "w24": tp["d24_w"][:, perm].T.astype(jnp.bfloat16),
        "b24": tp["d24_b"].reshape(1, -1),
        # dense15 column replicated to action_size: torch `.expand()` -> matmul.
        "w15": jnp.tile(tp["d15_w"].T, (1, action_size)).astype(jnp.bfloat16),
        "b15": jnp.tile(tp["d15_b"], (action_size,)).reshape(1, -1),
        "w25": tp["d25_w"].T.astype(jnp.bfloat16),
        "b25": tp["d25_b"].reshape(1, -1),
    }


@jax.jit
def qnetwork_duel_forward(packed, state_nchw):
    """state: (N, state_size, 80, 80) f32 NCHW, like the PyTorch module."""
    x = jnp.transpose(state_nchw, (0, 2, 3, 1)).astype(jnp.bfloat16)  # NHWC once
    x = conv2d_relu(x, packed["c1_w"], packed["c1_b"])
    x = conv2d_relu(x, packed["c2_w"], packed["c2_b"])
    x = conv2d_relu(x, packed["c3_w"], packed["c3_b"])
    x = x.reshape(x.shape[0], -1)   # NHWC flatten; dense columns pre-permuted
    return duel_head(x, packed)


# ---------------------------------------------------------------------------
# Pure-JAX f32 reference in PyTorch conventions (independent of kernel path)
# ---------------------------------------------------------------------------
def reference_forward(tp, state):
    dn = ("NCHW", "OIHW", "NCHW")

    def conv(x, w, b):
        y = jax.lax.conv_general_dilated(x, w, window_strides=(2, 2),
                                         padding=((1, 1), (1, 1)),
                                         dimension_numbers=dn)
        return jax.nn.relu(y + b.reshape(1, -1, 1, 1))

    x = conv(state, tp["conv1_w"], tp["conv1_b"])
    x = conv(x, tp["conv2_w"], tp["conv2_b"])
    x = conv(x, tp["conv3_w"], tp["conv3_b"])
    x = x.reshape(x.shape[0], -1)
    x1 = jax.nn.relu(x @ tp["d14_w"].T + tp["d14_b"])
    v = x1 @ tp["d15_w"].T + tp["d15_b"]                   # (B, 1) -> broadcast
    x2 = jax.nn.relu(x @ tp["d24_w"].T + tp["d24_b"])
    adv = x2 @ tp["d25_w"].T + tp["d25_b"]                 # (B, A)
    return v + adv - adv.mean(axis=1, keepdims=True)


if __name__ == "__main__":
    batch, state_size, action_size = 2, 4, 6
    key = jax.random.PRNGKey(0)
    pkey, xkey = jax.random.split(key)

    torch_params = init_torch_params(pkey, state_size, action_size)
    packed = pack_params(torch_params, action_size)

    # 80x80 spatial is implied by dense14's 10*10*8 input (80 -> 40 -> 20 -> 10).
    state = jax.random.normal(xkey, (batch, state_size, 80, 80), jnp.float32)

    out = jax.block_until_ready(qnetwork_duel_forward(packed, state))
    assert out.shape == (batch, action_size), out.shape

    ref = jax.block_until_ready(reference_forward(torch_params, state))
    np.testing.assert_allclose(np.asarray(out), np.asarray(ref), rtol=2e-2, atol=2e-2)

    print("KERNEL_OK")
</pallas_src>

<mosaic_0001>
module attributes {stable_mosaic.version = 11 : i64} {
  func.func @_gemm_bias_relu_kernel(%arg0: i32, %arg1: memref<1600x64xbf16, #tpu.memory_space<vmem>>, %arg2: memref<64x2xbf16, #tpu.memory_space<vmem>>, %arg3: memref<1x2xf32, #tpu.memory_space<vmem>>, %arg4: memref<1600x2xbf16, #tpu.memory_space<vmem>>) attributes {dimension_semantics = [#tpu.dimension_semantics<parallel>], iteration_bounds = array<i64: 2>, scalar_prefetch = 0 : i64, scratch_operands = 0 : i64, tpu.core_type = #tpu.core_type<tc>, window_params = [{transform_indices = @transform_0, window_bounds = array<i64: 1600, 64>}, {pipeline_mode = #tpu.pipeline_mode<synchronous>, transform_indices = @transform_1, window_bounds = array<i64: 64, 2>}, {pipeline_mode = #tpu.pipeline_mode<synchronous>, transform_indices = @transform_2, window_bounds = array<i64: 1, 2>}, {transform_indices = @transform_3, window_bounds = array<i64: 1600, 2>}]} {
    %c0 = arith.constant 0 : index
    %c0_0 = arith.constant 0 : index
    %0 = vector.load %arg1[%c0, %c0_0] : memref<1600x64xbf16, #tpu.memory_space<vmem>>, vector<1600x64xbf16>
    %c0_1 = arith.constant 0 : index
    %c0_2 = arith.constant 0 : index
    %1 = vector.load %arg2[%c0_1, %c0_2] : memref<64x2xbf16, #tpu.memory_space<vmem>>, vector<64x2xbf16>
    %cst = arith.constant dense<0.000000e+00> : vector<1600x2xf32>
    %2 = tpu.matmul %0, %1, %cst {dimension_numbers = #tpu.dot_dimension_numbers<[1], [0], [0], [1], [0, 0, 1, 1], [], []>} : vector<1600x64xbf16>, vector<64x2xbf16>, vector<1600x2xf32> -> vector<1600x2xf32>
    %c0_3 = arith.constant 0 : index
    %c0_4 = arith.constant 0 : index
    %3 = vector.load %arg3[%c0_3, %c0_4] : memref<1x2xf32, #tpu.memory_space<vmem>>, vector<1x2xf32>
    %4 = vector.broadcast %3 : vector<1x2xf32> to vector<1600x2xf32>
    %5 = arith.addf %2, %4 : vector<1600x2xf32>
    %cst_5 = arith.constant 0.000000e+00 : f32
    %6 = vector.broadcast %cst_5 : f32 to vector<1600x2xf32>
    %7 = arith.maximumf %5, %6 : vector<1600x2xf32>
    %8 = arith.truncf %7 : vector<1600x2xf32> to vector<1600x2xbf16>
    %c0_6 = arith.constant 0 : index
    %c0_7 = arith.constant 0 : index
    %9 = vector.load %arg4[%c0_6, %c0_7] : memref<1600x2xbf16, #tpu.memory_space<vmem>>, vector<1600x2xbf16>
    tpu.vector_store %arg4[%c0_6, %c0_7], %8 {strides = array<i32>} : memref<1600x2xbf16, #tpu.memory_space<vmem>>, vector<1600x2xbf16>,
    return
  }
  func.func @transform_0(%arg0: i32) -> (i32, i32) {
    %c0_i32 = arith.constant 0 : i32
    %c0_i32_0 = arith.constant 0 : i32
    return %arg0, %c0_i32 : i32, i32
  }
  func.func @transform_1(%arg0: i32) -> (i32, i32) {
    %c0_i32 = arith.constant 0 : i32
    %c0_i32_0 = arith.constant 0 : i32
    %c0_i32_1 = arith.constant 0 : i32
    return %c0_i32, %c0_i32_0 : i32, i32
  }
  func.func @transform_2(%arg0: i32) -> (i32, i32) {
    %c0_i32 = arith.constant 0 : i32
    %c0_i32_0 = arith.constant 0 : i32
    %c0_i32_1 = arith.constant 0 : i32
    return %c0_i32, %c0_i32_0 : i32, i32
  }
  func.func @transform_3(%arg0: i32) -> (i32, i32) {
    %c0_i32 = arith.constant 0 : i32
    %c0_i32_0 = arith.constant 0 : i32
    return %arg0, %c0_i32 : i32, i32
  }
}

module attributes {stable_mosaic.version = 11 : i64} {
  func.func @_gemm_bias_relu_kernel(%arg0: i32, %arg1: memref<400x32xbf16, #tpu.memory_space<vmem>>, %arg2: memref<32x4xbf16, #tpu.memory_space<vmem>>, %arg3: memref<1x4xf32, #tpu.memory_space<vmem>>, %arg4: memref<400x4xbf16, #tpu.memory_space<vmem>>) attributes {dimension_semantics = [#tpu.dimension_semantics<parallel>], iteration_bounds = array<i64: 2>, scalar_prefetch = 0 : i64, scratch_operands = 0 : i64, tpu.core_type = #tpu.core_type<tc>, window_params = [{transform_indices = @transform_0, window_bounds = array<i64: 400, 32>}, {pipeline_mode = #tpu.pipeline_mode<synchronous>, transform_indices = @transform_1, window_bounds = array<i64: 32, 4>}, {pipeline_mode = #tpu.pipeline_mode<synchronous>, transform_indices = @transform_2, window_bounds = array<i64: 1, 4>}, {transform_indices = @transform_3, window_bounds = array<i64: 400, 4>}]} {
    %c0 = arith.constant 0 : index
    %c0_0 = arith.constant 0 : index
    %0 = vector.load %arg1[%c0, %c0_0] : memref<400x32xbf16, #tpu.memory_space<vmem>>, vector<400x32xbf16>
    %c0_1 = arith.constant 0 : index
    %c0_2 = arith.constant 0 : index
    %1 = vector.load %arg2[%c0_1, %c0_2] : memref<32x4xbf16, #tpu.memory_space<vmem>>, vector<32x4xbf16>
    %cst = arith.constant dense<0.000000e+00> : vector<400x4xf32>
    %2 = tpu.matmul %0, %1, %cst {dimension_numbers = #tpu.dot_dimension_numbers<[1], [0], [0], [1], [0, 0, 1, 1], [], []>} : vector<400x32xbf16>, vector<32x4xbf16>, vector<400x4xf32> -> vector<400x4xf32>
    %c0_3 = arith.constant 0 : index
    %c0_4 = arith.constant 0 : index
    %3 = vector.load %arg3[%c0_3, %c0_4] : memref<1x4xf32, #tpu.memory_space<vmem>>, vector<1x4xf32>
    %4 = vector.broadcast %3 : vector<1x4xf32> to vector<400x4xf32>
    %5 = arith.addf %2, %4 : vector<400x4xf32>
    %cst_5 = arith.constant 0.000000e+00 : f32
    %6 = vector.broadcast %cst_5 : f32 to vector<400x4xf32>
    %7 = arith.maximumf %5, %6 : vector<400x4xf32>
    %8 = arith.truncf %7 : vector<400x4xf32> to vector<400x4xbf16>
    %c0_6 = arith.constant 0 : index
    %c0_7 = arith.constant 0 : index
    %9 = vector.load %arg4[%c0_6, %c0_7] : memref<400x4xbf16, #tpu.memory_space<vmem>>, vector<400x4xbf16>
    tpu.vector_store %arg4[%c0_6, %c0_7], %8 {strides = array<i32>} : memref<400x4xbf16, #tpu.memory_space<vmem>>, vector<400x4xbf16>,
    return
  }
  func.func @transform_0(%arg0: i32) -> (i32, i32) {
    %c0_i32 = arith.constant 0 : i32
    %c0_i32_0 = arith.constant 0 : i32
    return %arg0, %c0_i32 : i32, i32
  }
  func.func @transform_1(%arg0: i32) -> (i32, i32) {
    %c0_i32 = arith.constant 0 : i32
    %c0_i32_0 = arith.constant 0 : i32
    %c0_i32_1 = arith.constant 0 : i32
    return %c0_i32, %c0_i32_0 : i32, i32
  }
  func.func @transform_2(%arg0: i32) -> (i32, i32) {
    %c0_i32 = arith.constant 0 : i32
    %c0_i32_0 = arith.constant 0 : i32
    %c0_i32_1 = arith.constant 0 : i32
    return %c0_i32, %c0_i32_0 : i32, i32
  }
  func.func @transform_3(%arg0: i32) -> (i32, i32) {
    %c0_i32 = arith.constant 0 : i32
    %c0_i32_0 = arith.constant 0 : i32
    return %arg0, %c0_i32 : i32, i32
  }
}

module attributes {stable_mosaic.version = 11 : i64} {
  func.func @_gemm_bias_relu_kernel(%arg0: i32, %arg1: memref<200x64xbf16, #tpu.memory_space<vmem>>, %arg2: memref<64x8xbf16, #tpu.memory_space<vmem>>, %arg3: memref<1x8xf32, #tpu.memory_space<vmem>>, %arg4: memref<200x8xbf16, #tpu.memory_space<vmem>>) attributes {dimension_semantics = [#tpu.dimension_semantics<parallel>], iteration_bounds = array<i64: 1>, scalar_prefetch = 0 : i64, scratch_operands = 0 : i64, tpu.core_type = #tpu.core_type<tc>, window_params = [{transform_indices = @transform_0, window_bounds = array<i64: 200, 64>}, {pipeline_mode = #tpu.pipeline_mode<synchronous>, transform_indices = @transform_1, window_bounds = array<i64: 64, 8>}, {pipeline_mode = #tpu.pipeline_mode<synchronous>, transform_indices = @transform_2, window_bounds = array<i64: 1, 8>}, {transform_indices = @transform_3, window_bounds = array<i64: 200, 8>}]} {
    %c0 = arith.constant 0 : index
    %c0_0 = arith.constant 0 : index
    %0 = vector.load %arg1[%c0, %c0_0] : memref<200x64xbf16, #tpu.memory_space<vmem>>, vector<200x64xbf16>
    %c0_1 = arith.constant 0 : index
    %c0_2 = arith.constant 0 : index
    %1 = vector.load %arg2[%c0_1, %c0_2] : memref<64x8xbf16, #tpu.memory_space<vmem>>, vector<64x8xbf16>
    %cst = arith.constant dense<0.000000e+00> : vector<200x8xf32>
    %2 = tpu.matmul %0, %1, %cst {dimension_numbers = #tpu.dot_dimension_numbers<[1], [0], [0], [1], [0, 0, 1, 1], [], []>} : vector<200x64xbf16>, vector<64x8xbf16>, vector<200x8xf32> -> vector<200x8xf32>
    %c0_3 = arith.constant 0 : index
    %c0_4 = arith.constant 0 : index
    %3 = vector.load %arg3[%c0_3, %c0_4] : memref<1x8xf32, #tpu.memory_space<vmem>>, vector<1x8xf32>
    %4 = vector.broadcast %3 : vector<1x8xf32> to vector<200x8xf32>
    %5 = arith.addf %2, %4 : vector<200x8xf32>
    %cst_5 = arith.constant 0.000000e+00 : f32
    %6 = vector.broadcast %cst_5 : f32 to vector<200x8xf32>
    %7 = arith.maximumf %5, %6 : vector<200x8xf32>
    %8 = arith.truncf %7 : vector<200x8xf32> to vector<200x8xbf16>
    %c0_6 = arith.constant 0 : index
    %c0_7 = arith.constant 0 : index
    %9 = vector.load %arg4[%c0_6, %c0_7] : memref<200x8xbf16, #tpu.memory_space<vmem>>, vector<200x8xbf16>
    tpu.vector_store %arg4[%c0_6, %c0_7], %8 {strides = array<i32>} : memref<200x8xbf16, #tpu.memory_space<vmem>>, vector<200x8xbf16>,
    return
  }
  func.func @transform_0(%arg0: i32) -> (i32, i32) {
    %c0_i32 = arith.constant 0 : i32
    %c0_i32_0 = arith.constant 0 : i32
    return %arg0, %c0_i32 : i32, i32
  }
  func.func @transform_1(%arg0: i32) -> (i32, i32) {
    %c0_i32 = arith.constant 0 : i32
    %c0_i32_0 = arith.constant 0 : i32
    %c0_i32_1 = arith.constant 0 : i32
    return %c0_i32, %c0_i32_0 : i32, i32
  }
  func.func @transform_2(%arg0: i32) -> (i32, i32) {
    %c0_i32 = arith.constant 0 : i32
    %c0_i32_0 = arith.constant 0 : i32
    %c0_i32_1 = arith.constant 0 : i32
    return %c0_i32, %c0_i32_0 : i32, i32
  }
  func.func @transform_3(%arg0: i32) -> (i32, i32) {
    %c0_i32 = arith.constant 0 : i32
    %c0_i32_0 = arith.constant 0 : i32
    return %arg0, %c0_i32 : i32, i32
  }
}

module attributes {stable_mosaic.version = 11 : i64} {
  func.func @_duel_head_kernel(%arg0: i32, %arg1: memref<2x800xbf16, #tpu.memory_space<vmem>>, %arg2: memref<800x400xbf16, #tpu.memory_space<vmem>>, %arg3: memref<1x400xf32, #tpu.memory_space<vmem>>, %arg4: memref<400x6xbf16, #tpu.memory_space<vmem>>, %arg5: memref<1x6xf32, #tpu.memory_space<vmem>>, %arg6: memref<800x400xbf16, #tpu.memory_space<vmem>>, %arg7: memref<1x400xf32, #tpu.memory_space<vmem>>, %arg8: memref<400x6xbf16, #tpu.memory_space<vmem>>, %arg9: memref<1x6xf32, #tpu.memory_space<vmem>>, %arg10: memref<2x6xf32, #tpu.memory_space<vmem>>) attributes {dimension_semantics = [#tpu.dimension_semantics<arbitrary>], iteration_bounds = array<i64: 1>, scalar_prefetch = 0 : i64, scratch_operands = 0 : i64, tpu.core_type = #tpu.core_type<tc>, window_params = [{pipeline_mode = #tpu.pipeline_mode<synchronous>, transform_indices = @transform_0, window_bounds = array<i64: 2, 800>}, {pipeline_mode = #tpu.pipeline_mode<synchronous>, transform_indices = @transform_1, window_bounds = array<i64: 800, 400>}, {pipeline_mode = #tpu.pipeline_mode<synchronous>, transform_indices = @transform_2, window_bounds = array<i64: 1, 400>}, {pipeline_mode = #tpu.pipeline_mode<synchronous>, transform_indices = @transform_3, window_bounds = array<i64: 400, 6>}, {pipeline_mode = #tpu.pipeline_mode<synchronous>, transform_indices = @transform_4, window_bounds = array<i64: 1, 6>}, {pipeline_mode = #tpu.pipeline_mode<synchronous>, transform_indices = @transform_5, window_bounds = array<i64: 800, 400>}, {pipeline_mode = #tpu.pipeline_mode<synchronous>, transform_indices = @transform_6, window_bounds = array<i64: 1, 400>}, {pipeline_mode = #tpu.pipeline_mode<synchronous>, transform_indices = @transform_7, window_bounds = array<i64: 400, 6>}, {pipeline_mode = #tpu.pipeline_mode<synchronous>, transform_indices = @transform_8, window_bounds = array<i64: 1, 6>}, {pipeline_mode = #tpu.pipeline_mode<synchronous>, transform_indices = @transform_9, window_bounds = array<i64: 2, 6>}]} {
    %c0 = arith.constant 0 : index
    %c0_0 = arith.constant 0 : index
    %0 = vector.load %arg1[%c0, %c0_0] : memref<2x800xbf16, #tpu.memory_space<vmem>>, vector<2x800xbf16>
    %c0_1 = arith.constant 0 : index
    %c0_2 = arith.constant 0 : index
    %1 = vector.load %arg2[%c0_1, %c0_2] : memref<800x400xbf16, #tpu.memory_space<vmem>>, vector<800x400xbf16>
    %cst = arith.constant dense<0.000000e+00> : vector<2x400xf32>
    %2 = tpu.matmul %0, %1, %cst {dimension_numbers = #tpu.dot_dimension_numbers<[1], [0], [0], [1], [0, 0, 1, 1], [], []>} : vector<2x800xbf16>, vector<800x400xbf16>, vector<2x400xf32> -> vector<2x400xf32>
    %c0_3 = arith.constant 0 : index
    %c0_4 = arith.constant 0 : index
    %3 = vector.load %arg3[%c0_3, %c0_4] : memref<1x400xf32, #tpu.memory_space<vmem>>, vector<1x400xf32>
    %4 = vector.broadcast %3 : vector<1x400xf32> to vector<2x400xf32>
    %5 = arith.addf %2, %4 : vector<2x400xf32>
    %cst_5 = arith.constant 0.000000e+00 : f32
    %6 = vector.broadcast %cst_5 : f32 to vector<2x400xf32>
    %7 = arith.maximumf %5, %6 : vector<2x400xf32>
    %8 = arith.truncf %7 : vector<2x400xf32> to vector<2x400xbf16>
    %c0_6 = arith.constant 0 : index
    %c0_7 = arith.constant 0 : index
    %9 = vector.load %arg4[%c0_6, %c0_7] : memref<400x6xbf16, #tpu.memory_space<vmem>>, vector<400x6xbf16>
    %cst_8 = arith.constant dense<0.000000e+00> : vector<2x6xf32>
    %10 = tpu.matmul %8, %9, %cst_8 {dimension_numbers = #tpu.dot_dimension_numbers<[1], [0], [0], [1], [0, 0, 1, 1], [], []>} : vector<2x400xbf16>, vector<400x6xbf16>, vector<2x6xf32> -> vector<2x6xf32>
    %c0_9 = arith.constant 0 : index
    %c0_10 = arith.constant 0 : index
    %11 = vector.load %arg5[%c0_9, %c0_10] : memref<1x6xf32, #tpu.memory_space<vmem>>, vector<1x6xf32>
    %12 = vector.broadcast %11 : vector<1x6xf32> to vector<2x6xf32>
    %13 = arith.addf %10, %12 : vector<2x6xf32>
    %c0_11 = arith.constant 0 : index
    %c0_12 = arith.constant 0 : index
    %14 = vector.load %arg6[%c0_11, %c0_12] : memref<800x400xbf16, #tpu.memory_space<vmem>>, vector<800x400xbf16>
    %cst_13 = arith.constant dense<0.000000e+00> : vector<2x400xf32>
    %15 = tpu.matmul %0, %14, %cst_13 {dimension_numbers = #tpu.dot_dimension_numbers<[1], [0], [0], [1], [0, 0, 1, 1], [], []>} : vector<2x800xbf16>, vector<800x400xbf16>, vector<2x400xf32> -> vector<2x400xf32>
    %c0_14 = arith.constant 0 : index
    %c0_15 = arith.constant 0 : index
    %16 = vector.load %arg7[%c0_14, %c0_15] : memref<1x400xf32, #tpu.memory_space<vmem>>, vector<1x400xf32>
    %17 = vector.broadcast %16 : vector<1x400xf32> to vector<2x400xf32>
    %18 = arith.addf %15, %17 : vector<2x400xf32>
    %cst_16 = arith.constant 0.000000e+00 : f32
    %19 = vector.broadcast %cst_16 : f32 to vector<2x400xf32>
    %20 = arith.maximumf %18, %19 : vector<2x400xf32>
    %21 = arith.truncf %20 : vector<2x400xf32> to vector<2x400xbf16>
    %c0_17 = arith.constant 0 : index
    %c0_18 = arith.constant 0 : index
    %22 = vector.load %arg8[%c0_17, %c0_18] : memref<400x6xbf16, #tpu.memory_space<vmem>>, vector<400x6xbf16>
    %cst_19 = arith.constant dense<0.000000e+00> : vector<2x6xf32>
    %23 = tpu.matmul %21, %22, %cst_19 {dimension_numbers = #tpu.dot_dimension_numbers<[1], [0], [0], [1], [0, 0, 1, 1], [], []>} : vector<2x400xbf16>, vector<400x6xbf16>, vector<2x6xf32> -> vector<2x6xf32>
    %c0_20 = arith.constant 0 : index
    %c0_21 = arith.constant 0 : index
    %24 = vector.load %arg9[%c0_20, %c0_21] : memref<1x6xf32, #tpu.memory_space<vmem>>, vector<1x6xf32>
    %25 = vector.broadcast %24 : vector<1x6xf32> to vector<2x6xf32>
    %26 = arith.addf %23, %25 : vector<2x6xf32>
    %27 = arith.addf %13, %26 : vector<2x6xf32>
    %cst_22 = arith.constant dense<0.000000e+00> : vector<2xf32>
    %28 = vector.multi_reduction <add>, %26, %cst_22 [1] : vector<2x6xf32> to vector<2xf32>
    %29 = vector.shape_cast %28 : vector<2xf32> to vector<2x1xf32>
    %cst_23 = arith.constant 6.000000e+00 : f32
    %30 = vector.broadcast %cst_23 : f32 to vector<2x1xf32>
    %31 = arith.divf %29, %30 : vector<2x1xf32>
    %32 = vector.broadcast %31 : vector<2x1xf32> to vector<2x6xf32>
    %33 = arith.subf %27, %32 : vector<2x6xf32>
    %c0_24 = arith.constant 0 : index
    %c0_25 = arith.constant 0 : index
    %34 = vector.load %arg10[%c0_24, %c0_25] : memref<2x6xf32, #tpu.memory_space<vmem>>, vector<2x6xf32>
    tpu.vector_store %arg10[%c0_24, %c0_25], %33 {strides = array<i32>} : memref<2x6xf32, #tpu.memory_space<vmem>>, vector<2x6xf32>,
    return
  }
  func.func @transform_0(%arg0: i32) -> (i32, i32) {
    %c0_i32 = arith.constant 0 : i32
    %c0_i32_0 = arith.constant 0 : i32
    %c0_i32_1 = arith.constant 0 : i32
    return %c0_i32, %c0_i32_0 : i32, i32
  }
  func.func @transform_1(%arg0: i32) -> (i32, i32) {
    %c0_i32 = arith.constant 0 : i32
    %c0_i32_0 = arith.constant 0 : i32
    %c0_i32_1 = arith.constant 0 : i32
    return %c0_i32, %c0_i32_0 : i32, i32
  }
  func.func @transform_2(%arg0: i32) -> (i32, i32) {
    %c0_i32 = arith.constant 0 : i32
    %c0_i32_0 = arith.constant 0 : i32
    %c0_i32_1 = arith.constant 0 : i32
    return %c0_i32, %c0_i32_0 : i32, i32
  }
  func.func @transform_3(%arg0: i32) -> (i32, i32) {
    %c0_i32 = arith.constant 0 : i32
    %c0_i32_0 = arith.constant 0 : i32
    %c0_i32_1 = arith.constant 0 : i32
    return %c0_i32, %c0_i32_0 : i32, i32
  }
  func.func @transform_4(%arg0: i32) -> (i32, i32) {
    %c0_i32 = arith.constant 0 : i32
    %c0_i32_0 = arith.constant 0 : i32
    %c0_i32_1 = arith.constant 0 : i32
    return %c0_i32, %c0_i32_0 : i32, i32
  }
  func.func @transform_5(%arg0: i32) -> (i32, i32) {
    %c0_i32 = arith.constant 0 : i32
    %c0_i32_0 = arith.constant 0 : i32
    %c0_i32_1 = arith.constant 0 : i32
    return %c0_i32, %c0_i32_0 : i32, i32
  }
  func.func @transform_6(%arg0: i32) -> (i32, i32) {
    %c0_i32 = arith.constant 0 : i32
    %c0_i32_0 = arith.constant 0 : i32
    %c0_i32_1 = arith.constant 0 : i32
    return %c0_i32, %c0_i32_0 : i32, i32
  }
  func.func @transform_7(%arg0: i32) -> (i32, i32) {
    %c0_i32 = arith.constant 0 : i32
    %c0_i32_0 = arith.constant 0 : i32
    %c0_i32_1 = arith.constant 0 : i32
    return %c0_i32, %c0_i32_0 : i32, i32
  }
  func.func @transform_8(%arg0: i32) -> (i32, i32) {
    %c0_i32 = arith.constant 0 : i32
    %c0_i32_0 = arith.constant 0 : i32
    %c0_i32_1 = arith.constant 0 : i32
    return %c0_i32, %c0_i32_0 : i32, i32
  }
  func.func @transform_9(%arg0: i32) -> (i32, i32) {
    %c0_i32 = arith.constant 0 : i32
    %c0_i32_0 = arith.constant 0 : i32
    %c0_i32_1 = arith.constant 0 : i32
    return %c0_i32, %c0_i32_0 : i32, i32
  }
}

</mosaic_0001>

<bundles_post_ra>
// kernel: qnetwork_duel_forward.4
= control target key start
LH: loop header
LB: loop body
LE: loop exit
PB: predicated region body
PF: predicated region fallthrough
CT: control target
= control target key end

     0   :  { %s4380_s12 = smov 0   ;;  %s5230_s0 = inlined_call_operand.vmem [shape: bf16[3200,64], index: 0, kind: input, shape index: {}]   ;;  %s5231_s1 = inlined_call_operand.vmem [shape: bf16[64,2], index: 1, kind: input, shape index: {}]   ;;  %s5232_s2 = inlined_call_operand.vmem [shape: f32[1,2], index: 2, kind: input, shape index: {}]   ;;  %s5233_s3 = inlined_call_operand.vmem [shape: bf16[3200,2], index: 3, kind: output, shape index: {}]  }
   0x1 LB: > { %s3305_s13 = sadd.s32 4294967295, %s4358_s12   ;;  %p3309_p0 = scmp.ge.s32.totalorder %s4358_s12, 1  ;;  %s4358_s12 = sphi %s4380_s12, %s13_s12  }
   0x2   : > { %p138_p1 = scmp.lt.s32.totalorder %s4358_s12, 3 }
   0x4   : > { %p139_p2 = pnand %p3309_p0, %p138_p1 }
   0x5   : > { %v4247_v0 = vld [vmem:[%s5231_s1] sm:$0xff] (!%p139_p2)   ;;  %s162_s16 = smul.u32 (!%p139_p2), 200, %s3305_s13  ;;  %v4248_v1 = vld [vmem:[%s5231_s1 + $0x8] sm:$0xff] (!%p139_p2)   ;;  %v4249_v2 = vld [vmem:[%s5231_s1 + $0x10] sm:$0xff] (!%p139_p2)   ;;  %vm914_vm0 = vcmask (!%p139_p2), 523264   ;;  %vm3048_vm1 = vcmask (!%p139_p2), 11264  }
   0x6   : > { %142 = sbr.rel (%p139_p2) target bundleno = 436 (0x1b4), region = 32  ;;  %4023 = vmatprep.subr.bf16.mxu0 (!%p139_p2), %v4247_v0  ;;  %4231 = vmatprep.subr.bf16.mxu1 (!%p139_p2), %v4247_v0  ;;  %v4250_v3 = vld [vmem:[%s5231_s1 + $0x18] sm:$0xff] (!%p139_p2)  }
   0x7   : > { %p163_p3 = scmp.lt.s32.totalorder (!%p139_p2), %s162_s16, 399  ;;  %4024 = vmatpush3.bf16.msra.mxu0 (!%p139_p2), %v4247_v0  ;;  %4235 = vmatpush3.bf16.msra.mxu1 (!%p139_p2), %v4247_v0 }
   0x8   : > { %4025 = vmatprep.subr.bf16.mxu0 (!%p139_p2), %v4248_v1  ;;  %4232 = vmatprep.subr.bf16.mxu1 (!%p139_p2), %v4248_v1 }
   0xb   : > { %4026 = vmatpush3.bf16.msra.mxu0 (!%p139_p2), %v4248_v1  ;;  %4236 = vmatpush3.bf16.msra.mxu1 (!%p139_p2), %v4248_v1 }
   0xc   : > { %4027 = vmatprep.subr.bf16.mxu0 (!%p139_p2), %v4249_v2  ;;  %4233 = vmatprep.subr.bf16.mxu1 (!%p139_p2), %v4249_v2 }
   0xd   : > { %s5235_s16 = smov (!%p163_p3, %s162_s16), 399 }
   0xe   : > { %s3310_s21 = sshll.u32 %s5235_s16, 2 }
   0xf   : > { %s4408_s26 = scalar_lea.vmem %s5230_s0, %s3310_s21  ;;  %4028 = vmatpush3.bf16.msra.mxu0 %v4249_v2  ;;  %4237 = vmatpush3.bf16.msra.mxu1 %v4249_v2  ;;  %s4626_s4 = scalar_lea.vmem %s5233_s3, %s3310_s21 }
  0x10   : > { %v4251_v4 = vld [vmem:[%s4408_s26] sm:$0xff]   ;;  %v4252_v5 = vld [vmem:[%s4408_s26 + $0x190] sm:$0xff]   ;;  %4029 = vmatprep.subr.bf16.mxu0 %v4250_v3  ;;  %4234 = vmatprep.subr.bf16.mxu1 %v4250_v3  ;;  %v4253_v6 = vld [vmem:[%s4408_s26 + $0x8] sm:$0xff]  }
  0x11   : > { %4031 = vmatprep.mubr.msk.bf16.mxu0 %vm914_vm0, %v4251_v4  ;;  %4131 = vmatprep.mubr.msk.bf16.mxu1 %vm914_vm0, %v4252_v5  ;;  %v4254_v7 = vld [vmem:[%s4408_s26 + $0x198] sm:$0xff]   ;;  %v4255_v8 = vld [vmem:[%s4408_s26 + $0x10] sm:$0xff]   ;;  %v4256_v9 = vld [vmem:[%s4408_s26 + $0x1a0] sm:$0xff]  }
  0x12   : > { %v4257_v10 = vld [vmem:[%s4408_s26 + $0x18] sm:$0xff]   ;;  %v4258_v11 = vld [vmem:[%s4408_s26 + $0x1a8] sm:$0xff]   ;;  %v4259_v12 = vld [vmem:[%s4408_s26 + $0x20] sm:$0xff]  }
  0x13   : > { %4030 = vmatpush3.bf16.msra.mxu0 %v4250_v3  ;;  %4238 = vmatpush3.bf16.msra.mxu1 %v4250_v3  ;;  %v4260_v13 = vld [vmem:[%s4408_s26 + $0x1b0] sm:$0xff]   ;;  %v4261_v14 = vld [vmem:[%s4408_s26 + $0x28] sm:$0xff]   ;;  %v4262_v15 = vld [vmem:[%s4408_s26 + $0x1b8] sm:$0xff]  }
  0x14   : > { %v4263_v16 = vld [vmem:[%s4408_s26 + $0x30] sm:$0xff]   ;;  %v4264_v17 = vld [vmem:[%s4408_s26 + $0x1c0] sm:$0xff]   ;;  %v4265_v18 = vld [vmem:[%s4408_s26 + $0x38] sm:$0xff]  }
  0x15   : > { %v4266_v19 = vld [vmem:[%s4408_s26 + $0x1c8] sm:$0xff]   ;;  %v4267_v20 = vld [vmem:[%s4408_s26 + $0x40] sm:$0xff]   ;;  %v4268_v21 = vld [vmem:[%s4408_s26 + $0x1d0] sm:$0xff]  }
  0x16   : > { %4032 = vmatmul.mubr.msk.bf16.vlgmr.msra.gmra.mrb[0].mxu0 %vm914_vm0, %v4253_v6  ;;  %4132 = vmatmul.mubr.msk.bf16.vlgmr.msra.gmra.mrb[0].mxu1 %vm914_vm0, %v4254_v7  ;;  %v4269_v22 = vld [vmem:[%s4408_s26 + $0x48] sm:$0xff]   ;;  %v4270_v23 = vld [vmem:[%s4408_s26 + $0x1d8] sm:$0xff]   ;;  %v4271_v24 = vld [vmem:[%s4408_s26 + $0x50] sm:$0xff]  }
  0x17   : > { %4035 = vmatprep.mubr.msk.bf16.mxu0 %vm914_vm0, %v4255_v8  ;;  %4135 = vmatprep.mubr.msk.bf16.mxu1 %vm914_vm0, %v4256_v9  ;;  %v4272_v25 = vld [vmem:[%s4408_s26 + $0x1e0] sm:$0xff]   ;;  %v4273_v26 = vld [vmem:[%s4408_s26 + $0x58] sm:$0xff]   ;;  %v4274_v27 = vld [vmem:[%s4408_s26 + $0x1e8] sm:$0xff]  }
  0x18   : > { %v4275_v28 = vld [vmem:[%s4408_s26 + $0x60] sm:$0xff]   ;;  %v4276_v29 = vld [vmem:[%s4408_s26 + $0x1f0] sm:$0xff]   ;;  %v4277_v30 = vld [vmem:[%s4408_s26 + $0x68] sm:$0xff]  }
  0x19   : > { %v4278_v31 = vld [vmem:[%s4408_s26 + $0x1f8] sm:$0xff]   ;;  %v4279_v32 = vld [vmem:[%s4408_s26 + $0x70] sm:$0xff]   ;;  %v4280_v33 = vld [vmem:[%s4408_s26 + $0x200] sm:$0xff]  }
  0x1a   : > { %v4281_v34 = vld [vmem:[%s4408_s26 + $0x78] sm:$0xff]   ;;  %v4282_v35 = vld [vmem:[%s4408_s26 + $0x208] sm:$0xff]   ;;  %v4283_v36 = vld [vmem:[%s4408_s26 + $0x80] sm:$0xff]  }
  0x1b   : > { %v4284_v37 = vld [vmem:[%s4408_s26 + $0x210] sm:$0xff]   ;;  %v4285_v38 = vld [vmem:[%s4408_s26 + $0x88] sm:$0xff]   ;;  %v4286_v39 = vld [vmem:[%s4408_s26 + $0x218] sm:$0xff]  }
  0x1c   : > { %v4287_v40 = vld [vmem:[%s4408_s26 + $0x90] sm:$0xff]   ;;  %v4288_v41 = vld [vmem:[%s4408_s26 + $0x220] sm:$0xff]   ;;  %v4289_v42 = vld [vmem:[%s4408_s26 + $0x98] sm:$0xff]  }
  0x1d   : > { %v4290_v43 = vld [vmem:[%s4408_s26 + $0x228] sm:$0xff]   ;;  %v4291_v44 = vld [vmem:[%s4408_s26 + $0xa0] sm:$0xff]   ;;  %v4292_v45 = vld [vmem:[%s4408_s26 + $0x230] sm:$0xff]  }
  0x1e   : > { %4036 = vmatmul.mubr.msk.bf16.gmra.mrb[4].mxu0 %vm914_vm0, %v4257_v10  ;;  %4136 = vmatmul.mubr.msk.bf16.gmra.mrb[4].mxu1 %vm914_vm0, %v4258_v11  ;;  %v4293_v46 = vld [vmem:[%s4408_s26 + $0xa8] sm:$0xff]   ;;  %v4294_v47 = vld [vmem:[%s4408_s26 + $0x238] sm:$0xff]   ;;  %v4295_v48 = vld [vmem:[%s4408_s26 + $0xb0] sm:$0xff]  }
  0x1f   : > { %4039 = vmatprep.mubr.msk.bf16.mxu0 %vm914_vm0, %v4259_v12  ;;  %4139 = vmatprep.mubr.msk.bf16.mxu1 %vm914_vm0, %v4260_v13  ;;  %v4296_v49 = vld [vmem:[%s4408_s26 + $0x240] sm:$0xff]   ;;  %v4297_v50 = vld [vmem:[%s4408_s26 + $0xb8] sm:$0xff]   ;;  %v4298_v51 = vld [vmem:[%s4408_s26 + $0x248] sm:$0xff]  }
  0x20   : > { %v4299_v52 = vld [vmem:[%s4408_s26 + $0xc0] sm:$0xff]   ;;  %v4300_v53 = vld [vmem:[%s4408_s26 + $0x250] sm:$0xff]   ;;  %v4301_v54 = vld [vmem:[%s4408_s26 + $0xc8] sm:$0xff]  }
  0x21   : > { %v4302_v55 = vld [vmem:[%s4408_s26 + $0x258] sm:$0xff]   ;;  %v4303_v56 = vld [vmem:[%s4408_s26 + $0xd0] sm:$0xff]   ;;  %v4304_v57 = vld [vmem:[%s4408_s26 + $0x260] sm:$0xff]  }
  0x22   : > { %v4305_v58 = vld [vmem:[%s4408_s26 + $0xd8] sm:$0xff]   ;;  %v4306_v59 = vld [vmem:[%s4408_s26 + $0x268] sm:$0xff]   ;;  %v4307_v60 = vld [vmem:[%s4408_s26 + $0xe0] sm:$0xff]  }
  0x23   : > { %v4308_v61 = vld [vmem:[%s4408_s26 + $0x270] sm:$0xff]   ;;  %v4309_v62 = vld [vmem:[%s4408_s26 + $0xe8] sm:$0xff]   ;;  %v4310_v63 = vld [vmem:[%s4408_s26 + $0x278] sm:$0xff]  }
  0x24   : > { %v4311_v0 = vld [vmem:[%s4408_s26 + $0xf0] sm:$0xff]   ;;  %v4312_v1 = vld [vmem:[%s4408_s26 + $0x280] sm:$0xff]   ;;  %v4313_v2 = vld [vmem:[%s4408_s26 + $0xf8] sm:$0xff]  }
  0x25   : > { %v4314_v3 = vld [vmem:[%s4408_s26 + $0x288] sm:$0xff]   ;;  %v4315_v4 = vld [vmem:[%s4408_s26 + $0x100] sm:$0xff]   ;;  %v4316_v5 = vld [vmem:[%s4408_s26 + $0x290] sm:$0xff]  }
  0x26   : > { %4040 = vmatmul.mubr.msk.bf16.gmra.mrb[8].mxu0 %vm914_vm0, %v4261_v14  ;;  %4140 = vmatmul.mubr.msk.bf16.gmra.mrb[8].mxu1 %vm914_vm0, %v4262_v15  ;;  %v4317_v6 = vld [vmem:[%s4408_s26 + $0x108] sm:$0xff]   ;;  %v4318_v7 = vld [vmem:[%s4408_s26 + $0x298] sm:$0xff]   ;;  %v4319_v8 = vld [vmem:[%s4408_s26 + $0x110] sm:$0xff]  }
  0x27   : > { %4043 = vmatprep.mubr.msk.bf16.mxu0 %vm914_vm0, %v4263_v16  ;;  %4143 = vmatprep.mubr.msk.bf16.mxu1 %vm914_vm0, %v4264_v17  ;;  %v4320_v9 = vld [vmem:[%s4408_s26 + $0x2a0] sm:$0xff]   ;;  %v4321_v10 = vld [vmem:[%s4408_s26 + $0x118] sm:$0xff]   ;;  %v4322_v11 = vld [vmem:[%s4408_s26 + $0x2a8] sm:$0xff]  }
  0x28   : > { %v4323_v12 = vld [vmem:[%s4408_s26 + $0x120] sm:$0xff]   ;;  %v4324_v13 = vld [vmem:[%s4408_s26 + $0x2b0] sm:$0xff]   ;;  %v4325_v14 = vld [vmem:[%s4408_s26 + $0x128] sm:$0xff]  }
  0x29   : > { %v4326_v15 = vld [vmem:[%s4408_s26 + $0x2b8] sm:$0xff]   ;;  %v4327_v16 = vld [vmem:[%s4408_s26 + $0x130] sm:$0xff]   ;;  %v4328_v17 = vld [vmem:[%s4408_s26 + $0x2c0] sm:$0xff]  }
  0x2e   : > { %4044 = vmatmul.mubr.msk.bf16.gmra.mrb[12].mxu0 %vm914_vm0, %v4265_v18  ;;  %4144 = vmatmul.mubr.msk.bf16.gmra.mrb[12].mxu1 %vm914_vm0, %v4266_v19  ;;  %v4329_v18 = vld [vmem:[%s4408_s26 + $0x138] sm:$0xff]   ;;  %v4330_v19 = vld [vmem:[%s4408_s26 + $0x2c8] sm:$0xff]  }
  0x2f   : > { %4047 = vmatprep.mubr.msk.bf16.mxu0 %vm914_vm0, %v4267_v20  ;;  %4147 = vmatprep.mubr.msk.bf16.mxu1 %vm914_vm0, %v4268_v21  ;;  %v4331_v20 = vld [vmem:[%s4408_s26 + $0x140] sm:$0xff]   ;;  %v4332_v21 = vld [vmem:[%s4408_s26 + $0x2d0] sm:$0xff]  }
  0x36   : > { %4048 = vmatmul.mubr.msk.bf16.gmra.mrb[16].mxu0 %vm914_vm0, %v4269_v22  ;;  %4148 = vmatmul.mubr.msk.bf16.gmra.mrb[16].mxu1 %vm914_vm0, %v4270_v23  ;;  %v4333_v22 = vld [vmem:[%s4408_s26 + $0x148] sm:$0xff]   ;;  %v4334_v23 = vld [vmem:[%s4408_s26 + $0x2d8] sm:$0xff]  }
  0x37   : > { %4051 = vmatprep.mubr.msk.bf16.mxu0 %vm914_vm0, %v4271_v24  ;;  %4151 = vmatprep.mubr.msk.bf16.mxu1 %vm914_vm0, %v4272_v25  ;;  %v4335_v24 = vld [vmem:[%s4408_s26 + $0x150] sm:$0xff]   ;;  %v4336_v25 = vld [vmem:[%s4408_s26 + $0x2e0] sm:$0xff]  }
  0x3e   : > { %4052 = vmatmul.mubr.msk.bf16.gmra.mrb[20].mxu0 %vm914_vm0, %v4273_v26  ;;  %4152 = vmatmul.mubr.msk.bf16.gmra.mrb[20].mxu1 %vm914_vm0, %v4274_v27  ;;  %v4337_v26 = vld [vmem:[%s4408_s26 + $0x158] sm:$0xff]   ;;  %v4338_v27 = vld [vmem:[%s4408_s26 + $0x2e8] sm:$0xff]  }
  0x3f   : > { %4055 = vmatprep.mubr.msk.bf16.mxu0 %vm914_vm0, %v4275_v28  ;;  %4155 = vmatprep.mubr.msk.bf16.mxu1 %vm914_vm0, %v4276_v29  ;;  %v4339_v28 = vld [vmem:[%s4408_s26 + $0x160] sm:$0xff]   ;;  %v4340_v29 = vld [vmem:[%s4408_s26 + $0x2f0] sm:$0xff]  }
  0x46   : > { %4056 = vmatmul.mubr.msk.bf16.gmra.mrb[24].mxu0 %vm914_vm0, %v4277_v30  ;;  %4156 = vmatmul.mubr.msk.bf16.gmra.mrb[24].mxu1 %vm914_vm0, %v4278_v31  ;;  %v4341_v30 = vld [vmem:[%s4408_s26 + $0x168] sm:$0xff]   ;;  %v4342_v31 = vld [vmem:[%s4408_s26 + $0x2f8] sm:$0xff]  }
  0x47   : > { %4059 = vmatprep.mubr.msk.bf16.mxu0 %vm914_vm0, %v4279_v32  ;;  %4159 = vmatprep.mubr.msk.bf16.mxu1 %vm914_vm0, %v4280_v33  ;;  %v4343_v32 = vld [vmem:[%s4408_s26 + $0x170] sm:$0xff]   ;;  %v4344_v33 = vld [vmem:[%s4408_s26 + $0x300] sm:$0xff]  }
  0x4e   : > { %4060 = vmatmul.mubr.msk.bf16.gmra.mrb[28].mxu0 %vm914_vm0, %v4281_v34  ;;  %4160 = vmatmul.mubr.msk.bf16.gmra.mrb[28].mxu1 %vm914_vm0, %v4282_v35  ;;  %v4345_v34 = vld [vmem:[%s4408_s26 + $0x178] sm:$0xff]   ;;  %v4346_v35 = vld [vmem:[%s4408_s26 + $0x308] sm:$0xff]  }
  0x4f   : > { %4063 = vmatprep.mubr.msk.bf16.mxu0 %vm914_vm0, %v4283_v36  ;;  %4163 = vmatprep.mubr.msk.bf16.mxu1 %vm914_vm0, %v4284_v37  ;;  %v4347_v36 = vld [vmem:[%s4408_s26 + $0x180] sm:$0xff]   ;;  %v4348_v37 = vld [vmem:[%s4408_s26 + $0x310] sm:$0xff]  }
  0x56   : > { %4064 = vmatmul.mubr.msk.bf16.gmra.mrb[32].mxu0 %vm914_vm0, %v4285_v38  ;;  %4164 = vmatmul.mubr.msk.bf16.gmra.mrb[32].mxu1 %vm914_vm0, %v4286_v39  ;;  %v4349_v38 = vld [vmem:[%s4408_s26 + $0x188] sm:$0xff]   ;;  %v4350_v39 = vld [vmem:[%s4408_s26 + $0x318] sm:$0xff]  }
  0x57   : > { %4067 = vmatprep.mubr.msk.bf16.mxu0 %vm914_vm0, %v4287_v40  ;;  %4167 = vmatprep.mubr.msk.bf16.mxu1 %vm914_vm0, %v4288_v41  ;;  %v4613_v40 = vld [vmem:[%s5232_s2] ss:$0 sm:$0xff] }
  0x5e   : > { %4068 = vmatmul.mubr.msk.bf16.gmra.mrb[36].mxu0 %vm914_vm0, %v4289_v42  ;;  %4168 = vmatmul.mubr.msk.bf16.gmra.mrb[36].mxu1 %vm914_vm0, %v4290_v43 }
  0x5f   : > { %4071 = vmatprep.mubr.msk.bf16.mxu0 %vm914_vm0, %v4291_v44  ;;  %4171 = vmatprep.mubr.msk.bf16.mxu1 %vm914_vm0, %v4292_v45 }
  0x66   : > { %4072 = vmatmul.mubr.msk.bf16.gmra.mrb[40].mxu0 %vm914_vm0, %v4293_v46  ;;  %4172 = vmatmul.mubr.msk.bf16.gmra.mrb[40].mxu1 %vm914_vm0, %v4294_v47 }
  0x67   : > { %4075 = vmatprep.mubr.msk.bf16.mxu0 %vm914_vm0, %v4295_v48  ;;  %4175 = vmatprep.mubr.msk.bf16.mxu1 %vm914_vm0, %v4296_v49 }
  0x6e   : > { %4076 = vmatmul.mubr.msk.bf16.gmra.mrb[44].mxu0 %vm914_vm0, %v4297_v50  ;;  %4176 = vmatmul.mubr.msk.bf16.gmra.mrb[44].mxu1 %vm914_vm0, %v4298_v51 }
  0x6f   : > { %4079 = vmatprep.mubr.msk.bf16.mxu0 %vm914_vm0, %v4299_v52  ;;  %4179 = vmatprep.mubr.msk.bf16.mxu1 %vm914_vm0, %v4300_v53 }
  0x76   : > { %4080 = vmatmul.mubr.msk.bf16.gmra.mrb[48].mxu0 %vm914_vm0, %v4301_v54  ;;  %4180 = vmatmul.mubr.msk.bf16.gmra.mrb[48].mxu1 %vm914_vm0, %v4302_v55 }
  0x77   : > { %4083 = vmatprep.mubr.msk.bf16.mxu0 %vm914_vm0, %v4303_v56  ;;  %4183 = vmatprep.mubr.msk.bf16.mxu1 %vm914_vm0, %v4304_v57 }
  0x7e   : > { %4084 = vmatmul.mubr.msk.bf16.gmra.mrb[52].mxu0 %vm914_vm0, %v4305_v58  ;;  %4184 = vmatmul.mubr.msk.bf16.gmra.mrb[52].mxu1 %vm914_vm0, %v4306_v59 }
  0x7f   : > { %4087 = vmatprep.mubr.msk.bf16.mxu0 %vm914_vm0, %v4307_v60  ;;  %4187 = vmatprep.mubr.msk.bf16.mxu1 %vm914_vm0, %v4308_v61 }
  0x86   : > { %4088 = vmatmul.mubr.msk.bf16.gmra.mrb[56].mxu0 %vm914_vm0, %v4309_v62  ;;  %4188 = vmatmul.mubr.msk.bf16.gmra.mrb[56].mxu1 %vm914_vm0, %v4310_v63 }
  0x87   : > { %4091 = vmatprep.mubr.msk.bf16.mxu0 %vm914_vm0, %v4311_v0  ;;  %4191 = vmatprep.mubr.msk.bf16.mxu1 %vm914_vm0, %v4312_v1 }
  0x8e   : > { %4092 = vmatmul.mubr.msk.bf16.gmra.mrb[60].mxu0 %vm914_vm0, %v4313_v2  ;;  %4192 = vmatmul.mubr.msk.bf16.gmra.mrb[60].mxu1 %vm914_vm0, %v4314_v3 }
  0x8f   : > { %4095 = vmatprep.mubr.msk.bf16.mxu0 %vm914_vm0, %v4315_v4  ;;  %4195 = vmatprep.mubr.msk.bf16.mxu1 %vm914_vm0, %v4316_v5 }
  0x96   : > { %4096 = vmatmul.mubr.msk.bf16.gmra.mrb[64].mxu0 %vm914_vm0, %v4317_v6  ;;  %4196 = vmatmul.mubr.msk.bf16.gmra.mrb[64].mxu1 %vm914_vm0, %v4318_v7 }
  0x97   : > { %4099 = vmatprep.mubr.msk.bf16.mxu0 %vm914_vm0, %v4319_v8  ;;  %4199 = vmatprep.mubr.msk.bf16.mxu1 %vm914_vm0, %v4320_v9 }
  0x9e   : > { %4100 = vmatmul.mubr.msk.bf16.gmra.mrb[68].mxu0 %vm914_vm0, %v4321_v10  ;;  %4200 = vmatmul.mubr.msk.bf16.gmra.mrb[68].mxu1 %vm914_vm0, %v4322_v11 }
  0x9f   : > { %4103 = vmatprep.mubr.msk.bf16.mxu0 %vm914_vm0, %v4323_v12  ;;  %4203 = vmatprep.mubr.msk.bf16.mxu1 %vm914_vm0, %v4324_v13 }
  0xa6   : > { %4104 = vmatmul.mubr.msk.bf16.gmra.mrb[72].mxu0 %vm914_vm0, %v4325_v14  ;;  %4204 = vmatmul.mubr.msk.bf16.gmra.mrb[72].mxu1 %vm914_vm0, %v4326_v15 }
  0xa7   : > { %4107 = vmatprep.mubr.msk.bf16.mxu0 %vm914_vm0, %v4327_v16  ;;  %4207 = vmatprep.mubr.msk.bf16.mxu1 %vm914_vm0, %v4328_v17 }
  0xae   : > { %4108 = vmatmul.mubr.msk.bf16.gmra.mrb[76].mxu0 %vm914_vm0, %v4329_v18  ;;  %4208 = vmatmul.mubr.msk.bf16.gmra.mrb[76].mxu1 %vm914_vm0, %v4330_v19 }
  0xaf   : > { %4111 = vmatprep.mubr.msk.bf16.mxu0 %vm914_vm0, %v4331_v20  ;;  %4211 = vmatprep.mubr.msk.bf16.mxu1 %vm914_vm0, %v4332_v21 }
  0xb6   : > { %4112 = vmatmul.mubr.msk.bf16.gmra.mrb[80].mxu0 %vm914_vm0, %v4333_v22  ;;  %4212 = vmatmul.mubr.msk.bf16.gmra.mrb[80].mxu1 %vm914_vm0, %v4334_v23 }
  0xb7   : > { %4115 = vmatprep.mubr.msk.bf16.mxu0 %vm914_vm0, %v4335_v24  ;;  %4215 = vmatprep.mubr.msk.bf16.mxu1 %vm914_vm0, %v4336_v25 }
  0xbe   : > { %4116 = vmatmul.mubr.msk.bf16.gmra.mrb[84].mxu0 %vm914_vm0, %v4337_v26  ;;  %4216 = vmatmul.mubr.msk.bf16.gmra.mrb[84].mxu1 %vm914_vm0, %v4338_v27 }
  0xbf   : > { %4119 = vmatprep.mubr.msk.bf16.mxu0 %vm914_vm0, %v4339_v28  ;;  %4219 = vmatprep.mubr.msk.bf16.mxu1 %vm914_vm0, %v4340_v29 }
  0xc6   : > { %4120 = vmatmul.mubr.msk.bf16.gmra.mrb[88].mxu0 %vm914_vm0, %v4341_v30  ;;  %4220 = vmatmul.mubr.msk.bf16.gmra.mrb[88].mxu1 %vm914_vm0, %v4342_v31 }
  0xc7   : > { %4123 = vmatprep.mubr.msk.bf16.mxu0 %vm914_vm0, %v4343_v32  ;;  %4223 = vmatprep.mubr.msk.bf16.mxu1 %vm914_vm0, %v4344_v33 }
  0xce   : > { %4124 = vmatmul.mubr.msk.bf16.gmra.mrb[92].mxu0 %vm914_vm0, %v4345_v34  ;;  %4224 = vmatmul.mubr.msk.bf16.gmra.mrb[92].mxu1 %vm914_vm0, %v4346_v35 }
  0xcf   : > { %4127 = vmatprep.mubr.msk.bf16.mxu0 %vm914_vm0, %v4347_v36  ;;  %4227 = vmatprep.mubr.msk.bf16.mxu1 %vm914_vm0, %v4348_v37 }
  0xd6   : > { %4128 = vmatmul.mubr.msk.bf16.gmra.mrb[96].mxu0 %vm914_vm0, %v4349_v38  ;;  %4228 = vmatmul.mubr.msk.bf16.gmra.mrb[96].mxu1 %vm914_vm0, %v4350_v39 }
  0xe9   : > { %v4033_v41 = vpop.f32.mrb[0].mxu0  ;;  %v4133_v42 = vpop.f32.mrb[0].mxu1 }
  0xea   : > { %v1258_v43 = vadd.f32 %v4033_v41, %v4613_v40  ;;  %v1658_v44 = vadd.f32 %v4133_v42, %v4613_v40  ;;  %v1249_v45 = vpop.f32.mrb[1].mxu0  ;;  %v1649_v46 = vpop.f32.mrb[1].mxu1 }
  0xeb   : > { %v1250_v47 = vadd.f32 %v4613_v40, %v1249_v45  ;;  %v1650_v48 = vadd.f32 %v4613_v40, %v1649_v46  ;;  %v4034_v49 = vpop.f32.mrb[2].mxu0  ;;  %v4134_v50 = vpop.f32.mrb[2].mxu1 }
  0xec   : > { %v2050_v51 = vmax.f32 %v1258_v43, 0.0  ;;  %v2150_v52 = vmax.f32 %v1658_v44, 0.0  ;;  %v1261_v53 = vadd.f32 %v4034_v49, %v4613_v40  ;;  %v1661_v54 = vadd.f32 %v4134_v50, %v4613_v40  ;;  %v1252_v55 = vpop.f32.mrb[3].mxu0  ;;  %v1652_v56 = vpop.f32.mrb[3].mxu1 }
  0xed   : > { %v2048_v57 = vmax.f32 %v1250_v47, 0.0  ;;  %v2148_v58 = vmax.f32 %v1650_v48, 0.0  ;;  %v1253_v59 = vadd.f32 %v4613_v40, %v1252_v55  ;;  %v1653_v60 = vadd.f32 %v4613_v40, %v1652_v56 }
  0xee   : > { %v3721_v61 = vpack.c.bf16 %v2050_v51, %v2050_v51  ;;  %v3821_v62 = vpack.c.bf16 %v2150_v52, %v2150_v52  ;;  %v2051_v63 = vmax.f32 %v1261_v53, 0.0  ;;  %v2151_v0 = vmax.f32 %v1661_v54, 0.0 }
  0xef   : > { %v3719_v1 = vpack.c.bf16 %v2048_v57, %v2048_v57  ;;  %v3819_v2 = vpack.c.bf16 %v2148_v58, %v2148_v58  ;;  %v2049_v3 = vmax.f32 %v1253_v59, 0.0  ;;  %v2149_v4 = vmax.f32 %v1653_v60, 0.0 }
  0xf0   : > { %3051 = vst.msk [vmem:[%s4626_s4 + $0x8] sm:$0xf] %vm3048_vm1, %v3721_v61  ;;  %3151 = vst.msk [vmem:[%s4626_s4 + $0x198] sm:$0xf] %vm3048_vm1, %v3821_v62  ;;  %v3722_v5 = vpack.c.bf16 %v2051_v63, %v2051_v63  ;;  %v3822_v6 = vpack.c.bf16 %v2151_v0, %v2151_v0 }
  0xf1   : > { %3049 = vst.msk [vmem:[%s4626_s4] sm:$0xf] %vm3048_vm1, %v3719_v1  ;;  %3149 = vst.msk [vmem:[%s4626_s4 + $0x190] sm:$0xf] %vm3048_vm1, %v3819_v2  ;;  %v3720_v7 = vpack.c.bf16 %v2049_v3, %v2049_v3  ;;  %v3820_v8 = vpack.c.bf16 %v2149_v4, %v2149_v4  ;;  %v4037_v9 = vpop.f32.mrb[4].mxu0  ;;  %v4137_v10 = vpop.f32.mrb[4].mxu1 }
  0xf2   : > { %3052 = vst.msk [vmem:[%s4626_s4 + $0xc] sm:$0xf] %vm3048_vm1, %v3722_v5  ;;  %3152 = vst.msk [vmem:[%s4626_s4 + $0x19c] sm:$0xf] %vm3048_vm1, %v3822_v6  ;;  %v1274_v11 = vadd.f32 %v4037_v9, %v4613_v40  ;;  %v1674_v12 = vadd.f32 %v4137_v10, %v4613_v40  ;;  %v1265_v13 = vpop.f32.mrb[5].mxu0  ;;  %v1665_v14 = vpop.f32.mrb[5].mxu1 }
  0xf3   : > { %3050 = vst.msk [vmem:[%s4626_s4 + $0x4] sm:$0xf] %vm3048_vm1, %v3720_v7  ;;  %3150 = vst.msk [vmem:[%s4626_s4 + $0x194] sm:$0xf] %vm3048_vm1, %v3820_v8  ;;  %v1266_v15 = vadd.f32 %v4613_v40, %v1265_v13  ;;  %v1666_v16 = vadd.f32 %v4613_v40, %v1665_v14  ;;  %v4038_v17 = vpop.f32.mrb[6].mxu0  ;;  %v4138_v18 = vpop.f32.mrb[6].mxu1 }
  0xf4   : > { %v2054_v19 = vmax.f32 %v1274_v11, 0.0  ;;  %v2154_v20 = vmax.f32 %v1674_v12, 0.0  ;;  %v1277_v21 = vadd.f32 %v4038_v17, %v4613_v40  ;;  %v1677_v22 = vadd.f32 %v4138_v18, %v4613_v40  ;;  %v1268_v23 = vpop.f32.mrb[7].mxu0  ;;  %v1668_v24 = vpop.f32.mrb[7].mxu1 }
  0xf5   : > { %v2052_v25 = vmax.f32 %v1266_v15, 0.0  ;;  %v2152_v26 = vmax.f32 %v1666_v16, 0.0  ;;  %v1269_v27 = vadd.f32 %v4613_v40, %v1268_v23  ;;  %v1669_v28 = vadd.f32 %v4613_v40, %v1668_v24 }
  0xf6   : > { %v3725_v29 = vpack.c.bf16 %v2054_v19, %v2054_v19  ;;  %v3825_v30 = vpack.c.bf16 %v2154_v20, %v2154_v20  ;;  %v2055_v31 = vmax.f32 %v1277_v21, 0.0  ;;  %v2155_v32 = vmax.f32 %v1677_v22, 0.0 }
  0xf7   : > { %v3723_v33 = vpack.c.bf16 %v2052_v25, %v2052_v25  ;;  %v3823_v34 = vpack.c.bf16 %v2152_v26, %v2152_v26  ;;  %v2053_v35 = vmax.f32 %v1269_v27, 0.0  ;;  %v2153_v36 = vmax.f32 %v1669_v28, 0.0 }
  0xf8   : > { %3055 = vst.msk [vmem:[%s4626_s4 + $0x18] sm:$0xf] %vm3048_vm1, %v3725_v29  ;;  %3155 = vst.msk [vmem:[%s4626_s4 + $0x1a8] sm:$0xf] %vm3048_vm1, %v3825_v30  ;;  %v3726_v37 = vpack.c.bf16 %v2055_v31, %v2055_v31  ;;  %v3826_v38 = vpack.c.bf16 %v2155_v32, %v2155_v32 }
  0xf9   : > { %3053 = vst.msk [vmem:[%s4626_s4 + $0x10] sm:$0xf] %vm3048_vm1, %v3723_v33  ;;  %3153 = vst.msk [vmem:[%s4626_s4 + $0x1a0] sm:$0xf] %vm3048_vm1, %v3823_v34  ;;  %v3724_v39 = vpack.c.bf16 %v2053_v35, %v2053_v35  ;;  %v3824_v41 = vpack.c.bf16 %v2153_v36, %v2153_v36  ;;  %v4041_v42 = vpop.f32.mrb[8].mxu0  ;;  %v4141_v43 = vpop.f32.mrb[8].mxu1 }
  0xfa   : > { %3056 = vst.msk [vmem:[%s4626_s4 + $0x1c] sm:$0xf] %vm3048_vm1, %v3726_v37  ;;  %3156 = vst.msk [vmem:[%s4626_s4 + $0x1ac] sm:$0xf] %vm3048_vm1, %v3826_v38  ;;  %v1290_v44 = vadd.f32 %v4041_v42, %v4613_v40  ;;  %v1690_v45 = vadd.f32 %v4141_v43, %v4613_v40  ;;  %v1281_v46 = vpop.f32.mrb[9].mxu0  ;;  %v1681_v47 = vpop.f32.mrb[9].mxu1 }
  0xfb   : > { %3054 = vst.msk [vmem:[%s4626_s4 + $0x14] sm:$0xf] %vm3048_vm1, %v3724_v39  ;;  %3154 = vst.msk [vmem:[%s4626_s4 + $0x1a4] sm:$0xf] %vm3048_vm1, %v3824_v41  ;;  %v1282_v48 = vadd.f32 %v4613_v40, %v1281_v46  ;;  %v1682_v49 = vadd.f32 %v4613_v40, %v1681_v47  ;;  %v4042_v50 = vpop.f32.mrb[10].mxu0  ;;  %v4142_v51 = vpop.f32.mrb[10].mxu1 }
  0xfc   : > { %v2058_v52 = vmax.f32 %v1290_v44, 0.0  ;;  %v2158_v53 = vmax.f32 %v1690_v45, 0.0  ;;  %v1293_v54 = vadd.f32 %v4042_v50, %v4613_v40  ;;  %v1693_v55 = vadd.f32 %v4142_v51, %v4613_v40  ;;  %v1284_v56 = vpop.f32.mrb[11].mxu0  ;;  %v1684_v57 = vpop.f32.mrb[11].mxu1 }
  0xfd   : > { %v2056_v58 = vmax.f32 %v1282_v48, 0.0  ;;  %v2156_v59 = vmax.f32 %v1682_v49, 0.0  ;;  %v1285_v60 = vadd.f32 %v4613_v40, %v1284_v56  ;;  %v1685_v61 = vadd.f32 %v4613_v40, %v1684_v57 }
  0xfe   : > { %v3729_v62 = vpack.c.bf16 %v2058_v52, %v2058_v52  ;;  %v3829_v63 = vpack.c.bf16 %v2158_v53, %v2158_v53  ;;  %v2059_v0 = vmax.f32 %v1293_v54, 0.0  ;;  %v2159_v1 = vmax.f32 %v1693_v55, 0.0 }
  0xff   : > { %v3727_v2 = vpack.c.bf16 %v2056_v58, %v2056_v58  ;;  %v3827_v3 = vpack.c.bf16 %v2156_v59, %v2156_v59  ;;  %v2057_v4 = vmax.f32 %v1285_v60, 0.0  ;;  %v2157_v5 = vmax.f32 %v1685_v61, 0.0 }
 0x100   : > { %3059 = vst.msk [vmem:[%s4626_s4 + $0x28] sm:$0xf] %vm3048_vm1, %v3729_v62  ;;  %3159 = vst.msk [vmem:[%s4626_s4 + $0x1b8] sm:$0xf] %vm3048_vm1, %v3829_v63  ;;  %v3730_v6 = vpack.c.bf16 %v2059_v0, %v2059_v0  ;;  %v3830_v7 = vpack.c.bf16 %v2159_v1, %v2159_v1 }
 0x101   : > { %3057 = vst.msk [vmem:[%s4626_s4 + $0x20] sm:$0xf] %vm3048_vm1, %v3727_v2  ;;  %3157 = vst.msk [vmem:[%s4626_s4 + $0x1b0] sm:$0xf] %vm3048_vm1, %v3827_v3  ;;  %v3728_v8 = vpack.c.bf16 %v2057_v4, %v2057_v4  ;;  %v3828_v9 = vpack.c.bf16 %v2157_v5, %v2157_v5  ;;  %v4045_v10 = vpop.f32.mrb[12].mxu0  ;;  %v4145_v11 = vpop.f32.mrb[12].mxu1 }
 0x102   : > { %3060 = vst.msk [vmem:[%s4626_s4 + $0x2c] sm:$0xf] %vm3048_vm1, %v3730_v6  ;;  %3160 = vst.msk [vmem:[%s4626_s4 + $0x1bc] sm:$0xf] %vm3048_vm1, %v3830_v7  ;;  %v1306_v12 = vadd.f32 %v4045_v10, %v4613_v40  ;;  %v1706_v13 = vadd.f32 %v4145_v11, %v4613_v40  ;;  %v1297_v14 = vpop.f32.mrb[13].mxu0  ;;  %v1697_v15 = vpop.f32.mrb[13].mxu1 }
 0x103   : > { %3058 = vst.msk [vmem:[%s4626_s4 + $0x24] sm:$0xf] %vm3048_vm1, %v3728_v8  ;;  %3158 = vst.msk [vmem:[%s4626_s4 + $0x1b4] sm:$0xf] %vm3048_vm1, %v3828_v9  ;;  %v1298_v16 = vadd.f32 %v4613_v40, %v1297_v14  ;;  %v1698_v17 = vadd.f32 %v4613_v40, %v1697_v15  ;;  %v4046_v18 = vpop.f32.mrb[14].mxu0  ;;  %v4146_v19 = vpop.f32.mrb[14].mxu1 }
 0x104   : > { %v2062_v20 = vmax.f32 %v1306_v12, 0.0  ;;  %v2162_v21 = vmax.f32 %v1706_v13, 0.0  ;;  %v1309_v22 = vadd.f32 %v4046_v18, %v4613_v40  ;;  %v1709_v23 = vadd.f32 %v4146_v19, %v4613_v40  ;;  %v1300_v24 = vpop.f32.mrb[15].mxu0  ;;  %v1700_v25 = vpop.f32.mrb[15].mxu1 }
 0x105   : > { %v2060_v26 = vmax.f32 %v1298_v16, 0.0  ;;  %v2160_v27 = vmax.f32 %v1698_v17, 0.0  ;;  %v1301_v28 = vadd.f32 %v4613_v40, %v1300_v24  ;;  %v1701_v29 = vadd.f32 %v4613_v40, %v1700_v25 }
 0x106   : > { %v3733_v30 = vpack.c.bf16 %v2062_v20, %v2062_v20  ;;  %v3833_v31 = vpack.c.bf16 %v2162_v21, %v2162_v21  ;;  %v2063_v32 = vmax.f32 %v1309_v22, 0.0  ;;  %v2163_v33 = vmax.f32 %v1709_v23, 0.0 }
 0x107   : > { %v3731_v34 = vpack.c.bf16 %v2060_v26, %v2060_v26  ;;  %v3831_v35 = vpack.c.bf16 %v2160_v27, %v2160_v27  ;;  %v2061_v36 = vmax.f32 %v1301_v28, 0.0  ;;  %v2161_v37 = vmax.f32 %v1701_v29, 0.0 }
 0x108   : > { %3063 = vst.msk [vmem:[%s4626_s4 + $0x38] sm:$0xf] %vm3048_vm1, %v3733_v30  ;;  %3163 = vst.msk [vmem:[%s4626_s4 + $0x1c8] sm:$0xf] %vm3048_vm1, %v3833_v31  ;;  %v3734_v38 = vpack.c.bf16 %v2063_v32, %v2063_v32  ;;  %v3834_v39 = vpack.c.bf16 %v2163_v33, %v2163_v33 }
 0x109   : > { %3061 = vst.msk [vmem:[%s4626_s4 + $0x30] sm:$0xf] %vm3048_vm1, %v3731_v34  ;;  %3161 = vst.msk [vmem:[%s4626_s4 + $0x1c0] sm:$0xf] %vm3048_vm1, %v3831_v35  ;;  %v3732_v41 = vpack.c.bf16 %v2061_v36, %v2061_v36  ;;  %v3832_v42 = vpack.c.bf16 %v2161_v37, %v2161_v37  ;;  %v4049_v43 = vpop.f32.mrb[16].mxu0  ;;  %v4149_v44 = vpop.f32.mrb[16].mxu1 }
 0x10a   : > { %3064 = vst.msk [vmem:[%s4626_s4 + $0x3c] sm:$0xf] %vm3048_vm1, %v3734_v38  ;;  %3164 = vst.msk [vmem:[%s4626_s4 + $0x1cc] sm:$0xf] %vm3048_vm1, %v3834_v39  ;;  %v1322_v45 = vadd.f32 %v4049_v43, %v4613_v40  ;;  %v1722_v46 = vadd.f32 %v4149_v44, %v4613_v40  ;;  %v1313_v47 = vpop.f32.mrb[17].mxu0  ;;  %v1713_v48 = vpop.f32.mrb[17].mxu1 }
 0x10b   : > { %3062 = vst.msk [vmem:[%s4626_s4 + $0x34] sm:$0xf] %vm3048_vm1, %v3732_v41  ;;  %3162 = vst.msk [vmem:[%s4626_s4 + $0x1c4] sm:$0xf] %vm3048_vm1, %v3832_v42  ;;  %v1314_v49 = vadd.f32 %v4613_v40, %v1313_v47  ;;  %v1714_v50 = vadd.f32 %v4613_v40, %v1713_v48  ;;  %v4050_v51 = vpop.f32.mrb[18].mxu0  ;;  %v4150_v52 = vpop.f32.mrb[18].mxu1 }
 0x10c   : > { %v2066_v53 = vmax.f32 %v1322_v45, 0.0  ;;  %v2166_v54 = vmax.f32 %v1722_v46, 0.0  ;;  %v1325_v55 = vadd.f32 %v4050_v51, %v4613_v40  ;;  %v1725_v56 = vadd.f32 %v4150_v52, %v4613_v40  ;;  %v1316_v57 = vpop.f32.mrb[19].mxu0  ;;  %v1716_v58 = vpop.f32.mrb[19].mxu1 }
 0x10d   : > { %v2064_v59 = vmax.f32 %v1314_v49, 0.0  ;;  %v2164_v60 = vmax.f32 %v1714_v50, 0.0  ;;  %v1317_v61 = vadd.f32 %v4613_v40, %v1316_v57  ;;  %v1717_v62 = vadd.f32 %v4613_v40, %v1716_v58 }
 0x10e   : > { %v3737_v63 = vpack.c.bf16 %v2066_v53, %v2066_v53  ;;  %v3837_v0 = vpack.c.bf16 %v2166_v54, %v2166_v54  ;;  %v2067_v1 = vmax.f32 %v1325_v55, 0.0  ;;  %v2167_v2 = vmax.f32 %v1725_v56, 0.0 }
 0x10f   : > { %v3735_v3 = vpack.c.bf16 %v2064_v59, %v2064_v59  ;;  %v3835_v4 = vpack.c.bf16 %v2164_v60, %v2164_v60  ;;  %v2065_v5 = vmax.f32 %v1317_v61, 0.0  ;;  %v2165_v6 = vmax.f32 %v1717_v62, 0.0 }
 0x110   : > { %3067 = vst.msk [vmem:[%s4626_s4 + $0x48] sm:$0xf] %vm3048_vm1, %v3737_v63  ;;  %3167 = vst.msk [vmem:[%s4626_s4 + $0x1d8] sm:$0xf] %vm3048_vm1, %v3837_v0  ;;  %v3738_v7 = vpack.c.bf16 %v2067_v1, %v2067_v1  ;;  %v3838_v8 = vpack.c.bf16 %v2167_v2, %v2167_v2 }
 0x111   : > { %3065 = vst.msk [vmem:[%s4626_s4 + $0x40] sm:$0xf] %vm3048_vm1, %v3735_v3  ;;  %3165 = vst.msk [vmem:[%s4626_s4 + $0x1d0] sm:$0xf] %vm3048_vm1, %v3835_v4  ;;  %v3736_v9 = vpack.c.bf16 %v2065_v5, %v2065_v5  ;;  %v3836_v10 = vpack.c.bf16 %v2165_v6, %v2165_v6  ;;  %v4053_v11 = vpop.f32.mrb[20].mxu0  ;;  %v4153_v12 = vpop.f32.mrb[20].mxu1 }
 0x112   : > { %3068 = vst.msk [vmem:[%s4626_s4 + $0x4c] sm:$0xf] %vm3048_vm1, %v3738_v7  ;;  %3168 = vst.msk [vmem:[%s4626_s4 + $0x1dc] sm:$0xf] %vm3048_vm1, %v3838_v8  ;;  %v1338_v13 = vadd.f32 %v4053_v11, %v4613_v40  ;;  %v1738_v14 = vadd.f32 %v4153_v12, %v4613_v40  ;;  %v1329_v15 = vpop.f32.mrb[21].mxu0  ;;  %v1729_v16 = vpop.f32.mrb[21].mxu1 }
 0x113   : > { %3066 = vst.msk [vmem:[%s4626_s4 + $0x44] sm:$0xf] %vm3048_vm1, %v3736_v9  ;;  %3166 = vst.msk [vmem:[%s4626_s4 + $0x1d4] sm:$0xf] %vm3048_vm1, %v3836_v10  ;;  %v1330_v17 = vadd.f32 %v4613_v40, %v1329_v15  ;;  %v1730_v18 = vadd.f32 %v4613_v40, %v1729_v16  ;;  %v4054_v19 = vpop.f32.mrb[22].mxu0  ;;  %v4154_v20 = vpop.f32.mrb[22].mxu1 }
 0x114   : > { %v2070_v21 = vmax.f32 %v1338_v13, 0.0  ;;  %v2170_v22 = vmax.f32 %v1738_v14, 0.0  ;;  %v1341_v23 = vadd.f32 %v4054_v19, %v4613_v40  ;;  %v1741_v24 = vadd.f32 %v4154_v20, %v4613_v40  ;;  %v1332_v25 = vpop.f32.mrb[23].mxu0  ;;  %v1732_v26 = vpop.f32.mrb[23].mxu1 }
 0x115   : > { %v2068_v27 = vmax.f32 %v1330_v17, 0.0  ;;  %v2168_v28 = vmax.f32 %v1730_v18, 0.0  ;;  %v1333_v29 = vadd.f32 %v4613_v40, %v1332_v25  ;;  %v1733_v30 = vadd.f32 %v4613_v40, %v1732_v26 }
 0x116   : > { %v3741_v31 = vpack.c.bf16 %v2070_v21, %v2070_v21  ;;  %v3841_v32 = vpack.c.bf16 %v2170_v22, %v2170_v22  ;;  %v2071_v33 = vmax.f32 %v1341_v23, 0.0  ;;  %v2171_v34 = vmax.f32 %v1741_v24, 0.0 }
 0x117   : > { %v3739_v35 = vpack.c.bf16 %v2068_v27, %v2068_v27  ;;  %v3839_v36 = vpack.c.bf16 %v2168_v28, %v2168_v28  ;;  %v2069_v37 = vmax.f32 %v1333_v29, 0.0  ;;  %v2169_v38 = vmax.f32 %v1733_v30, 0.0 }
 0x118   : > { %3071 = vst.msk [vmem:[%s4626_s4 + $0x58] sm:$0xf] %vm3048_vm1, %v3741_v31  ;;  %3171 = vst.msk [vmem:[%s4626_s4 + $0x1e8] sm:$0xf] %vm3048_vm1, %v3841_v32  ;;  %v3742_v39 = vpack.c.bf16 %v2071_v33, %v2071_v33  ;;  %v3842_v41 = vpack.c.bf16 %v2171_v34, %v2171_v34 }
 0x119   : > { %3069 = vst.msk [vmem:[%s4626_s4 + $0x50] sm:$0xf] %vm3048_vm1, %v3739_v35  ;;  %3169 = vst.msk [vmem:[%s4626_s4 + $0x1e0] sm:$0xf] %vm3048_vm1, %v3839_v36  ;;  %v3740_v42 = vpack.c.bf16 %v2069_v37, %v2069_v37  ;;  %v3840_v43 = vpack.c.bf16 %v2169_v38, %v2169_v38  ;;  %v4057_v44 = vpop.f32.mrb[24].mxu0  ;;  %v4157_v45 = vpop.f32.mrb[24].mxu1 }
 0x11a   : > { %3072 = vst.msk [vmem:[%s4626_s4 + $0x5c] sm:$0xf] %vm3048_vm1, %v3742_v39  ;;  %3172 = vst.msk [vmem:[%s4626_s4 + $0x1ec] sm:$0xf] %vm3048_vm1, %v3842_v41  ;;  %v1354_v46 = vadd.f32 %v4057_v44, %v4613_v40  ;;  %v1754_v47 = vadd.f32 %v4157_v45, %v4613_v40  ;;  %v1345_v48 = vpop.f32.mrb[25].mxu0  ;;  %v1745_v49 = vpop.f32.mrb[25].mxu1 }
 0x11b   : > { %3070 = vst.msk [vmem:[%s4626_s4 + $0x54] sm:$0xf] %vm3048_vm1, %v3740_v42  ;;  %3170 = vst.msk [vmem:[%s4626_s4 + $0x1e4] sm:$0xf] %vm3048_vm1, %v3840_v43  ;;  %v1346_v50 = vadd.f32 %v4613_v40, %v1345_v48  ;;  %v1746_v51 = vadd.f32 %v4613_v40, %v1745_v49  ;;  %v4058_v52 = vpop.f32.mrb[26].mxu0  ;;  %v4158_v53 = vpop.f32.mrb[26].mxu1 }
 0x11c   : > { %v2074_v54 = vmax.f32 %v1354_v46, 0.0  ;;  %v2174_v55 = vmax.f32 %v1754_v47, 0.0  ;;  %v1357_v56 = vadd.f32 %v4058_v52, %v4613_v40  ;;  %v1757_v57 = vadd.f32 %v4158_v53, %v4613_v40  ;;  %v1348_v58 = vpop.f32.mrb[27].mxu0  ;;  %v1748_v59 = vpop.f32.mrb[27].mxu1 }
 0x11d   : > { %v2072_v60 = vmax.f32 %v1346_v50, 0.0  ;;  %v2172_v61 = vmax.f32 %v1746_v51, 0.0  ;;  %v1349_v62 = vadd.f32 %v4613_v40, %v1348_v58  ;;  %v1749_v63 = vadd.f32 %v4613_v40, %v1748_v59 }
 0x11e   : > { %v3745_v0 = vpack.c.bf16 %v2074_v54, %v2074_v54  ;;  %v3845_v1 = vpack.c.bf16 %v2174_v55, %v2174_v55  ;;  %v2075_v2 = vmax.f32 %v1357_v56, 0.0  ;;  %v2175_v3 = vmax.f32 %v1757_v57, 0.0 }
 0x11f   : > { %v3743_v4 = vpack.c.bf16 %v2072_v60, %v2072_v60  ;;  %v3843_v5 = vpack.c.bf16 %v2172_v61, %v2172_v61  ;;  %v2073_v6 = vmax.f32 %v1349_v62, 0.0  ;;  %v2173_v7 = vmax.f32 %v1749_v63, 0.0 }
 0x120   : > { %3075 = vst.msk [vmem:[%s4626_s4 + $0x68] sm:$0xf] %vm3048_vm1, %v3745_v0  ;;  %3175 = vst.msk [vmem:[%s4626_s4 + $0x1f8] sm:$0xf] %vm3048_vm1, %v3845_v1  ;;  %v3746_v8 = vpack.c.bf16 %v2075_v2, %v2075_v2  ;;  %v3846_v9 = vpack.c.bf16 %v2175_v3, %v2175_v3 }
 0x121   : > { %3073 = vst.msk [vmem:[%s4626_s4 + $0x60] sm:$0xf] %vm3048_vm1, %v3743_v4  ;;  %3173 = vst.msk [vmem:[%s4626_s4 + $0x1f0] sm:$0xf] %vm3048_vm1, %v3843_v5  ;;  %v3744_v10 = vpack.c.bf16 %v2073_v6, %v2073_v6  ;;  %v3844_v11 = vpack.c.bf16 %v2173_v7, %v2173_v7  ;;  %v4061_v12 = vpop.f32.mrb[28].mxu0  ;;  %v4161_v13 = vpop.f32.mrb[28].mxu1 }
 0x122   : > { %3076 = vst.msk [vmem:[%s4626_s4 + $0x6c] sm:$0xf] %vm3048_vm1, %v3746_v8  ;;  %3176 = vst.msk [vmem:[%s4626_s4 + $0x1fc] sm:$0xf] %vm3048_vm1, %v3846_v9  ;;  %v1370_v14 = vadd.f32 %v4061_v12, %v4613_v40  ;;  %v1770_v15 = vadd.f32 %v4161_v13, %v4613_v40  ;;  %v1361_v16 = vpop.f32.mrb[29].mxu0  ;;  %v1761_v17 = vpop.f32.mrb[29].mxu1 }
 0x123   : > { %3074 = vst.msk [vmem:[%s4626_s4 + $0x64] sm:$0xf] %vm3048_vm1, %v3744_v10  ;;  %3174 = vst.msk [vmem:[%s4626_s4 + $0x1f4] sm:$0xf] %vm3048_vm1, %v3844_v11  ;;  %v1362_v18 = vadd.f32 %v4613_v40, %v1361_v16  ;;  %v1762_v19 = vadd.f32 %v4613_v40, %v1761_v17  ;;  %v4062_v20 = vpop.f32.mrb[30].mxu0  ;;  %v4162_v21 = vpop.f32.mrb[30].mxu1 }
 0x124   : > { %v2078_v22 = vmax.f32 %v1370_v14, 0.0  ;;  %v2178_v23 = vmax.f32 %v1770_v15, 0.0  ;;  %v1373_v24 = vadd.f32 %v4062_v20, %v4613_v40  ;;  %v1773_v25 = vadd.f32 %v4162_v21, %v4613_v40  ;;  %v1364_v26 = vpop.f32.mrb[31].mxu0  ;;  %v1764_v27 = vpop.f32.mrb[31].mxu1 }
 0x125   : > { %v2076_v28 = vmax.f32 %v1362_v18, 0.0  ;;  %v2176_v29 = vmax.f32 %v1762_v19, 0.0  ;;  %v1365_v30 = vadd.f32 %v4613_v40, %v1364_v26  ;;  %v1765_v31 = vadd.f32 %v4613_v40, %v1764_v27 }
 0x126   : > { %v3749_v32 = vpack.c.bf16 %v2078_v22, %v2078_v22  ;;  %v3849_v33 = vpack.c.bf16 %v2178_v23, %v2178_v23  ;;  %v2079_v34 = vmax.f32 %v1373_v24, 0.0  ;;  %v2179_v35 = vmax.f32 %v1773_v25, 0.0 }
 0x127   : > { %v3747_v36 = vpack.c.bf16 %v2076_v28, %v2076_v28  ;;  %v3847_v37 = vpack.c.bf16 %v2176_v29, %v2176_v29  ;;  %v2077_v38 = vmax.f32 %v1365_v30, 0.0  ;;  %v2177_v39 = vmax.f32 %v1765_v31, 0.0 }
 0x128   : > { %3079 = vst.msk [vmem:[%s4626_s4 + $0x78] sm:$0xf] %vm3048_vm1, %v3749_v32  ;;  %3179 = vst.msk [vmem:[%s4626_s4 + $0x208] sm:$0xf] %vm3048_vm1, %v3849_v33  ;;  %v3750_v41 = vpack.c.bf16 %v2079_v34, %v2079_v34  ;;  %v3850_v42 = vpack.c.bf16 %v2179_v35, %v2179_v35 }
 0x129   : > { %3077 = vst.msk [vmem:[%s4626_s4 + $0x70] sm:$0xf] %vm3048_vm1, %v3747_v36  ;;  %3177 = vst.msk [vmem:[%s4626_s4 + $0x200] sm:$0xf] %vm3048_vm1, %v3847_v37  ;;  %v3748_v43 = vpack.c.bf16 %v2077_v38, %v2077_v38  ;;  %v3848_v44 = vpack.c.bf16 %v2177_v39, %v2177_v39  ;;  %v4065_v45 = vpop.f32.mrb[32].mxu0  ;;  %v4165_v46 = vpop.f32.mrb[32].mxu1 }
 0x12a   : > { %3080 = vst.msk [vmem:[%s4626_s4 + $0x7c] sm:$0xf] %vm3048_vm1, %v3750_v41  ;;  %3180 = vst.msk [vmem:[%s4626_s4 + $0x20c] sm:$0xf] %vm3048_vm1, %v3850_v42  ;;  %v1386_v47 = vadd.f32 %v4065_v45, %v4613_v40  ;;  %v1786_v48 = vadd.f32 %v4165_v46, %v4613_v40  ;;  %v1377_v49 = vpop.f32.mrb[33].mxu0  ;;  %v1777_v50 = vpop.f32.mrb[33].mxu1 }
 0x12b   : > { %3078 = vst.msk [vmem:[%s4626_s4 + $0x74] sm:$0xf] %vm3048_vm1, %v3748_v43  ;;  %3178 = vst.msk [vmem:[%s4626_s4 + $0x204] sm:$0xf] %vm3048_vm1, %v3848_v44  ;;  %v1378_v51 = vadd.f32 %v4613_v40, %v1377_v49  ;;  %v1778_v52 = vadd.f32 %v4613_v40, %v1777_v50  ;;  %v4066_v53 = vpop.f32.mrb[34].mxu0  ;;  %v4166_v54 = vpop.f32.mrb[34].mxu1 }
 0x12c   : > { %v2082_v55 = vmax.f32 %v1386_v47, 0.0  ;;  %v2182_v56 = vmax.f32 %v1786_v48, 0.0  ;;  %v1389_v57 = vadd.f32 %v4066_v53, %v4613_v40  ;;  %v1789_v58 = vadd.f32 %v4166_v54, %v4613_v40  ;;  %v1380_v59 = vpop.f32.mrb[35].mxu0  ;;  %v1780_v60 = vpop.f32.mrb[35].mxu1 }
 0x12d   : > { %v2080_v61 = vmax.f32 %v1378_v51, 0.0  ;;  %v2180_v62 = vmax.f32 %v1778_v52, 0.0  ;;  %v1381_v63 = vadd.f32 %v4613_v40, %v1380_v59  ;;  %v1781_v0 = vadd.f32 %v4613_v40, %v1780_v60 }
 0x12e   : > { %v3753_v1 = vpack.c.bf16 %v2082_v55, %v2082_v55  ;;  %v3853_v2 = vpack.c.bf16 %v2182_v56, %v2182_v56  ;;  %v2083_v3 = vmax.f32 %v1389_v57, 0.0  ;;  %v2183_v4 = vmax.f32 %v1789_v58, 0.0 }
 0x12f   : > { %v3751_v5 = vpack.c.bf16 %v2080_v61, %v2080_v61  ;;  %v3851_v6 = vpack.c.bf16 %v2180_v62, %v2180_v62  ;;  %v2081_v7 = vmax.f32 %v1381_v63, 0.0  ;;  %v2181_v8 = vmax.f32 %v1781_v0, 0.0 }
 0x130   : > { %3083 = vst.msk [vmem:[%s4626_s4 + $0x88] sm:$0xf] %vm3048_vm1, %v3753_v1  ;;  %3183 = vst.msk [vmem:[%s4626_s4 + $0x218] sm:$0xf] %vm3048_vm1, %v3853_v2  ;;  %v3754_v9 = vpack.c.bf16 %v2083_v3, %v2083_v3  ;;  %v3854_v10 = vpack.c.bf16 %v2183_v4, %v2183_v4 }
 0x131   : > { %3081 = vst.msk [vmem:[%s4626_s4 + $0x80] sm:$0xf] %vm3048_vm1, %v3751_v5  ;;  %3181 = vst.msk [vmem:[%s4626_s4 + $0x210] sm:$0xf] %vm3048_vm1, %v3851_v6  ;;  %v3752_v11 = vpack.c.bf16 %v2081_v7, %v2081_v7  ;;  %v3852_v12 = vpack.c.bf16 %v2181_v8, %v2181_v8  ;;  %v4069_v13 = vpop.f32.mrb[36].mxu0  ;;  %v4169_v14 = vpop.f32.mrb[36].mxu1 }
 0x132   : > { %3084 = vst.msk [vmem:[%s4626_s4 + $0x8c] sm:$0xf] %vm3048_vm1, %v3754_v9  ;;  %3184 = vst.msk [vmem:[%s4626_s4 + $0x21c] sm:$0xf] %vm3048_vm1, %v3854_v10  ;;  %v1402_v15 = vadd.f32 %v4069_v13, %v4613_v40  ;;  %v1802_v16 = vadd.f32 %v4169_v14, %v4613_v40  ;;  %v1393_v17 = vpop.f32.mrb[37].mxu0  ;;  %v1793_v18 = vpop.f32.mrb[37].mxu1 }
 0x133   : > { %3082 = vst.msk [vmem:[%s4626_s4 + $0x84] sm:$0xf] %vm3048_vm1, %v3752_v11  ;;  %3182 = vst.msk [vmem:[%s4626_s4 + $0x214] sm:$0xf] %vm3048_vm1, %v3852_v12  ;;  %v1394_v19 = vadd.f32 %v4613_v40, %v1393_v17  ;;  %v1794_v20 = vadd.f32 %v4613_v40, %v1793_v18  ;;  %v4070_v21 = vpop.f32.mrb[38].mxu0  ;;  %v4170_v22 = vpop.f32.mrb[38].mxu1 }
 0x134   : > { %v2086_v23 = vmax.f32 %v1402_v15, 0.0  ;;  %v2186_v24 = vmax.f32 %v1802_v16, 0.0  ;;  %v1405_v25 = vadd.f32 %v4070_v21, %v4613_v40  ;;  %v1805_v26 = vadd.f32 %v4170_v22, %v4613_v40  ;;  %v1396_v27 = vpop.f32.mrb[39].mxu0  ;;  %v1796_v28 = vpop.f32.mrb[39].mxu1 }
 0x135   : > { %v2084_v29 = vmax.f32 %v1394_v19, 0.0  ;;  %v2184_v30 = vmax.f32 %v1794_v20, 0.0  ;;  %v1397_v31 = vadd.f32 %v4613_v40, %v1396_v27  ;;  %v1797_v32 = vadd.f32 %v4613_v40, %v1796_v28 }
 0x136   : > { %v3757_v33 = vpack.c.bf16 %v2086_v23, %v2086_v23  ;;  %v3857_v34 = vpack.c.bf16 %v2186_v24, %v2186_v24  ;;  %v2087_v35 = vmax.f32 %v1405_v25, 0.0  ;;  %v2187_v36 = vmax.f32 %v1805_v26, 0.0 }
 0x137   : > { %v3755_v37 = vpack.c.bf16 %v2084_v29, %v2084_v29  ;;  %v3855_v38 = vpack.c.bf16 %v2184_v30, %v2184_v30  ;;  %v2085_v39 = vmax.f32 %v1397_v31, 0.0  ;;  %v2185_v41 = vmax.f32 %v1797_v32, 0.0 }
 0x138   : > { %3087 = vst.msk [vmem:[%s4626_s4 + $0x98] sm:$0xf] %vm3048_vm1, %v3757_v33  ;;  %3187 = vst.msk [vmem:[%s4626_s4 + $0x228] sm:$0xf] %vm3048_vm1, %v3857_v34  ;;  %v3758_v42 = vpack.c.bf16 %v2087_v35, %v2087_v35  ;;  %v3858_v43 = vpack.c.bf16 %v2187_v36, %v2187_v36 }
 0x139   : > { %3085 = vst.msk [vmem:[%s4626_s4 + $0x90] sm:$0xf] %vm3048_vm1, %v3755_v37  ;;  %3185 = vst.msk [vmem:[%s4626_s4 + $0x220] sm:$0xf] %vm3048_vm1, %v3855_v38  ;;  %v3756_v44 = vpack.c.bf16 %v2085_v39, %v2085_v39  ;;  %v3856_v45 = vpack.c.bf16 %v2185_v41, %v2185_v41  ;;  %v4073_v46 = vpop.f32.mrb[40].mxu0  ;;  %v4173_v47 = vpop.f32.mrb[40].mxu1 }
 0x13a   : > { %3088 = vst.msk [vmem:[%s4626_s4 + $0x9c] sm:$0xf] %vm3048_vm1, %v3758_v42  ;;  %3188 = vst.msk [vmem:[%s4626_s4 + $0x22c] sm:$0xf] %vm3048_vm1, %v3858_v43  ;;  %v1418_v48 = vadd.f32 %v4073_v46, %v4613_v40  ;;  %v1818_v49 = vadd.f32 %v4173_v47, %v4613_v40  ;;  %v1409_v50 = vpop.f32.mrb[41].mxu0  ;;  %v1809_v51 = vpop.f32.mrb[41].mxu1 }
 0x13b   : > { %3086 = vst.msk [vmem:[%s4626_s4 + $0x94] sm:$0xf] %vm3048_vm1, %v3756_v44  ;;  %3186 = vst.msk [vmem:[%s4626_s4 + $0x224] sm:$0xf] %vm3048_vm1, %v3856_v45  ;;  %v1410_v52 = vadd.f32 %v4613_v40, %v1409_v50  ;;  %v1810_v53 = vadd.f32 %v4613_v40, %v1809_v51  ;;  %v4074_v54 = vpop.f32.mrb[42].mxu0  ;;  %v4174_v55 = vpop.f32.mrb[42].mxu1 }
 0x13c   : > { %v2090_v56 = vmax.f32 %v1418_v48, 0.0  ;;  %v2190_v57 = vmax.f32 %v1818_v49, 0.0  ;;  %v1421_v58 = vadd.f32 %v4074_v54, %v4613_v40  ;;  %v1821_v59 = vadd.f32 %v4174_v55, %v4613_v40  ;;  %v1412_v60 = vpop.f32.mrb[43].mxu0  ;;  %v1812_v61 = vpop.f32.mrb[43].mxu1 }
 0x13d   : > { %v2088_v62 = vmax.f32 %v1410_v52, 0.0  ;;  %v2188_v63 = vmax.f32 %v1810_v53, 0.0  ;;  %v1413_v0 = vadd.f32 %v4613_v40, %v1412_v60  ;;  %v1813_v1 = vadd.f32 %v4613_v40, %v1812_v61 }
 0x13e   : > { %v3761_v2 = vpack.c.bf16 %v2090_v56, %v2090_v56  ;;  %v3861_v3 = vpack.c.bf16 %v2190_v57, %v2190_v57  ;;  %v2091_v4 = vmax.f32 %v1421_v58, 0.0  ;;  %v2191_v5 = vmax.f32 %v1821_v59, 0.0 }
 0x13f   : > { %v3759_v6 = vpack.c.bf16 %v2088_v62, %v2088_v62  ;;  %v3859_v7 = vpack.c.bf16 %v2188_v63, %v2188_v63  ;;  %v2089_v8 = vmax.f32 %v1413_v0, 0.0  ;;  %v2189_v9 = vmax.f32 %v1813_v1, 0.0 }
 0x140   : > { %3091 = vst.msk [vmem:[%s4626_s4 + $0xa8] sm:$0xf] %vm3048_vm1, %v3761_v2  ;;  %3191 = vst.msk [vmem:[%s4626_s4 + $0x238] sm:$0xf] %vm3048_vm1, %v3861_v3  ;;  %v3762_v10 = vpack.c.bf16 %v2091_v4, %v2091_v4  ;;  %v3862_v11 = vpack.c.bf16 %v2191_v5, %v2191_v5 }
 0x141   : > { %3089 = vst.msk [vmem:[%s4626_s4 + $0xa0] sm:$0xf] %vm3048_vm1, %v3759_v6  ;;  %3189 = vst.msk [vmem:[%s4626_s4 + $0x230] sm:$0xf] %vm3048_vm1, %v3859_v7  ;;  %v3760_v12 = vpack.c.bf16 %v2089_v8, %v2089_v8  ;;  %v3860_v13 = vpack.c.bf16 %v2189_v9, %v2189_v9  ;;  %v4077_v14 = vpop.f32.mrb[44].mxu0  ;;  %v4177_v15 = vpop.f32.mrb[44].mxu1 }
 0x142   : > { %3092 = vst.msk [vmem:[%s4626_s4 + $0xac] sm:$0xf] %vm3048_vm1, %v3762_v10  ;;  %3192 = vst.msk [vmem:[%s4626_s4 + $0x23c] sm:$0xf] %vm3048_vm1, %v3862_v11  ;;  %v1434_v16 = vadd.f32 %v4077_v14, %v4613_v40  ;;  %v1834_v17 = vadd.f32 %v4177_v15, %v4613_v40  ;;  %v1425_v18 = vpop.f32.mrb[45].mxu0  ;;  %v1825_v19 = vpop.f32.mrb[45].mxu1 }
 0x143   : > { %3090 = vst.msk [vmem:[%s4626_s4 + $0xa4] sm:$0xf] %vm3048_vm1, %v3760_v12  ;;  %3190 = vst.msk [vmem:[%s4626_s4 + $0x234] sm:$0xf] %vm3048_vm1, %v3860_v13  ;;  %v1426_v20 = vadd.f32 %v4613_v40, %v1425_v18  ;;  %v1826_v21 = vadd.f32 %v4613_v40, %v1825_v19  ;;  %v4078_v22 = vpop.f32.mrb[46].mxu0  ;;  %v4178_v23 = vpop.f32.mrb[46].mxu1 }
 0x144   : > { %v2094_v24 = vmax.f32 %v1434_v16, 0.0  ;;  %v2194_v25 = vmax.f32 %v1834_v17, 0.0  ;;  %v1437_v26 = vadd.f32 %v4078_v22, %v4613_v40  ;;  %v1837_v27 = vadd.f32 %v4178_v23, %v4613_v40  ;;  %v1428_v28 = vpop.f32.mrb[47].mxu0  ;;  %v1828_v29 = vpop.f32.mrb[47].mxu1  ;;  %v4933_v16 = vld [vmem:[%s5232_s2] ss:$0 sm:$0xff] }
 0x145   : > { %v2092_v30 = vmax.f32 %v1426_v20, 0.0  ;;  %v2192_v31 = vmax.f32 %v1826_v21, 0.0  ;;  %v1429_v32 = vadd.f32 %v4613_v40, %v1428_v28  ;;  %v1829_v33 = vadd.f32 %v4613_v40, %v1828_v29 }
 0x146   : > { %v3765_v34 = vpack.c.bf16 %v2094_v24, %v2094_v24  ;;  %v3865_v35 = vpack.c.bf16 %v2194_v25, %v2194_v25  ;;  %v2095_v36 = vmax.f32 %v1437_v26, 0.0  ;;  %v2195_v37 = vmax.f32 %v1837_v27, 0.0 }
 0x147   : > { %v3763_v38 = vpack.c.bf16 %v2092_v30, %v2092_v30  ;;  %v3863_v39 = vpack.c.bf16 %v2192_v31, %v2192_v31  ;;  %v2093_v41 = vmax.f32 %v1429_v32, 0.0  ;;  %v2193_v42 = vmax.f32 %v1829_v33, 0.0 }
 0x148   : > { %3095 = vst.msk [vmem:[%s4626_s4 + $0xb8] sm:$0xf] %vm3048_vm1, %v3765_v34  ;;  %3195 = vst.msk [vmem:[%s4626_s4 + $0x248] sm:$0xf] %vm3048_vm1, %v3865_v35  ;;  %v3766_v43 = vpack.c.bf16 %v2095_v36, %v2095_v36  ;;  %v3866_v44 = vpack.c.bf16 %v2195_v37, %v2195_v37 }
 0x149   : > { %3093 = vst.msk [vmem:[%s4626_s4 + $0xb0] sm:$0xf] %vm3048_vm1, %v3763_v38  ;;  %3193 = vst.msk [vmem:[%s4626_s4 + $0x240] sm:$0xf] %vm3048_vm1, %v3863_v39  ;;  %v3764_v45 = vpack.c.bf16 %v2093_v41, %v2093_v41  ;;  %v3864_v46 = vpack.c.bf16 %v2193_v42, %v2193_v42  ;;  %v4081_v47 = vpop.f32.mrb[48].mxu0  ;;  %v4181_v48 = vpop.f32.mrb[48].mxu1 }
 0x14a   : > { %3096 = vst.msk [vmem:[%s4626_s4 + $0xbc] sm:$0xf] %vm3048_vm1, %v3766_v43  ;;  %3196 = vst.msk [vmem:[%s4626_s4 + $0x24c] sm:$0xf] %vm3048_vm1, %v3866_v44  ;;  %v1450_v49 = vadd.f32 %v4081_v47, %v4613_v40  ;;  %v1850_v50 = vadd.f32 %v4181_v48, %v4613_v40  ;;  %v1441_v51 = vpop.f32.mrb[49].mxu0  ;;  %v1841_v52 = vpop.f32.mrb[49].mxu1 }
 0x14b   : > { %3094 = vst.msk [vmem:[%s4626_s4 + $0xb4] sm:$0xf] %vm3048_vm1, %v3764_v45  ;;  %3194 = vst.msk [vmem:[%s4626_s4 + $0x244] sm:$0xf] %vm3048_vm1, %v3864_v46  ;;  %v1442_v53 = vadd.f32 %v4613_v40, %v1441_v51  ;;  %v1842_v54 = vadd.f32 %v4613_v40, %v1841_v52  ;;  %v4082_v55 = vpop.f32.mrb[50].mxu0  ;;  %v4182_v56 = vpop.f32.mrb[50].mxu1 }
 0x14c   : > { %v2098_v57 = vmax.f32 %v1450_v49, 0.0  ;;  %v2198_v58 = vmax.f32 %v1850_v50, 0.0  ;;  %v1453_v59 = vadd.f32 %v4082_v55, %v4613_v40  ;;  %v1853_v60 = vadd.f32 %v4182_v56, %v4613_v40  ;;  %v1444_v61 = vpop.f32.mrb[51].mxu0  ;;  %v1844_v62 = vpop.f32.mrb[51].mxu1 }
 0x14d   : > { %v2096_v63 = vmax.f32 %v1442_v53, 0.0  ;;  %v2196_v0 = vmax.f32 %v1842_v54, 0.0  ;;  %v1445_v1 = vadd.f32 %v4613_v40, %v1444_v61  ;;  %v1845_v2 = vadd.f32 %v4613_v40, %v1844_v62 }
 0x14e   : > { %v3769_v3 = vpack.c.bf16 %v2098_v57, %v2098_v57  ;;  %v3869_v4 = vpack.c.bf16 %v2198_v58, %v2198_v58  ;;  %v2099_v5 = vmax.f32 %v1453_v59, 0.0  ;;  %v2199_v6 = vmax.f32 %v1853_v60, 0.0 }
 0x14f   : > { %v3767_v7 = vpack.c.bf16 %v2096_v63, %v2096_v63  ;;  %v3867_v8 = vpack.c.bf16 %v2196_v0, %v2196_v0  ;;  %v2097_v9 = vmax.f32 %v1445_v1, 0.0  ;;  %v2197_v10 = vmax.f32 %v1845_v2, 0.0 }
 0x150   : > { %3099 = vst.msk [vmem:[%s4626_s4 + $0xc8] sm:$0xf] %vm3048_vm1, %v3769_v3  ;;  %3199 = vst.msk [vmem:[%s4626_s4 + $0x258] sm:$0xf] %vm3048_vm1, %v3869_v4  ;;  %v3770_v11 = vpack.c.bf16 %v2099_v5, %v2099_v5  ;;  %v3870_v12 = vpack.c.bf16 %v2199_v6, %v2199_v6 }
 0x151   : > { %3097 = vst.msk [vmem:[%s4626_s4 + $0xc0] sm:$0xf] %vm3048_vm1, %v3767_v7  ;;  %3197 = vst.msk [vmem:[%s4626_s4 + $0x250] sm:$0xf] %vm3048_vm1, %v3867_v8  ;;  %v3768_v40 = vpack.c.bf16 %v2097_v9, %v2097_v9  ;;  %v3868_v13 = vpack.c.bf16 %v2197_v10, %v2197_v10  ;;  %v4085_v14 = vpop.f32.mrb[52].mxu0  ;;  %v4185_v15 = vpop.f32.mrb[52].mxu1 }
 0x152   : > { %3100 = vst.msk [vmem:[%s4626_s4 + $0xcc] sm:$0xf] %vm3048_vm1, %v3770_v11  ;;  %3200 = vst.msk [vmem:[%s4626_s4 + $0x25c] sm:$0xf] %vm3048_vm1, %v3870_v12  ;;  %v1466_v17 = vadd.f32 %v4933_v16, %v4085_v14  ;;  %v1866_v18 = vadd.f32 %v4933_v16, %v4185_v15  ;;  %v1457_v19 = vpop.f32.mrb[53].mxu0  ;;  %v1857_v20 = vpop.f32.mrb[53].mxu1 }
 0x153   : > { %3098 = vst.msk [vmem:[%s4626_s4 + $0xc4] sm:$0xf] %vm3048_vm1, %v3768_v40  ;;  %3198 = vst.msk [vmem:[%s4626_s4 + $0x254] sm:$0xf] %vm3048_vm1, %v3868_v13  ;;  %v1458_v21 = vadd.f32 %v4933_v16, %v1457_v19  ;;  %v1858_v22 = vadd.f32 %v4933_v16, %v1857_v20  ;;  %v4086_v23 = vpop.f32.mrb[54].mxu0  ;;  %v4186_v24 = vpop.f32.mrb[54].mxu1 }
 0x154   : > { %v2102_v25 = vmax.f32 %v1466_v17, 0.0  ;;  %v2202_v26 = vmax.f32 %v1866_v18, 0.0  ;;  %v1469_v27 = vadd.f32 %v4933_v16, %v4086_v23  ;;  %v1869_v28 = vadd.f32 %v4933_v16, %v4186_v24  ;;  %v1460_v29 = vpop.f32.mrb[55].mxu0  ;;  %v1860_v30 = vpop.f32.mrb[55].mxu1 }
 0x155   : > { %v2100_v31 = vmax.f32 %v1458_v21, 0.0  ;;  %v2200_v32 = vmax.f32 %v1858_v22, 0.0  ;;  %v1461_v33 = vadd.f32 %v4933_v16, %v1460_v29  ;;  %v1861_v34 = vadd.f32 %v4933_v16, %v1860_v30 }
 0x156   : > { %v3773_v35 = vpack.c.bf16 %v2102_v25, %v2102_v25  ;;  %v3873_v36 = vpack.c.bf16 %v2202_v26, %v2202_v26  ;;  %v2103_v37 = vmax.f32 %v1469_v27, 0.0  ;;  %v2203_v38 = vmax.f32 %v1869_v28, 0.0 }
 0x157   : > { %v3771_v39 = vpack.c.bf16 %v2100_v31, %v2100_v31  ;;  %v3871_v41 = vpack.c.bf16 %v2200_v32, %v2200_v32  ;;  %v2101_v42 = vmax.f32 %v1461_v33, 0.0  ;;  %v2201_v43 = vmax.f32 %v1861_v34, 0.0 }
 0x158   : > { %3103 = vst.msk [vmem:[%s4626_s4 + $0xd8] sm:$0xf] %vm3048_vm1, %v3773_v35  ;;  %3203 = vst.msk [vmem:[%s4626_s4 + $0x268] sm:$0xf] %vm3048_vm1, %v3873_v36  ;;  %v3774_v44 = vpack.c.bf16 %v2103_v37, %v2103_v37  ;;  %v3874_v45 = vpack.c.bf16 %v2203_v38, %v2203_v38 }
 0x159   : > { %3101 = vst.msk [vmem:[%s4626_s4 + $0xd0] sm:$0xf] %vm3048_vm1, %v3771_v39  ;;  %3201 = vst.msk [vmem:[%s4626_s4 + $0x260] sm:$0xf] %vm3048_vm1, %v3871_v41  ;;  %v3772_v46 = vpack.c.bf16 %v2101_v42, %v2101_v42  ;;  %v3872_v47 = vpack.c.bf16 %v2201_v43, %v2201_v43  ;;  %v4089_v48 = vpop.f32.mrb[56].mxu0  ;;  %v4189_v49 = vpop.f32.mrb[56].mxu1 }
 0x15a   : > { %3104 = vst.msk [vmem:[%s4626_s4 + $0xdc] sm:$0xf] %vm3048_vm1, %v3774_v44  ;;  %3204 = vst.msk [vmem:[%s4626_s4 + $0x26c] sm:$0xf] %vm3048_vm1, %v3874_v45  ;;  %v1482_v50 = vadd.f32 %v4933_v16, %v4089_v48  ;;  %v1882_v51 = vadd.f32 %v4933_v16, %v4189_v49  ;;  %v1473_v52 = vpop.f32.mrb[57].mxu0  ;;  %v1873_v53 = vpop.f32.mrb[57].mxu1 }
 0x15b   : > { %3102 = vst.msk [vmem:[%s4626_s4 + $0xd4] sm:$0xf] %vm3048_vm1, %v3772_v46  ;;  %3202 = vst.msk [vmem:[%s4626_s4 + $0x264] sm:$0xf] %vm3048_vm1, %v3872_v47  ;;  %v1474_v54 = vadd.f32 %v4933_v16, %v1473_v52  ;;  %v1874_v55 = vadd.f32 %v4933_v16, %v1873_v53  ;;  %v4090_v56 = vpop.f32.mrb[58].mxu0  ;;  %v4190_v57 = vpop.f32.mrb[58].mxu1 }
 0x15c   : > { %v2106_v58 = vmax.f32 %v1482_v50, 0.0  ;;  %v2206_v59 = vmax.f32 %v1882_v51, 0.0  ;;  %v1485_v60 = vadd.f32 %v4933_v16, %v4090_v56  ;;  %v1885_v61 = vadd.f32 %v4933_v16, %v4190_v57  ;;  %v1476_v62 = vpop.f32.mrb[59].mxu0  ;;  %v1876_v63 = vpop.f32.mrb[59].mxu1 }
 0x15d   : > { %v2104_v0 = vmax.f32 %v1474_v54, 0.0  ;;  %v2204_v1 = vmax.f32 %v1874_v55, 0.0  ;;  %v1477_v2 = vadd.f32 %v4933_v16, %v1476_v62  ;;  %v1877_v3 = vadd.f32 %v4933_v16, %v1876_v63 }
 0x15e   : > { %v3777_v4 = vpack.c.bf16 %v2106_v58, %v2106_v58  ;;  %v3877_v5 = vpack.c.bf16 %v2206_v59, %v2206_v59  ;;  %v2107_v6 = vmax.f32 %v1485_v60, 0.0  ;;  %v2207_v7 = vmax.f32 %v1885_v61, 0.0 }
 0x15f   : > { %v3775_v8 = vpack.c.bf16 %v2104_v0, %v2104_v0  ;;  %v3875_v9 = vpack.c.bf16 %v2204_v1, %v2204_v1  ;;  %v2105_v10 = vmax.f32 %v1477_v2, 0.0  ;;  %v2205_v11 = vmax.f32 %v1877_v3, 0.0 }
 0x160   : > { %3107 = vst.msk [vmem:[%s4626_s4 + $0xe8] sm:$0xf] %vm3048_vm1, %v3777_v4  ;;  %3207 = vst.msk [vmem:[%s4626_s4 + $0x278] sm:$0xf] %vm3048_vm1, %v3877_v5  ;;  %v3778_v12 = vpack.c.bf16 %v2107_v6, %v2107_v6  ;;  %v3878_v40 = vpack.c.bf16 %v2207_v7, %v2207_v7 }
 0x161   : > { %3105 = vst.msk [vmem:[%s4626_s4 + $0xe0] sm:$0xf] %vm3048_vm1, %v3775_v8  ;;  %3205 = vst.msk [vmem:[%s4626_s4 + $0x270] sm:$0xf] %vm3048_vm1, %v3875_v9  ;;  %v3776_v13 = vpack.c.bf16 %v2105_v10, %v2105_v10  ;;  %v3876_v14 = vpack.c.bf16 %v2205_v11, %v2205_v11  ;;  %v4093_v15 = vpop.f32.mrb[60].mxu0  ;;  %v4193_v17 = vpop.f32.mrb[60].mxu1 }
 0x162   : > { %3108 = vst.msk [vmem:[%s4626_s4 + $0xec] sm:$0xf] %vm3048_vm1, %v3778_v12  ;;  %3208 = vst.msk [vmem:[%s4626_s4 + $0x27c] sm:$0xf] %vm3048_vm1, %v3878_v40  ;;  %v1498_v18 = vadd.f32 %v4933_v16, %v4093_v15  ;;  %v1898_v19 = vadd.f32 %v4933_v16, %v4193_v17  ;;  %v1489_v20 = vpop.f32.mrb[61].mxu0  ;;  %v1889_v21 = vpop.f32.mrb[61].mxu1 }
 0x163   : > { %3106 = vst.msk [vmem:[%s4626_s4 + $0xe4] sm:$0xf] %vm3048_vm1, %v3776_v13  ;;  %3206 = vst.msk [vmem:[%s4626_s4 + $0x274] sm:$0xf] %vm3048_vm1, %v3876_v14  ;;  %v1490_v22 = vadd.f32 %v4933_v16, %v1489_v20  ;;  %v1890_v23 = vadd.f32 %v4933_v16, %v1889_v21  ;;  %v4094_v24 = vpop.f32.mrb[62].mxu0  ;;  %v4194_v25 = vpop.f32.mrb[62].mxu1 }
 0x164   : > { %v2110_v26 = vmax.f32 %v1498_v18, 0.0  ;;  %v2210_v27 = vmax.f32 %v1898_v19, 0.0  ;;  %v1501_v28 = vadd.f32 %v4933_v16, %v4094_v24  ;;  %v1901_v29 = vadd.f32 %v4933_v16, %v4194_v25  ;;  %v1492_v30 = vpop.f32.mrb[63].mxu0  ;;  %v1892_v31 = vpop.f32.mrb[63].mxu1 }
 0x165   : > { %v2108_v32 = vmax.f32 %v1490_v22, 0.0  ;;  %v2208_v33 = vmax.f32 %v1890_v23, 0.0  ;;  %v1493_v34 = vadd.f32 %v4933_v16, %v1492_v30  ;;  %v1893_v35 = vadd.f32 %v4933_v16, %v1892_v31 }
 0x166   : > { %v3781_v36 = vpack.c.bf16 %v2110_v26, %v2110_v26  ;;  %v3881_v37 = vpack.c.bf16 %v2210_v27, %v2210_v27  ;;  %v2111_v38 = vmax.f32 %v1501_v28, 0.0  ;;  %v2211_v39 = vmax.f32 %v1901_v29, 0.0 }
 0x167   : > { %v3779_v41 = vpack.c.bf16 %v2108_v32, %v2108_v32  ;;  %v3879_v42 = vpack.c.bf16 %v2208_v33, %v2208_v33  ;;  %v2109_v43 = vmax.f32 %v1493_v34, 0.0  ;;  %v2209_v44 = vmax.f32 %v1893_v35, 0.0 }
 0x168   : > { %3111 = vst.msk [vmem:[%s4626_s4 + $0xf8] sm:$0xf] %vm3048_vm1, %v3781_v36  ;;  %3211 = vst.msk [vmem:[%s4626_s4 + $0x288] sm:$0xf] %vm3048_vm1, %v3881_v37  ;;  %v3782_v45 = vpack.c.bf16 %v2111_v38, %v2111_v38  ;;  %v3882_v46 = vpack.c.bf16 %v2211_v39, %v2211_v39 }
 0x169   : > { %3109 = vst.msk [vmem:[%s4626_s4 + $0xf0] sm:$0xf] %vm3048_vm1, %v3779_v41  ;;  %3209 = vst.msk [vmem:[%s4626_s4 + $0x280] sm:$0xf] %vm3048_vm1, %v3879_v42  ;;  %v3780_v47 = vpack.c.bf16 %v2109_v43, %v2109_v43  ;;  %v3880_v48 = vpack.c.bf16 %v2209_v44, %v2209_v44  ;;  %v4097_v49 = vpop.f32.mrb[64].mxu0  ;;  %v4197_v50 = vpop.f32.mrb[64].mxu1 }
 0x16a   : > { %3112 = vst.msk [vmem:[%s4626_s4 + $0xfc] sm:$0xf] %vm3048_vm1, %v3782_v45  ;;  %3212 = vst.msk [vmem:[%s4626_s4 + $0x28c] sm:$0xf] %vm3048_vm1, %v3882_v46  ;;  %v1514_v51 = vadd.f32 %v4933_v16, %v4097_v49  ;;  %v1914_v52 = vadd.f32 %v4933_v16, %v4197_v50  ;;  %v1505_v53 = vpop.f32.mrb[65].mxu0  ;;  %v1905_v54 = vpop.f32.mrb[65].mxu1 }
 0x16b   : > { %3110 = vst.msk [vmem:[%s4626_s4 + $0xf4] sm:$0xf] %vm3048_vm1, %v3780_v47  ;;  %3210 = vst.msk [vmem:[%s4626_s4 + $0x284] sm:$0xf] %vm3048_vm1, %v3880_v48  ;;  %v1506_v55 = vadd.f32 %v4933_v16, %v1505_v53  ;;  %v1906_v56 = vadd.f32 %v4933_v16, %v1905_v54  ;;  %v4098_v57 = vpop.f32.mrb[66].mxu0  ;;  %v4198_v58 = vpop.f32.mrb[66].mxu1 }
 0x16c   : > { %v2114_v59 = vmax.f32 %v1514_v51, 0.0  ;;  %v2214_v60 = vmax.f32 %v1914_v52, 0.0  ;;  %v1517_v61 = vadd.f32 %v4933_v16, %v4098_v57  ;;  %v1917_v62 = vadd.f32 %v4933_v16, %v4198_v58  ;;  %v1508_v63 = vpop.f32.mrb[67].mxu0  ;;  %v1908_v0 = vpop.f32.mrb[67].mxu1 }
 0x16d   : > { %v2112_v1 = vmax.f32 %v1506_v55, 0.0  ;;  %v2212_v2 = vmax.f32 %v1906_v56, 0.0  ;;  %v1509_v3 = vadd.f32 %v4933_v16, %v1508_v63  ;;  %v1909_v4 = vadd.f32 %v4933_v16, %v1908_v0 }
 0x16e   : > { %v3785_v5 = vpack.c.bf16 %v2114_v59, %v2114_v59  ;;  %v3885_v6 = vpack.c.bf16 %v2214_v60, %v2214_v60  ;;  %v2115_v7 = vmax.f32 %v1517_v61, 0.0  ;;  %v2215_v8 = vmax.f32 %v1917_v62, 0.0 }
 0x16f   : > { %v3783_v9 = vpack.c.bf16 %v2112_v1, %v2112_v1  ;;  %v3883_v10 = vpack.c.bf16 %v2212_v2, %v2212_v2  ;;  %v2113_v11 = vmax.f32 %v1509_v3, 0.0  ;;  %v2213_v12 = vmax.f32 %v1909_v4, 0.0 }
 0x170   : > { %3115 = vst.msk [vmem:[%s4626_s4 + $0x108] sm:$0xf] %vm3048_vm1, %v3785_v5  ;;  %3215 = vst.msk [vmem:[%s4626_s4 + $0x298] sm:$0xf] %vm3048_vm1, %v3885_v6  ;;  %v3786_v40 = vpack.c.bf16 %v2115_v7, %v2115_v7  ;;  %v3886_v13 = vpack.c.bf16 %v2215_v8, %v2215_v8 }
 0x171   : > { %3113 = vst.msk [vmem:[%s4626_s4 + $0x100] sm:$0xf] %vm3048_vm1, %v3783_v9  ;;  %3213 = vst.msk [vmem:[%s4626_s4 + $0x290] sm:$0xf] %vm3048_vm1, %v3883_v10  ;;  %v3784_v14 = vpack.c.bf16 %v2113_v11, %v2113_v11  ;;  %v3884_v15 = vpack.c.bf16 %v2213_v12, %v2213_v12  ;;  %v4101_v17 = vpop.f32.mrb[68].mxu0  ;;  %v4201_v18 = vpop.f32.mrb[68].mxu1 }
 0x172   : > { %3116 = vst.msk [vmem:[%s4626_s4 + $0x10c] sm:$0xf] %vm3048_vm1, %v3786_v40  ;;  %3216 = vst.msk [vmem:[%s4626_s4 + $0x29c] sm:$0xf] %vm3048_vm1, %v3886_v13  ;;  %v1530_v19 = vadd.f32 %v4933_v16, %v4101_v17  ;;  %v1930_v20 = vadd.f32 %v4933_v16, %v4201_v18  ;;  %v1521_v21 = vpop.f32.mrb[69].mxu0  ;;  %v1921_v22 = vpop.f32.mrb[69].mxu1 }
 0x173   : > { %3114 = vst.msk [vmem:[%s4626_s4 + $0x104] sm:$0xf] %vm3048_vm1, %v3784_v14  ;;  %3214 = vst.msk [vmem:[%s4626_s4 + $0x294] sm:$0xf] %vm3048_vm1, %v3884_v15  ;;  %v1522_v23 = vadd.f32 %v4933_v16, %v1521_v21  ;;  %v1922_v24 = vadd.f32 %v4933_v16, %v1921_v22  ;;  %v4102_v25 = vpop.f32.mrb[70].mxu0  ;;  %v4202_v26 = vpop.f32.mrb[70].mxu1 }
 0x174   : > { %v2118_v27 = vmax.f32 %v1530_v19, 0.0  ;;  %v2218_v28 = vmax.f32 %v1930_v20, 0.0  ;;  %v1533_v29 = vadd.f32 %v4933_v16, %v4102_v25  ;;  %v1933_v30 = vadd.f32 %v4933_v16, %v4202_v26  ;;  %v1524_v31 = vpop.f32.mrb[71].mxu0  ;;  %v1924_v32 = vpop.f32.mrb[71].mxu1 }
 0x175   : > { %v2116_v33 = vmax.f32 %v1522_v23, 0.0  ;;  %v2216_v34 = vmax.f32 %v1922_v24, 0.0  ;;  %v1525_v35 = vadd.f32 %v4933_v16, %v1524_v31  ;;  %v1925_v36 = vadd.f32 %v4933_v16, %v1924_v32 }
 0x176   : > { %v3789_v37 = vpack.c.bf16 %v2118_v27, %v2118_v27  ;;  %v3889_v38 = vpack.c.bf16 %v2218_v28, %v2218_v28  ;;  %v2119_v39 = vmax.f32 %v1533_v29, 0.0  ;;  %v2219_v41 = vmax.f32 %v1933_v30, 0.0 }
 0x177   : > { %v3787_v42 = vpack.c.bf16 %v2116_v33, %v2116_v33  ;;  %v3887_v43 = vpack.c.bf16 %v2216_v34, %v2216_v34  ;;  %v2117_v44 = vmax.f32 %v1525_v35, 0.0  ;;  %v2217_v45 = vmax.f32 %v1925_v36, 0.0 }
 0x178   : > { %3119 = vst.msk [vmem:[%s4626_s4 + $0x118] sm:$0xf] %vm3048_vm1, %v3789_v37  ;;  %3219 = vst.msk [vmem:[%s4626_s4 + $0x2a8] sm:$0xf] %vm3048_vm1, %v3889_v38  ;;  %v3790_v46 = vpack.c.bf16 %v2119_v39, %v2119_v39  ;;  %v3890_v47 = vpack.c.bf16 %v2219_v41, %v2219_v41 }
 0x179   : > { %3117 = vst.msk [vmem:[%s4626_s4 + $0x110] sm:$0xf] %vm3048_vm1, %v3787_v42  ;;  %3217 = vst.msk [vmem:[%s4626_s4 + $0x2a0] sm:$0xf] %vm3048_vm1, %v3887_v43  ;;  %v3788_v48 = vpack.c.bf16 %v2117_v44, %v2117_v44  ;;  %v3888_v49 = vpack.c.bf16 %v2217_v45, %v2217_v45  ;;  %v4105_v50 = vpop.f32.mrb[72].mxu0  ;;  %v4205_v51 = vpop.f32.mrb[72].mxu1 }
 0x17a   : > { %3120 = vst.msk [vmem:[%s4626_s4 + $0x11c] sm:$0xf] %vm3048_vm1, %v3790_v46  ;;  %3220 = vst.msk [vmem:[%s4626_s4 + $0x2ac] sm:$0xf] %vm3048_vm1, %v3890_v47  ;;  %v1546_v52 = vadd.f32 %v4933_v16, %v4105_v50  ;;  %v1946_v53 = vadd.f32 %v4933_v16, %v4205_v51  ;;  %v1537_v54 = vpop.f32.mrb[73].mxu0  ;;  %v1937_v55 = vpop.f32.mrb[73].mxu1 }
 0x17b   : > { %3118 = vst.msk [vmem:[%s4626_s4 + $0x114] sm:$0xf] %vm3048_vm1, %v3788_v48  ;;  %3218 = vst.msk [vmem:[%s4626_s4 + $0x2a4] sm:$0xf] %vm3048_vm1, %v3888_v49  ;;  %v1538_v56 = vadd.f32 %v4933_v16, %v1537_v54  ;;  %v1938_v57 = vadd.f32 %v4933_v16, %v1937_v55  ;;  %v4106_v58 = vpop.f32.mrb[74].mxu0  ;;  %v4206_v59 = vpop.f32.mrb[74].mxu1 }
 0x17c   : > { %v2122_v60 = vmax.f32 %v1546_v52, 0.0  ;;  %v2222_v61 = vmax.f32 %v1946_v53, 0.0  ;;  %v1549_v62 = vadd.f32 %v4933_v16, %v4106_v58  ;;  %v1949_v63 = vadd.f32 %v4933_v16, %v4206_v59  ;;  %v1540_v0 = vpop.f32.mrb[75].mxu0  ;;  %v1940_v1 = vpop.f32.mrb[75].mxu1 }
 0x17d   : > { %v2120_v2 = vmax.f32 %v1538_v56, 0.0  ;;  %v2220_v3 = vmax.f32 %v1938_v57, 0.0  ;;  %v1541_v4 = vadd.f32 %v4933_v16, %v1540_v0  ;;  %v1941_v5 = vadd.f32 %v4933_v16, %v1940_v1 }
 0x17e   : > { %v3793_v6 = vpack.c.bf16 %v2122_v60, %v2122_v60  ;;  %v3893_v7 = vpack.c.bf16 %v2222_v61, %v2222_v61  ;;  %v2123_v8 = vmax.f32 %v1549_v62, 0.0  ;;  %v2223_v9 = vmax.f32 %v1949_v63, 0.0 }
 0x17f   : > { %v3791_v10 = vpack.c.bf16 %v2120_v2, %v2120_v2  ;;  %v3891_v11 = vpack.c.bf16 %v2220_v3, %v2220_v3  ;;  %v2121_v12 = vmax.f32 %v1541_v4, 0.0  ;;  %v2221_v40 = vmax.f32 %v1941_v5, 0.0 }
 0x180   : > { %3123 = vst.msk [vmem:[%s4626_s4 + $0x128] sm:$0xf] %vm3048_vm1, %v3793_v6  ;;  %3223 = vst.msk [vmem:[%s4626_s4 + $0x2b8] sm:$0xf] %vm3048_vm1, %v3893_v7  ;;  %v3794_v13 = vpack.c.bf16 %v2123_v8, %v2123_v8  ;;  %v3894_v14 = vpack.c.bf16 %v2223_v9, %v2223_v9 }
 0x181   : > { %3121 = vst.msk [vmem:[%s4626_s4 + $0x120] sm:$0xf] %vm3048_vm1, %v3791_v10  ;;  %3221 = vst.msk [vmem:[%s4626_s4 + $0x2b0] sm:$0xf] %vm3048_vm1, %v3891_v11  ;;  %v3792_v15 = vpack.c.bf16 %v2121_v12, %v2121_v12  ;;  %v3892_v17 = vpack.c.bf16 %v2221_v40, %v2221_v40  ;;  %v4109_v18 = vpop.f32.mrb[76].mxu0  ;;  %v4209_v19 = vpop.f32.mrb[76].mxu1 }
 0x182   : > { %3124 = vst.msk [vmem:[%s4626_s4 + $0x12c] sm:$0xf] %vm3048_vm1, %v3794_v13  ;;  %3224 = vst.msk [vmem:[%s4626_s4 + $0x2bc] sm:$0xf] %vm3048_vm1, %v3894_v14  ;;  %v1562_v20 = vadd.f32 %v4933_v16, %v4109_v18  ;;  %v1962_v21 = vadd.f32 %v4933_v16, %v4209_v19  ;;  %v1553_v22 = vpop.f32.mrb[77].mxu0  ;;  %v1953_v23 = vpop.f32.mrb[77].mxu1 }
 0x183   : > { %3122 = vst.msk [vmem:[%s4626_s4 + $0x124] sm:$0xf] %vm3048_vm1, %v3792_v15  ;;  %3222 = vst.msk [vmem:[%s4626_s4 + $0x2b4] sm:$0xf] %vm3048_vm1, %v3892_v17  ;;  %v1554_v24 = vadd.f32 %v4933_v16, %v1553_v22  ;;  %v1954_v25 = vadd.f32 %v4933_v16, %v1953_v23  ;;  %v4110_v26 = vpop.f32.mrb[78].mxu0  ;;  %v4210_v27 = vpop.f32.mrb[78].mxu1 }
 0x184   : > { %v2126_v28 = vmax.f32 %v1562_v20, 0.0  ;;  %v2226_v29 = vmax.f32 %v1962_v21, 0.0  ;;  %v1565_v30 = vadd.f32 %v4933_v16, %v4110_v26  ;;  %v1965_v31 = vadd.f32 %v4933_v16, %v4210_v27  ;;  %v1556_v32 = vpop.f32.mrb[79].mxu0  ;;  %v1956_v33 = vpop.f32.mrb[79].mxu1 }
 0x185   : > { %v2124_v34 = vmax.f32 %v1554_v24, 0.0  ;;  %v2224_v35 = vmax.f32 %v1954_v25, 0.0  ;;  %v1557_v36 = vadd.f32 %v4933_v16, %v1556_v32  ;;  %v1957_v37 = vadd.f32 %v4933_v16, %v1956_v33 }
 0x186   : > { %v3797_v38 = vpack.c.bf16 %v2126_v28, %v2126_v28  ;;  %v3897_v39 = vpack.c.bf16 %v2226_v29, %v2226_v29  ;;  %v2127_v41 = vmax.f32 %v1565_v30, 0.0  ;;  %v2227_v42 = vmax.f32 %v1965_v31, 0.0 }
 0x187   : > { %v3795_v43 = vpack.c.bf16 %v2124_v34, %v2124_v34  ;;  %v3895_v44 = vpack.c.bf16 %v2224_v35, %v2224_v35  ;;  %v2125_v45 = vmax.f32 %v1557_v36, 0.0  ;;  %v2225_v46 = vmax.f32 %v1957_v37, 0.0 }
 0x188   : > { %3127 = vst.msk [vmem:[%s4626_s4 + $0x138] sm:$0xf] %vm3048_vm1, %v3797_v38  ;;  %3227 = vst.msk [vmem:[%s4626_s4 + $0x2c8] sm:$0xf] %vm3048_vm1, %v3897_v39  ;;  %v3798_v47 = vpack.c.bf16 %v2127_v41, %v2127_v41  ;;  %v3898_v48 = vpack.c.bf16 %v2227_v42, %v2227_v42 }
 0x189   : > { %3125 = vst.msk [vmem:[%s4626_s4 + $0x130] sm:$0xf] %vm3048_vm1, %v3795_v43  ;;  %3225 = vst.msk [vmem:[%s4626_s4 + $0x2c0] sm:$0xf] %vm3048_vm1, %v3895_v44  ;;  %v3796_v49 = vpack.c.bf16 %v2125_v45, %v2125_v45  ;;  %v3896_v50 = vpack.c.bf16 %v2225_v46, %v2225_v46  ;;  %v4113_v51 = vpop.f32.mrb[80].mxu0  ;;  %v4213_v52 = vpop.f32.mrb[80].mxu1 }
 0x18a   : > { %3128 = vst.msk [vmem:[%s4626_s4 + $0x13c] sm:$0xf] %vm3048_vm1, %v3798_v47  ;;  %3228 = vst.msk [vmem:[%s4626_s4 + $0x2cc] sm:$0xf] %vm3048_vm1, %v3898_v48  ;;  %v1578_v53 = vadd.f32 %v4933_v16, %v4113_v51  ;;  %v1978_v54 = vadd.f32 %v4933_v16, %v4213_v52  ;;  %v1569_v55 = vpop.f32.mrb[81].mxu0  ;;  %v1969_v56 = vpop.f32.mrb[81].mxu1 }
 0x18b   : > { %3126 = vst.msk [vmem:[%s4626_s4 + $0x134] sm:$0xf] %vm3048_vm1, %v3796_v49  ;;  %3226 = vst.msk [vmem:[%s4626_s4 + $0x2c4] sm:$0xf] %vm3048_vm1, %v3896_v50  ;;  %v1570_v57 = vadd.f32 %v4933_v16, %v1569_v55  ;;  %v1970_v58 = vadd.f32 %v4933_v16, %v1969_v56  ;;  %v4114_v59 = vpop.f32.mrb[82].mxu0  ;;  %v4214_v60 = vpop.f32.mrb[82].mxu1 }
 0x18c   : > { %v2130_v61 = vmax.f32 %v1578_v53, 0.0  ;;  %v2230_v62 = vmax.f32 %v1978_v54, 0.0  ;;  %v1581_v63 = vadd.f32 %v4933_v16, %v4114_v59  ;;  %v1981_v0 = vadd.f32 %v4933_v16, %v4214_v60  ;;  %v1572_v1 = vpop.f32.mrb[83].mxu0  ;;  %v1972_v2 = vpop.f32.mrb[83].mxu1 }
 0x18d   : > { %v2128_v3 = vmax.f32 %v1570_v57, 0.0  ;;  %v2228_v4 = vmax.f32 %v1970_v58, 0.0  ;;  %v1573_v5 = vadd.f32 %v4933_v16, %v1572_v1  ;;  %v1973_v6 = vadd.f32 %v4933_v16, %v1972_v2 }
 0x18e   : > { %v3801_v7 = vpack.c.bf16 %v2130_v61, %v2130_v61  ;;  %v3901_v8 = vpack.c.bf16 %v2230_v62, %v2230_v62  ;;  %v2131_v9 = vmax.f32 %v1581_v63, 0.0  ;;  %v2231_v10 = vmax.f32 %v1981_v0, 0.0 }
 0x18f   : > { %v3799_v11 = vpack.c.bf16 %v2128_v3, %v2128_v3  ;;  %v3899_v12 = vpack.c.bf16 %v2228_v4, %v2228_v4  ;;  %v2129_v40 = vmax.f32 %v1573_v5, 0.0  ;;  %v2229_v13 = vmax.f32 %v1973_v6, 0.0 }
 0x190   : > { %3131 = vst.msk [vmem:[%s4626_s4 + $0x148] sm:$0xf] %vm3048_vm1, %v3801_v7  ;;  %3231 = vst.msk [vmem:[%s4626_s4 + $0x2d8] sm:$0xf] %vm3048_vm1, %v3901_v8  ;;  %v3802_v14 = vpack.c.bf16 %v2131_v9, %v2131_v9  ;;  %v3902_v15 = vpack.c.bf16 %v2231_v10, %v2231_v10 }
 0x191   : > { %3129 = vst.msk [vmem:[%s4626_s4 + $0x140] sm:$0xf] %vm3048_vm1, %v3799_v11  ;;  %3229 = vst.msk [vmem:[%s4626_s4 + $0x2d0] sm:$0xf] %vm3048_vm1, %v3899_v12  ;;  %v3800_v17 = vpack.c.bf16 %v2129_v40, %v2129_v40  ;;  %v3900_v18 = vpack.c.bf16 %v2229_v13, %v2229_v13  ;;  %v4117_v19 = vpop.f32.mrb[84].mxu0  ;;  %v4217_v20 = vpop.f32.mrb[84].mxu1 }
 0x192   : > { %3132 = vst.msk [vmem:[%s4626_s4 + $0x14c] sm:$0xf] %vm3048_vm1, %v3802_v14  ;;  %3232 = vst.msk [vmem:[%s4626_s4 + $0x2dc] sm:$0xf] %vm3048_vm1, %v3902_v15  ;;  %v1594_v21 = vadd.f32 %v4933_v16, %v4117_v19  ;;  %v1994_v22 = vadd.f32 %v4933_v16, %v4217_v20  ;;  %v1585_v23 = vpop.f32.mrb[85].mxu0  ;;  %v1985_v24 = vpop.f32.mrb[85].mxu1 }
 0x193   : > { %3130 = vst.msk [vmem:[%s4626_s4 + $0x144] sm:$0xf] %vm3048_vm1, %v3800_v17  ;;  %3230 = vst.msk [vmem:[%s4626_s4 + $0x2d4] sm:$0xf] %vm3048_vm1, %v3900_v18  ;;  %v1586_v25 = vadd.f32 %v4933_v16, %v1585_v23  ;;  %v1986_v26 = vadd.f32 %v4933_v16, %v1985_v24  ;;  %v4118_v27 = vpop.f32.mrb[86].mxu0  ;;  %v4218_v28 = vpop.f32.mrb[86].mxu1 }
 0x194   : > { %v2134_v29 = vmax.f32 %v1594_v21, 0.0  ;;  %v2234_v30 = vmax.f32 %v1994_v22, 0.0  ;;  %v1597_v31 = vadd.f32 %v4933_v16, %v4118_v27  ;;  %v1997_v32 = vadd.f32 %v4933_v16, %v4218_v28  ;;  %v1588_v33 = vpop.f32.mrb[87].mxu0  ;;  %v1988_v34 = vpop.f32.mrb[87].mxu1 }
 0x195   : > { %v2132_v35 = vmax.f32 %v1586_v25, 0.0  ;;  %v2232_v36 = vmax.f32 %v1986_v26, 0.0  ;;  %v1589_v37 = vadd.f32 %v4933_v16, %v1588_v33  ;;  %v1989_v38 = vadd.f32 %v4933_v16, %v1988_v34 }
 0x196   : > { %v3805_v39 = vpack.c.bf16 %v2134_v29, %v2134_v29  ;;  %v3905_v41 = vpack.c.bf16 %v2234_v30, %v2234_v30  ;;  %v2135_v42 = vmax.f32 %v1597_v31, 0.0  ;;  %v2235_v43 = vmax.f32 %v1997_v32, 0.0 }
 0x197   : > { %v3803_v44 = vpack.c.bf16 %v2132_v35, %v2132_v35  ;;  %v3903_v45 = vpack.c.bf16 %v2232_v36, %v2232_v36  ;;  %v2133_v46 = vmax.f32 %v1589_v37, 0.0  ;;  %v2233_v47 = vmax.f32 %v1989_v38, 0.0 }
 0x198   : > { %3135 = vst.msk [vmem:[%s4626_s4 + $0x158] sm:$0xf] %vm3048_vm1, %v3805_v39  ;;  %3235 = vst.msk [vmem:[%s4626_s4 + $0x2e8] sm:$0xf] %vm3048_vm1, %v3905_v41  ;;  %v3806_v48 = vpack.c.bf16 %v2135_v42, %v2135_v42  ;;  %v3906_v49 = vpack.c.bf16 %v2235_v43, %v2235_v43 }
 0x199   : > { %3133 = vst.msk [vmem:[%s4626_s4 + $0x150] sm:$0xf] %vm3048_vm1, %v3803_v44  ;;  %3233 = vst.msk [vmem:[%s4626_s4 + $0x2e0] sm:$0xf] %vm3048_vm1, %v3903_v45  ;;  %v3804_v50 = vpack.c.bf16 %v2133_v46, %v2133_v46  ;;  %v3904_v51 = vpack.c.bf16 %v2233_v47, %v2233_v47  ;;  %v4121_v52 = vpop.f32.mrb[88].mxu0  ;;  %v4221_v53 = vpop.f32.mrb[88].mxu1 }
 0x19a   : > { %3136 = vst.msk [vmem:[%s4626_s4 + $0x15c] sm:$0xf] %vm3048_vm1, %v3806_v48  ;;  %3236 = vst.msk [vmem:[%s4626_s4 + $0x2ec] sm:$0xf] %vm3048_vm1, %v3906_v49  ;;  %v1610_v54 = vadd.f32 %v4933_v16, %v4121_v52  ;;  %v2010_v55 = vadd.f32 %v4933_v16, %v4221_v53  ;;  %v1601_v56 = vpop.f32.mrb[89].mxu0  ;;  %v2001_v57 = vpop.f32.mrb[89].mxu1 }
 0x19b   : > { %3134 = vst.msk [vmem:[%s4626_s4 + $0x154] sm:$0xf] %vm3048_vm1, %v3804_v50  ;;  %3234 = vst.msk [vmem:[%s4626_s4 + $0x2e4] sm:$0xf] %vm3048_vm1, %v3904_v51  ;;  %v1602_v58 = vadd.f32 %v4933_v16, %v1601_v56  ;;  %v2002_v59 = vadd.f32 %v4933_v16, %v2001_v57  ;;  %v4122_v60 = vpop.f32.mrb[90].mxu0  ;;  %v4222_v61 = vpop.f32.mrb[90].mxu1 }
 0x19c   : > { %v2138_v62 = vmax.f32 %v1610_v54, 0.0  ;;  %v2238_v63 = vmax.f32 %v2010_v55, 0.0  ;;  %v1613_v0 = vadd.f32 %v4933_v16, %v4122_v60  ;;  %v2013_v1 = vadd.f32 %v4933_v16, %v4222_v61  ;;  %v1604_v2 = vpop.f32.mrb[91].mxu0  ;;  %v2004_v3 = vpop.f32.mrb[91].mxu1 }
 0x19d   : > { %v2136_v4 = vmax.f32 %v1602_v58, 0.0  ;;  %v2236_v5 = vmax.f32 %v2002_v59, 0.0  ;;  %v1605_v6 = vadd.f32 %v4933_v16, %v1604_v2  ;;  %v2005_v7 = vadd.f32 %v4933_v16, %v2004_v3 }
 0x19e   : > { %v3809_v8 = vpack.c.bf16 %v2138_v62, %v2138_v62  ;;  %v3909_v9 = vpack.c.bf16 %v2238_v63, %v2238_v63  ;;  %v2139_v10 = vmax.f32 %v1613_v0, 0.0  ;;  %v2239_v11 = vmax.f32 %v2013_v1, 0.0 }
 0x19f   : > { %v3807_v12 = vpack.c.bf16 %v2136_v4, %v2136_v4  ;;  %v3907_v40 = vpack.c.bf16 %v2236_v5, %v2236_v5  ;;  %v2137_v13 = vmax.f32 %v1605_v6, 0.0  ;;  %v2237_v14 = vmax.f32 %v2005_v7, 0.0 }
 0x1a0   : > { %3139 = vst.msk [vmem:[%s4626_s4 + $0x168] sm:$0xf] %vm3048_vm1, %v3809_v8  ;;  %3239 = vst.msk [vmem:[%s4626_s4 + $0x2f8] sm:$0xf] %vm3048_vm1, %v3909_v9  ;;  %v3810_v15 = vpack.c.bf16 %v2139_v10, %v2139_v10  ;;  %v3910_v17 = vpack.c.bf16 %v2239_v11, %v2239_v11 }
 0x1a1   : > { %3137 = vst.msk [vmem:[%s4626_s4 + $0x160] sm:$0xf] %vm3048_vm1, %v3807_v12  ;;  %3237 = vst.msk [vmem:[%s4626_s4 + $0x2f0] sm:$0xf] %vm3048_vm1, %v3907_v40  ;;  %v3808_v18 = vpack.c.bf16 %v2137_v13, %v2137_v13  ;;  %v3908_v19 = vpack.c.bf16 %v2237_v14, %v2237_v14  ;;  %v4125_v20 = vpop.f32.mrb[92].mxu0  ;;  %v4225_v21 = vpop.f32.mrb[92].mxu1 }
 0x1a2   : > { %3140 = vst.msk [vmem:[%s4626_s4 + $0x16c] sm:$0xf] %vm3048_vm1, %v3810_v15  ;;  %3240 = vst.msk [vmem:[%s4626_s4 + $0x2fc] sm:$0xf] %vm3048_vm1, %v3910_v17  ;;  %v1626_v22 = vadd.f32 %v4933_v16, %v4125_v20  ;;  %v2026_v23 = vadd.f32 %v4933_v16, %v4225_v21  ;;  %v1617_v24 = vpop.f32.mrb[93].mxu0  ;;  %v2017_v25 = vpop.f32.mrb[93].mxu1 }
 0x1a3   : > { %3138 = vst.msk [vmem:[%s4626_s4 + $0x164] sm:$0xf] %vm3048_vm1, %v3808_v18  ;;  %3238 = vst.msk [vmem:[%s4626_s4 + $0x2f4] sm:$0xf] %vm3048_vm1, %v3908_v19  ;;  %v1618_v26 = vadd.f32 %v4933_v16, %v1617_v24  ;;  %v2018_v27 = vadd.f32 %v4933_v16, %v2017_v25  ;;  %v4126_v28 = vpop.f32.mrb[94].mxu0  ;;  %v4226_v29 = vpop.f32.mrb[94].mxu1 }
 0x1a4   : > { %v2142_v30 = vmax.f32 %v1626_v22, 0.0  ;;  %v2242_v31 = vmax.f32 %v2026_v23, 0.0  ;;  %v1629_v32 = vadd.f32 %v4933_v16, %v4126_v28  ;;  %v2029_v33 = vadd.f32 %v4933_v16, %v4226_v29  ;;  %v1620_v34 = vpop.f32.mrb[95].mxu0  ;;  %v2020_v35 = vpop.f32.mrb[95].mxu1 }
 0x1a5   : > { %v2140_v36 = vmax.f32 %v1618_v26, 0.0  ;;  %v2240_v37 = vmax.f32 %v2018_v27, 0.0  ;;  %v1621_v38 = vadd.f32 %v4933_v16, %v1620_v34  ;;  %v2021_v39 = vadd.f32 %v4933_v16, %v2020_v35 }
 0x1a6   : > { %v3813_v41 = vpack.c.bf16 %v2142_v30, %v2142_v30  ;;  %v3913_v42 = vpack.c.bf16 %v2242_v31, %v2242_v31  ;;  %v2143_v43 = vmax.f32 %v1629_v32, 0.0  ;;  %v2243_v44 = vmax.f32 %v2029_v33, 0.0 }
 0x1a7   : > { %v3811_v45 = vpack.c.bf16 %v2140_v36, %v2140_v36  ;;  %v3911_v46 = vpack.c.bf16 %v2240_v37, %v2240_v37  ;;  %v2141_v47 = vmax.f32 %v1621_v38, 0.0  ;;  %v2241_v48 = vmax.f32 %v2021_v39, 0.0 }
 0x1a8   : > { %3143 = vst.msk [vmem:[%s4626_s4 + $0x178] sm:$0xf] %vm3048_vm1, %v3813_v41  ;;  %3243 = vst.msk [vmem:[%s4626_s4 + $0x308] sm:$0xf] %vm3048_vm1, %v3913_v42  ;;  %v3814_v49 = vpack.c.bf16 %v2143_v43, %v2143_v43  ;;  %v3914_v50 = vpack.c.bf16 %v2243_v44, %v2243_v44 }
 0x1a9   : > { %3141 = vst.msk [vmem:[%s4626_s4 + $0x170] sm:$0xf] %vm3048_vm1, %v3811_v45  ;;  %3241 = vst.msk [vmem:[%s4626_s4 + $0x300] sm:$0xf] %vm3048_vm1, %v3911_v46  ;;  %v3812_v51 = vpack.c.bf16 %v2141_v47, %v2141_v47  ;;  %v3912_v52 = vpack.c.bf16 %v2241_v48, %v2241_v48  ;;  %v4129_v53 = vpop.f32.mrb[96].mxu0  ;;  %v4229_v54 = vpop.f32.mrb[96].mxu1 }
 0x1aa   : > { %3144 = vst.msk [vmem:[%s4626_s4 + $0x17c] sm:$0xf] %vm3048_vm1, %v3814_v49  ;;  %3244 = vst.msk [vmem:[%s4626_s4 + $0x30c] sm:$0xf] %vm3048_vm1, %v3914_v50  ;;  %v1642_v55 = vadd.f32 %v4933_v16, %v4129_v53  ;;  %v2042_v56 = vadd.f32 %v4933_v16, %v4229_v54  ;;  %v1633_v57 = vpop.f32.mrb[97].mxu0  ;;  %v2033_v58 = vpop.f32.mrb[97].mxu1 }
 0x1ab   : > { %3142 = vst.msk [vmem:[%s4626_s4 + $0x174] sm:$0xf] %vm3048_vm1, %v3812_v51  ;;  %3242 = vst.msk [vmem:[%s4626_s4 + $0x304] sm:$0xf] %vm3048_vm1, %v3912_v52  ;;  %v1634_v59 = vadd.f32 %v4933_v16, %v1633_v57  ;;  %v2034_v60 = vadd.f32 %v4933_v16, %v2033_v58  ;;  %v4130_v61 = vpop.f32.mrb[98].mxu0  ;;  %v4230_v62 = vpop.f32.mrb[98].mxu1 }
 0x1ac   : > { %v2146_v63 = vmax.f32 %v1642_v55, 0.0  ;;  %v2246_v0 = vmax.f32 %v2042_v56, 0.0  ;;  %v1645_v1 = vadd.f32 %v4933_v16, %v4130_v61  ;;  %v2045_v2 = vadd.f32 %v4933_v16, %v4230_v62  ;;  %v1636_v3 = vpop.f32.mrb[99].mxu0  ;;  %v2036_v4 = vpop.f32.mrb[99].mxu1 }
 0x1ad   : > { %v2144_v5 = vmax.f32 %v1634_v59, 0.0  ;;  %v2244_v6 = vmax.f32 %v2034_v60, 0.0  ;;  %v1637_v7 = vadd.f32 %v4933_v16, %v1636_v3  ;;  %v2037_v8 = vadd.f32 %v4933_v16, %v2036_v4 }
 0x1ae   : > { %v3817_v9 = vpack.c.bf16 %v2146_v63, %v2146_v63  ;;  %v3917_v10 = vpack.c.bf16 %v2246_v0, %v2246_v0  ;;  %v2147_v11 = vmax.f32 %v1645_v1, 0.0  ;;  %v2247_v12 = vmax.f32 %v2045_v2, 0.0 }
 0x1af   : > { %v3815_v40 = vpack.c.bf16 %v2144_v5, %v2144_v5  ;;  %v3915_v13 = vpack.c.bf16 %v2244_v6, %v2244_v6  ;;  %v2145_v14 = vmax.f32 %v1637_v7, 0.0  ;;  %v2245_v15 = vmax.f32 %v2037_v8, 0.0 }
 0x1b0   : > { %3147 = vst.msk [vmem:[%s4626_s4 + $0x188] sm:$0xf] %vm3048_vm1, %v3817_v9  ;;  %3247 = vst.msk [vmem:[%s4626_s4 + $0x318] sm:$0xf] %vm3048_vm1, %v3917_v10  ;;  %v3818_v17 = vpack.c.bf16 %v2147_v11, %v2147_v11  ;;  %v3918_v18 = vpack.c.bf16 %v2247_v12, %v2247_v12 }
 0x1b1   : > { %3145 = vst.msk [vmem:[%s4626_s4 + $0x180] sm:$0xf] %vm3048_vm1, %v3815_v40  ;;  %3245 = vst.msk [vmem:[%s4626_s4 + $0x310] sm:$0xf] %vm3048_vm1, %v3915_v13  ;;  %v3816_v16 = vpack.c.bf16 %v2145_v14, %v2145_v14  ;;  %v3916_v19 = vpack.c.bf16 %v2245_v15, %v2245_v15 }
 0x1b2   : > { %3148 = vst.msk [vmem:[%s4626_s4 + $0x18c] sm:$0xf] %vm3048_vm1, %v3818_v17  ;;  %3248 = vst.msk [vmem:[%s4626_s4 + $0x31c] sm:$0xf] %vm3048_vm1, %v3918_v18 }
 0x1b3   : > { %3146 = vst.msk [vmem:[%s4626_s4 + $0x184] sm:$0xf] %vm3048_vm1, %v3816_v16  ;;  %3246 = vst.msk [vmem:[%s4626_s4 + $0x314] sm:$0xf] %vm3048_vm1, %v3916_v19 }
 0x1b4 PF: > { %s13_s12 = sadd.s32 1, %s4358_s12  }
 0x1b5   : > { %p10_p4 = scmp.ge.s32.totalorder %s13_s12, 4  }
 0x1b7   :  { %12 = sbr.rel (!%p10_p4) target bundleno = 1 (0x1), region = 62 }

// kernel: qnetwork_duel_forward.5
= control target key start
LH: loop header
LB: loop body
LE: loop exit
PB: predicated region body
PF: predicated region fallthrough
CT: control target
= control target key end

     0   :  { %s1403_s12 = smov 0   ;;  %s1696_s0 = inlined_call_operand.vmem [shape: bf16[800,32], index: 0, kind: input, shape index: {}]   ;;  %s1697_s1 = inlined_call_operand.vmem [shape: bf16[32,4], index: 1, kind: input, shape index: {}]   ;;  %s1698_s2 = inlined_call_operand.vmem [shape: f32[1,4], index: 2, kind: input, shape index: {}]   ;;  %s1699_s3 = inlined_call_operand.vmem [shape: bf16[800,4], index: 3, kind: output, shape index: {}]  }
   0x1 LB: > { %s1039_s13 = sadd.s32 4294967295, %s1379_s12   ;;  %p1043_p0 = scmp.ge.s32.totalorder %s1379_s12, 1  ;;  %s1379_s12 = sphi %s1403_s12, %s13_s12  }
   0x2   : > { %p138_p1 = scmp.lt.s32.totalorder %s1379_s12, 3 }
   0x4   : > { %p139_p2 = pnand %p1043_p0, %p138_p1 }
   0x5   : > { %v1346_v0 = vld [vmem:[%s1697_s1] sm:$0xff] (!%p139_p2)   ;;  %v1381_v1 = vmov (!%p139_p2), 0.0   ;;  %v1347_v2 = vld [vmem:[%s1697_s1 + $0x8] sm:$0xff] (!%p139_p2)   ;;  %s162_s18 = smul.u32 (!%p139_p2), 50, %s1039_s13  ;;  %vm1382_vm0 = vmmov (!%p139_p2), 0   ;;  %vm373_vm1 = vcmask (!%p139_p2), 261120  }
   0x6   : > { %142 = sbr.rel (%p139_p2) target bundleno = 334 (0x14e), region = 32  ;;  %1228 = vmatprep.subr.bf16.mxu0 (!%p139_p2), %v1381_v1  ;;  %1332 = vmatprep.subr.bf16.mxu1 (!%p139_p2), %v1381_v1  ;;  %v1534_v28 = vld [vmem:[%s1698_s2] ss:$0 sm:$0xff] (!%p139_p2)  ;;  %vm932_vm2 = vcmask (!%p139_p2), 27648  }
   0x7   : > { %1229 = vmatpush3.bf16.msra.mxu0 (!%p139_p2), %v1346_v0  ;;  %1334 = vmatpush3.bf16.msra.mxu1 (!%p139_p2), %v1346_v0  ;;  %p163_p3 = scmp.lt.s32.totalorder (!%p139_p2), %s162_s18, 99 }
   0x8   : > { %1230 = vmatprep.subr.bf16.mxu0 (!%p139_p2), %v1381_v1  ;;  %1232 = vmatprep.mubr.msk.bf16.mxu0 (!%p139_p2), %vm1382_vm0, %v1381_v1 }
   0x9   : > { %1333 = vmatprep.subr.bf16.mxu1 (!%p139_p2), %v1381_v1  ;;  %1284 = vmatprep.mubr.msk.bf16.mxu1 (!%p139_p2), %vm1382_vm0, %v1381_v1 }
   0xb   : > { %1231 = vmatpush3.bf16.msra.mxu0 (!%p139_p2), %v1347_v2  ;;  %1335 = vmatpush3.bf16.msra.mxu1 (!%p139_p2), %v1347_v2 }
   0xd   : > { %s1701_s18 = smov (!%p163_p3, %s162_s18), 99 }
   0xe   : > { %s1044_s19 = sshll.u32 %s1701_s18, 2 }
   0xf   : > { %s1433_s22 = scalar_lea.vmem %s1696_s0, %s1044_s19  ;;  %s1544_s27 = scalar_lea.vmem %s1699_s3, %s1044_s19 }
  0x10   : > { %v1348_v3 = vld [vmem:[%s1433_s22] sm:$0xff]   ;;  %v1349_v4 = vld [vmem:[%s1433_s22 + $0x68] sm:$0xff]   ;;  %v1351_v6 = vld [vmem:[%s1433_s22 + $0x70] sm:$0xff]  }
  0x11   : > { %1233 = vmatmul.mubr.msk.bf16.vlgmr.msra.gmra.mrb[0].mxu0 %vm373_vm1, %v1348_v3  ;;  %1285 = vmatmul.mubr.msk.bf16.vlgmr.msra.gmra.mrb[0].mxu1 %vm373_vm1, %v1349_v4  ;;  %v1350_v5 = vld [vmem:[%s1433_s22 + $0x8] sm:$0xff]   ;;  %v1352_v7 = vld [vmem:[%s1433_s22 + $0x10] sm:$0xff]   ;;  %v1353_v8 = vld [vmem:[%s1433_s22 + $0x78] sm:$0xff]  }
  0x12   : > { %1236 = vmatprep.mubr.msk.bf16.mxu0 %vm1382_vm0, %v1381_v1  ;;  %1288 = vmatprep.mubr.msk.bf16.mxu1 %vm1382_vm0, %v1381_v1  ;;  %v1354_v9 = vld [vmem:[%s1433_s22 + $0x18] sm:$0xff]   ;;  %v1355_v10 = vld [vmem:[%s1433_s22 + $0x80] sm:$0xff]   ;;  %v1357_v12 = vld [vmem:[%s1433_s22 + $0x88] sm:$0xff]  }
  0x13   : > { %v1356_v11 = vld [vmem:[%s1433_s22 + $0x20] sm:$0xff]   ;;  %v1358_v13 = vld [vmem:[%s1433_s22 + $0x28] sm:$0xff]   ;;  %v1359_v14 = vld [vmem:[%s1433_s22 + $0x90] sm:$0xff]  }
  0x14   : > { %v1360_v15 = vld [vmem:[%s1433_s22 + $0x30] sm:$0xff]   ;;  %v1361_v16 = vld [vmem:[%s1433_s22 + $0x98] sm:$0xff]   ;;  %v1363_v18 = vld [vmem:[%s1433_s22 + $0xa0] sm:$0xff]  }
  0x15   : > { %v1362_v17 = vld [vmem:[%s1433_s22 + $0x38] sm:$0xff]   ;;  %v1364_v19 = vld [vmem:[%s1433_s22 + $0x40] sm:$0xff]   ;;  %v1365_v20 = vld [vmem:[%s1433_s22 + $0xa8] sm:$0xff]  }
  0x16   : > { %v1366_v21 = vld [vmem:[%s1433_s22 + $0x48] sm:$0xff]   ;;  %v1367_v22 = vld [vmem:[%s1433_s22 + $0xb0] sm:$0xff]   ;;  %v1369_v24 = vld [vmem:[%s1433_s22 + $0xb8] sm:$0xff]  }
  0x17   : > { %v1368_v23 = vld [vmem:[%s1433_s22 + $0x50] sm:$0xff]   ;;  %v1370_v25 = vld [vmem:[%s1433_s22 + $0x58] sm:$0xff]   ;;  %v1371_v26 = vld [vmem:[%s1433_s22 + $0xc0] sm:$0xff]  }
  0x18   : > { %v1372_v27 = vld [vmem:[%s1433_s22 + $0x60] sm:$0xff]  }
  0x19   : > { %1237 = vmatmul.mubr.msk.bf16.gmra.mrb[4].mxu0 %vm373_vm1, %v1350_v5  ;;  %1289 = vmatmul.mubr.msk.bf16.gmra.mrb[4].mxu1 %vm373_vm1, %v1351_v6 }
  0x1a   : > { %1240 = vmatprep.mubr.msk.bf16.mxu0 %vm1382_vm0, %v1381_v1  ;;  %1292 = vmatprep.mubr.msk.bf16.mxu1 %vm1382_vm0, %v1381_v1 }
  0x21   : > { %1241 = vmatmul.mubr.msk.bf16.gmra.mrb[8].mxu0 %vm373_vm1, %v1352_v7  ;;  %1293 = vmatmul.mubr.msk.bf16.gmra.mrb[8].mxu1 %vm373_vm1, %v1353_v8 }
  0x22   : > { %1244 = vmatprep.mubr.msk.bf16.mxu0 %vm1382_vm0, %v1381_v1  ;;  %1296 = vmatprep.mubr.msk.bf16.mxu1 %vm1382_vm0, %v1381_v1 }
  0x29   : > { %1245 = vmatmul.mubr.msk.bf16.gmra.mrb[12].mxu0 %vm373_vm1, %v1354_v9  ;;  %1297 = vmatmul.mubr.msk.bf16.gmra.mrb[12].mxu1 %vm373_vm1, %v1355_v10 }
  0x2a   : > { %1248 = vmatprep.mubr.msk.bf16.mxu0 %vm1382_vm0, %v1381_v1  ;;  %1300 = vmatprep.mubr.msk.bf16.mxu1 %vm1382_vm0, %v1381_v1 }
  0x31   : > { %1249 = vmatmul.mubr.msk.bf16.gmra.mrb[16].mxu0 %vm373_vm1, %v1356_v11  ;;  %1301 = vmatmul.mubr.msk.bf16.gmra.mrb[16].mxu1 %vm373_vm1, %v1357_v12 }
  0x32   : > { %1252 = vmatprep.mubr.msk.bf16.mxu0 %vm1382_vm0, %v1381_v1  ;;  %1304 = vmatprep.mubr.msk.bf16.mxu1 %vm1382_vm0, %v1381_v1 }
  0x39   : > { %1253 = vmatmul.mubr.msk.bf16.gmra.mrb[20].mxu0 %vm373_vm1, %v1358_v13  ;;  %1305 = vmatmul.mubr.msk.bf16.gmra.mrb[20].mxu1 %vm373_vm1, %v1359_v14 }
  0x3a   : > { %1256 = vmatprep.mubr.msk.bf16.mxu0 %vm1382_vm0, %v1381_v1  ;;  %1308 = vmatprep.mubr.msk.bf16.mxu1 %vm1382_vm0, %v1381_v1 }
  0x41   : > { %1257 = vmatmul.mubr.msk.bf16.gmra.mrb[24].mxu0 %vm373_vm1, %v1360_v15  ;;  %1309 = vmatmul.mubr.msk.bf16.gmra.mrb[24].mxu1 %vm373_vm1, %v1361_v16 }
  0x42   : > { %1260 = vmatprep.mubr.msk.bf16.mxu0 %vm1382_vm0, %v1381_v1  ;;  %1312 = vmatprep.mubr.msk.bf16.mxu1 %vm1382_vm0, %v1381_v1 }
  0x49   : > { %1261 = vmatmul.mubr.msk.bf16.gmra.mrb[28].mxu0 %vm373_vm1, %v1362_v17  ;;  %1313 = vmatmul.mubr.msk.bf16.gmra.mrb[28].mxu1 %vm373_vm1, %v1363_v18 }
  0x4a   : > { %1264 = vmatprep.mubr.msk.bf16.mxu0 %vm1382_vm0, %v1381_v1  ;;  %1316 = vmatprep.mubr.msk.bf16.mxu1 %vm1382_vm0, %v1381_v1 }
  0x51   : > { %1265 = vmatmul.mubr.msk.bf16.gmra.mrb[32].mxu0 %vm373_vm1, %v1364_v19  ;;  %1317 = vmatmul.mubr.msk.bf16.gmra.mrb[32].mxu1 %vm373_vm1, %v1365_v20 }
  0x52   : > { %1268 = vmatprep.mubr.msk.bf16.mxu0 %vm1382_vm0, %v1381_v1  ;;  %1320 = vmatprep.mubr.msk.bf16.mxu1 %vm1382_vm0, %v1381_v1 }
  0x59   : > { %1269 = vmatmul.mubr.msk.bf16.gmra.mrb[36].mxu0 %vm373_vm1, %v1366_v21  ;;  %1321 = vmatmul.mubr.msk.bf16.gmra.mrb[36].mxu1 %vm373_vm1, %v1367_v22 }
  0x5a   : > { %1272 = vmatprep.mubr.msk.bf16.mxu0 %vm1382_vm0, %v1381_v1  ;;  %1324 = vmatprep.mubr.msk.bf16.mxu1 %vm1382_vm0, %v1381_v1 }
  0x61   : > { %1273 = vmatmul.mubr.msk.bf16.gmra.mrb[40].mxu0 %vm373_vm1, %v1368_v23  ;;  %1325 = vmatmul.mubr.msk.bf16.gmra.mrb[40].mxu1 %vm373_vm1, %v1369_v24 }
  0x62   : > { %1276 = vmatprep.mubr.msk.bf16.mxu0 %vm1382_vm0, %v1381_v1  ;;  %1328 = vmatprep.mubr.msk.bf16.mxu1 %vm1382_vm0, %v1381_v1 }
  0x69   : > { %1277 = vmatmul.mubr.msk.bf16.gmra.mrb[44].mxu0 %vm373_vm1, %v1370_v25  ;;  %1329 = vmatmul.mubr.msk.bf16.gmra.mrb[44].mxu1 %vm373_vm1, %v1371_v26 }
  0x6a   : > { %1280 = vmatprep.mubr.msk.bf16.mxu0 %vm1382_vm0, %v1381_v1 }
  0x71   : > { %1281 = vmatmul.mubr.msk.bf16.gmra.mrb[48].mxu0 %vm373_vm1, %v1372_v27 }
  0xe4   : > { %v483_v29 = vpop.f32.mrb[0].mxu0  ;;  %v587_v32 = vpop.f32.mrb[0].mxu1 }
  0xe5   : > { %v484_v30 = vadd.f32 %v1534_v28, %v483_v29  ;;  %v1234_v31 = vpop.f32.mrb[1].mxu0  ;;  %v588_v34 = vadd.f32 %v1534_v28, %v587_v32  ;;  %v1286_v35 = vpop.f32.mrb[1].mxu1 }
  0xe6   : > { %v486_v33 = vpop.f32.mrb[2].mxu0  ;;  %v590_v39 = vpop.f32.mrb[2].mxu1 }
  0xe7   : > { %v682_v36 = vmax.f32 %v484_v30, 0.0  ;;  %v487_v37 = vadd.f32 %v1534_v28, %v486_v33  ;;  %v1235_v38 = vpop.f32.mrb[3].mxu0  ;;  %v708_v40 = vmax.f32 %v588_v34, 0.0  ;;  %v591_v41 = vadd.f32 %v1534_v28, %v590_v39  ;;  %v1287_v42 = vpop.f32.mrb[3].mxu1 }
  0xe9   : > { %v1151_v43 = vpack.c.bf16 %v682_v36, %v682_v36  ;;  %v683_v44 = vmax.f32 %v487_v37, 0.0  ;;  %v1177_v45 = vpack.c.bf16 %v708_v40, %v708_v40  ;;  %v709_v46 = vmax.f32 %v591_v41, 0.0 }
  0xeb   : > { %933 = vst.msk [vmem:[%s1544_s27] sm:$0xf] %vm932_vm2, %v1151_v43  ;;  %v1152_v47 = vpack.c.bf16 %v683_v44, %v683_v44  ;;  %959 = vst.msk [vmem:[%s1544_s27 + $0x68] sm:$0xf] %vm932_vm2, %v1177_v45  ;;  %v1178_v48 = vpack.c.bf16 %v709_v46, %v709_v46 }
  0xec   : > { %v491_v49 = vpop.f32.mrb[4].mxu0  ;;  %v595_v52 = vpop.f32.mrb[4].mxu1 }
  0xed   : > { %934 = vst.msk [vmem:[%s1544_s27 + $0x4] sm:$0xf] %vm932_vm2, %v1152_v47  ;;  %v492_v50 = vadd.f32 %v1534_v28, %v491_v49  ;;  %v1238_v51 = vpop.f32.mrb[5].mxu0  ;;  %960 = vst.msk [vmem:[%s1544_s27 + $0x6c] sm:$0xf] %vm932_vm2, %v1178_v48  ;;  %v596_v54 = vadd.f32 %v1534_v28, %v595_v52  ;;  %v1290_v55 = vpop.f32.mrb[5].mxu1 }
  0xee   : > { %v494_v53 = vpop.f32.mrb[6].mxu0  ;;  %v598_v59 = vpop.f32.mrb[6].mxu1 }
  0xef   : > { %v684_v56 = vmax.f32 %v492_v50, 0.0  ;;  %v495_v57 = vadd.f32 %v1534_v28, %v494_v53  ;;  %v1239_v58 = vpop.f32.mrb[7].mxu0  ;;  %v710_v60 = vmax.f32 %v596_v54, 0.0  ;;  %v599_v61 = vadd.f32 %v1534_v28, %v598_v59  ;;  %v1291_v62 = vpop.f32.mrb[7].mxu1 }
  0xf1   : > { %v1153_v63 = vpack.c.bf16 %v684_v56, %v684_v56  ;;  %v685_v0 = vmax.f32 %v495_v57, 0.0  ;;  %v1179_v1 = vpack.c.bf16 %v710_v60, %v710_v60  ;;  %v711_v2 = vmax.f32 %v599_v61, 0.0 }
  0xf3   : > { %935 = vst.msk [vmem:[%s1544_s27 + $0x8] sm:$0xf] %vm932_vm2, %v1153_v63  ;;  %v1154_v3 = vpack.c.bf16 %v685_v0, %v685_v0  ;;  %961 = vst.msk [vmem:[%s1544_s27 + $0x70] sm:$0xf] %vm932_vm2, %v1179_v1  ;;  %v1180_v4 = vpack.c.bf16 %v711_v2, %v711_v2 }
  0xf4   : > { %v499_v5 = vpop.f32.mrb[8].mxu0  ;;  %v603_v8 = vpop.f32.mrb[8].mxu1 }
  0xf5   : > { %936 = vst.msk [vmem:[%s1544_s27 + $0xc] sm:$0xf] %vm932_vm2, %v1154_v3  ;;  %v500_v6 = vadd.f32 %v1534_v28, %v499_v5  ;;  %v1242_v7 = vpop.f32.mrb[9].mxu0  ;;  %962 = vst.msk [vmem:[%s1544_s27 + $0x74] sm:$0xf] %vm932_vm2, %v1180_v4  ;;  %v604_v10 = vadd.f32 %v1534_v28, %v603_v8  ;;  %v1294_v11 = vpop.f32.mrb[9].mxu1 }
  0xf6   : > { %v502_v9 = vpop.f32.mrb[10].mxu0  ;;  %v606_v15 = vpop.f32.mrb[10].mxu1 }
  0xf7   : > { %v686_v12 = vmax.f32 %v500_v6, 0.0  ;;  %v503_v13 = vadd.f32 %v1534_v28, %v502_v9  ;;  %v1243_v14 = vpop.f32.mrb[11].mxu0  ;;  %v712_v16 = vmax.f32 %v604_v10, 0.0  ;;  %v607_v17 = vadd.f32 %v1534_v28, %v606_v15  ;;  %v1295_v18 = vpop.f32.mrb[11].mxu1 }
  0xf9   : > { %v1155_v19 = vpack.c.bf16 %v686_v12, %v686_v12  ;;  %v687_v20 = vmax.f32 %v503_v13, 0.0  ;;  %v1181_v21 = vpack.c.bf16 %v712_v16, %v712_v16  ;;  %v713_v22 = vmax.f32 %v607_v17, 0.0 }
  0xfb   : > { %937 = vst.msk [vmem:[%s1544_s27 + $0x10] sm:$0xf] %vm932_vm2, %v1155_v19  ;;  %v1156_v23 = vpack.c.bf16 %v687_v20, %v687_v20  ;;  %963 = vst.msk [vmem:[%s1544_s27 + $0x78] sm:$0xf] %vm932_vm2, %v1181_v21  ;;  %v1182_v24 = vpack.c.bf16 %v713_v22, %v713_v22 }
  0xfc   : > { %v507_v25 = vpop.f32.mrb[12].mxu0  ;;  %v611_v29 = vpop.f32.mrb[12].mxu1 }
  0xfd   : > { %938 = vst.msk [vmem:[%s1544_s27 + $0x14] sm:$0xf] %vm932_vm2, %v1156_v23  ;;  %v508_v26 = vadd.f32 %v1534_v28, %v507_v25  ;;  %v1246_v27 = vpop.f32.mrb[13].mxu0  ;;  %964 = vst.msk [vmem:[%s1544_s27 + $0x7c] sm:$0xf] %vm932_vm2, %v1182_v24  ;;  %v612_v31 = vadd.f32 %v1534_v28, %v611_v29  ;;  %v1298_v32 = vpop.f32.mrb[13].mxu1 }
  0xfe   : > { %v510_v30 = vpop.f32.mrb[14].mxu0  ;;  %v614_v36 = vpop.f32.mrb[14].mxu1 }
  0xff   : > { %v688_v33 = vmax.f32 %v508_v26, 0.0  ;;  %v511_v34 = vadd.f32 %v1534_v28, %v510_v30  ;;  %v1247_v35 = vpop.f32.mrb[15].mxu0  ;;  %v714_v37 = vmax.f32 %v612_v31, 0.0  ;;  %v615_v38 = vadd.f32 %v1534_v28, %v614_v36  ;;  %v1299_v39 = vpop.f32.mrb[15].mxu1 }
 0x101   : > { %v1157_v40 = vpack.c.bf16 %v688_v33, %v688_v33  ;;  %v689_v41 = vmax.f32 %v511_v34, 0.0  ;;  %v1183_v42 = vpack.c.bf16 %v714_v37, %v714_v37  ;;  %v715_v43 = vmax.f32 %v615_v38, 0.0 }
 0x103   : > { %939 = vst.msk [vmem:[%s1544_s27 + $0x18] sm:$0xf] %vm932_vm2, %v1157_v40  ;;  %v1158_v44 = vpack.c.bf16 %v689_v41, %v689_v41  ;;  %965 = vst.msk [vmem:[%s1544_s27 + $0x80] sm:$0xf] %vm932_vm2, %v1183_v42  ;;  %v1184_v45 = vpack.c.bf16 %v715_v43, %v715_v43 }
 0x104   : > { %v515_v46 = vpop.f32.mrb[16].mxu0  ;;  %v619_v49 = vpop.f32.mrb[16].mxu1 }
 0x105   : > { %940 = vst.msk [vmem:[%s1544_s27 + $0x1c] sm:$0xf] %vm932_vm2, %v1158_v44  ;;  %v516_v47 = vadd.f32 %v1534_v28, %v515_v46  ;;  %v1250_v48 = vpop.f32.mrb[17].mxu0  ;;  %966 = vst.msk [vmem:[%s1544_s27 + $0x84] sm:$0xf] %vm932_vm2, %v1184_v45  ;;  %v620_v51 = vadd.f32 %v1534_v28, %v619_v49  ;;  %v1302_v52 = vpop.f32.mrb[17].mxu1 }
 0x106   : > { %v518_v50 = vpop.f32.mrb[18].mxu0  ;;  %v622_v56 = vpop.f32.mrb[18].mxu1 }
 0x107   : > { %v690_v53 = vmax.f32 %v516_v47, 0.0  ;;  %v519_v54 = vadd.f32 %v1534_v28, %v518_v50  ;;  %v1251_v55 = vpop.f32.mrb[19].mxu0  ;;  %v716_v57 = vmax.f32 %v620_v51, 0.0  ;;  %v623_v58 = vadd.f32 %v1534_v28, %v622_v56  ;;  %v1303_v59 = vpop.f32.mrb[19].mxu1 }
 0x109   : > { %v1159_v60 = vpack.c.bf16 %v690_v53, %v690_v53  ;;  %v691_v61 = vmax.f32 %v519_v54, 0.0  ;;  %v1185_v62 = vpack.c.bf16 %v716_v57, %v716_v57  ;;  %v717_v63 = vmax.f32 %v623_v58, 0.0 }
 0x10b   : > { %941 = vst.msk [vmem:[%s1544_s27 + $0x20] sm:$0xf] %vm932_vm2, %v1159_v60  ;;  %v1160_v0 = vpack.c.bf16 %v691_v61, %v691_v61  ;;  %967 = vst.msk [vmem:[%s1544_s27 + $0x88] sm:$0xf] %vm932_vm2, %v1185_v62  ;;  %v1186_v1 = vpack.c.bf16 %v717_v63, %v717_v63 }
 0x10c   : > { %v523_v2 = vpop.f32.mrb[20].mxu0  ;;  %v627_v5 = vpop.f32.mrb[20].mxu1 }
 0x10d   : > { %942 = vst.msk [vmem:[%s1544_s27 + $0x24] sm:$0xf] %vm932_vm2, %v1160_v0  ;;  %v524_v3 = vadd.f32 %v1534_v28, %v523_v2  ;;  %v1254_v4 = vpop.f32.mrb[21].mxu0  ;;  %968 = vst.msk [vmem:[%s1544_s27 + $0x8c] sm:$0xf] %vm932_vm2, %v1186_v1  ;;  %v628_v7 = vadd.f32 %v1534_v28, %v627_v5  ;;  %v1306_v8 = vpop.f32.mrb[21].mxu1 }
 0x10e   : > { %v526_v6 = vpop.f32.mrb[22].mxu0  ;;  %v630_v12 = vpop.f32.mrb[22].mxu1 }
 0x10f   : > { %v692_v9 = vmax.f32 %v524_v3, 0.0  ;;  %v527_v10 = vadd.f32 %v1534_v28, %v526_v6  ;;  %v1255_v11 = vpop.f32.mrb[23].mxu0  ;;  %v718_v13 = vmax.f32 %v628_v7, 0.0  ;;  %v631_v14 = vadd.f32 %v1534_v28, %v630_v12  ;;  %v1307_v15 = vpop.f32.mrb[23].mxu1 }
 0x111   : > { %v1161_v16 = vpack.c.bf16 %v692_v9, %v692_v9  ;;  %v693_v17 = vmax.f32 %v527_v10, 0.0  ;;  %v1187_v18 = vpack.c.bf16 %v718_v13, %v718_v13  ;;  %v719_v19 = vmax.f32 %v631_v14, 0.0 }
 0x113   : > { %943 = vst.msk [vmem:[%s1544_s27 + $0x28] sm:$0xf] %vm932_vm2, %v1161_v16  ;;  %v1162_v20 = vpack.c.bf16 %v693_v17, %v693_v17  ;;  %969 = vst.msk [vmem:[%s1544_s27 + $0x90] sm:$0xf] %vm932_vm2, %v1187_v18  ;;  %v1188_v21 = vpack.c.bf16 %v719_v19, %v719_v19 }
 0x114   : > { %v531_v22 = vpop.f32.mrb[24].mxu0  ;;  %v635_v25 = vpop.f32.mrb[24].mxu1 }
 0x115   : > { %944 = vst.msk [vmem:[%s1544_s27 + $0x2c] sm:$0xf] %vm932_vm2, %v1162_v20  ;;  %v532_v23 = vadd.f32 %v1534_v28, %v531_v22  ;;  %v1258_v24 = vpop.f32.mrb[25].mxu0  ;;  %970 = vst.msk [vmem:[%s1544_s27 + $0x94] sm:$0xf] %vm932_vm2, %v1188_v21  ;;  %v636_v27 = vadd.f32 %v1534_v28, %v635_v25  ;;  %v1310_v29 = vpop.f32.mrb[25].mxu1 }
 0x116   : > { %v534_v26 = vpop.f32.mrb[26].mxu0  ;;  %v638_v33 = vpop.f32.mrb[26].mxu1 }
 0x117   : > { %v694_v30 = vmax.f32 %v532_v23, 0.0  ;;  %v535_v31 = vadd.f32 %v1534_v28, %v534_v26  ;;  %v1259_v32 = vpop.f32.mrb[27].mxu0  ;;  %v720_v34 = vmax.f32 %v636_v27, 0.0  ;;  %v639_v35 = vadd.f32 %v1534_v28, %v638_v33  ;;  %v1311_v36 = vpop.f32.mrb[27].mxu1 }
 0x119   : > { %v1163_v37 = vpack.c.bf16 %v694_v30, %v694_v30  ;;  %v695_v38 = vmax.f32 %v535_v31, 0.0  ;;  %v1189_v39 = vpack.c.bf16 %v720_v34, %v720_v34  ;;  %v721_v40 = vmax.f32 %v639_v35, 0.0 }
 0x11b   : > { %945 = vst.msk [vmem:[%s1544_s27 + $0x30] sm:$0xf] %vm932_vm2, %v1163_v37  ;;  %v1164_v41 = vpack.c.bf16 %v695_v38, %v695_v38  ;;  %971 = vst.msk [vmem:[%s1544_s27 + $0x98] sm:$0xf] %vm932_vm2, %v1189_v39  ;;  %v1190_v42 = vpack.c.bf16 %v721_v40, %v721_v40 }
 0x11c   : > { %v539_v43 = vpop.f32.mrb[28].mxu0  ;;  %v643_v46 = vpop.f32.mrb[28].mxu1 }
 0x11d   : > { %946 = vst.msk [vmem:[%s1544_s27 + $0x34] sm:$0xf] %vm932_vm2, %v1164_v41  ;;  %v540_v44 = vadd.f32 %v1534_v28, %v539_v43  ;;  %v1262_v45 = vpop.f32.mrb[29].mxu0  ;;  %972 = vst.msk [vmem:[%s1544_s27 + $0x9c] sm:$0xf] %vm932_vm2, %v1190_v42  ;;  %v644_v48 = vadd.f32 %v1534_v28, %v643_v46  ;;  %v1314_v49 = vpop.f32.mrb[29].mxu1 }
 0x11e   : > { %v542_v47 = vpop.f32.mrb[30].mxu0  ;;  %v646_v53 = vpop.f32.mrb[30].mxu1 }
 0x11f   : > { %v696_v50 = vmax.f32 %v540_v44, 0.0  ;;  %v543_v51 = vadd.f32 %v1534_v28, %v542_v47  ;;  %v1263_v52 = vpop.f32.mrb[31].mxu0  ;;  %v722_v54 = vmax.f32 %v644_v48, 0.0  ;;  %v647_v55 = vadd.f32 %v1534_v28, %v646_v53  ;;  %v1315_v56 = vpop.f32.mrb[31].mxu1 }
 0x121   : > { %v1165_v57 = vpack.c.bf16 %v696_v50, %v696_v50  ;;  %v697_v58 = vmax.f32 %v543_v51, 0.0  ;;  %v1191_v59 = vpack.c.bf16 %v722_v54, %v722_v54  ;;  %v723_v60 = vmax.f32 %v647_v55, 0.0 }
 0x123   : > { %947 = vst.msk [vmem:[%s1544_s27 + $0x38] sm:$0xf] %vm932_vm2, %v1165_v57  ;;  %v1166_v61 = vpack.c.bf16 %v697_v58, %v697_v58  ;;  %973 = vst.msk [vmem:[%s1544_s27 + $0xa0] sm:$0xf] %vm932_vm2, %v1191_v59  ;;  %v1192_v62 = vpack.c.bf16 %v723_v60, %v723_v60 }
 0x124   : > { %v547_v63 = vpop.f32.mrb[32].mxu0  ;;  %v651_v2 = vpop.f32.mrb[32].mxu1 }
 0x125   : > { %948 = vst.msk [vmem:[%s1544_s27 + $0x3c] sm:$0xf] %vm932_vm2, %v1166_v61  ;;  %v548_v0 = vadd.f32 %v1534_v28, %v547_v63  ;;  %v1266_v1 = vpop.f32.mrb[33].mxu0  ;;  %974 = vst.msk [vmem:[%s1544_s27 + $0xa4] sm:$0xf] %vm932_vm2, %v1192_v62  ;;  %v652_v4 = vadd.f32 %v1534_v28, %v651_v2  ;;  %v1318_v5 = vpop.f32.mrb[33].mxu1 }
 0x126   : > { %v550_v3 = vpop.f32.mrb[34].mxu0  ;;  %v654_v9 = vpop.f32.mrb[34].mxu1 }
 0x127   : > { %v698_v6 = vmax.f32 %v548_v0, 0.0  ;;  %v551_v7 = vadd.f32 %v1534_v28, %v550_v3  ;;  %v1267_v8 = vpop.f32.mrb[35].mxu0  ;;  %v724_v10 = vmax.f32 %v652_v4, 0.0  ;;  %v655_v11 = vadd.f32 %v1534_v28, %v654_v9  ;;  %v1319_v12 = vpop.f32.mrb[35].mxu1 }
 0x129   : > { %v1167_v13 = vpack.c.bf16 %v698_v6, %v698_v6  ;;  %v699_v14 = vmax.f32 %v551_v7, 0.0  ;;  %v1193_v15 = vpack.c.bf16 %v724_v10, %v724_v10  ;;  %v725_v16 = vmax.f32 %v655_v11, 0.0 }
 0x12b   : > { %949 = vst.msk [vmem:[%s1544_s27 + $0x40] sm:$0xf] %vm932_vm2, %v1167_v13  ;;  %v1168_v17 = vpack.c.bf16 %v699_v14, %v699_v14  ;;  %975 = vst.msk [vmem:[%s1544_s27 + $0xa8] sm:$0xf] %vm932_vm2, %v1193_v15  ;;  %v1194_v18 = vpack.c.bf16 %v725_v16, %v725_v16 }
 0x12c   : > { %v555_v19 = vpop.f32.mrb[36].mxu0  ;;  %v659_v22 = vpop.f32.mrb[36].mxu1 }
 0x12d   : > { %950 = vst.msk [vmem:[%s1544_s27 + $0x44] sm:$0xf] %vm932_vm2, %v1168_v17  ;;  %v556_v20 = vadd.f32 %v1534_v28, %v555_v19  ;;  %v1270_v21 = vpop.f32.mrb[37].mxu0  ;;  %976 = vst.msk [vmem:[%s1544_s27 + $0xac] sm:$0xf] %vm932_vm2, %v1194_v18  ;;  %v660_v24 = vadd.f32 %v1534_v28, %v659_v22  ;;  %v1322_v25 = vpop.f32.mrb[37].mxu1 }
 0x12e   : > { %v558_v23 = vpop.f32.mrb[38].mxu0  ;;  %v662_v30 = vpop.f32.mrb[38].mxu1 }
 0x12f   : > { %v700_v26 = vmax.f32 %v556_v20, 0.0  ;;  %v559_v27 = vadd.f32 %v1534_v28, %v558_v23  ;;  %v1271_v29 = vpop.f32.mrb[39].mxu0  ;;  %v726_v31 = vmax.f32 %v660_v24, 0.0  ;;  %v663_v32 = vadd.f32 %v1534_v28, %v662_v30  ;;  %v1323_v33 = vpop.f32.mrb[39].mxu1 }
 0x131   : > { %v1169_v34 = vpack.c.bf16 %v700_v26, %v700_v26  ;;  %v701_v35 = vmax.f32 %v559_v27, 0.0  ;;  %v1195_v36 = vpack.c.bf16 %v726_v31, %v726_v31  ;;  %v727_v37 = vmax.f32 %v663_v32, 0.0 }
 0x133   : > { %951 = vst.msk [vmem:[%s1544_s27 + $0x48] sm:$0xf] %vm932_vm2, %v1169_v34  ;;  %v1170_v38 = vpack.c.bf16 %v701_v35, %v701_v35  ;;  %977 = vst.msk [vmem:[%s1544_s27 + $0xb0] sm:$0xf] %vm932_vm2, %v1195_v36  ;;  %v1196_v39 = vpack.c.bf16 %v727_v37, %v727_v37 }
 0x134   : > { %v563_v40 = vpop.f32.mrb[40].mxu0  ;;  %v667_v43 = vpop.f32.mrb[40].mxu1 }
 0x135   : > { %952 = vst.msk [vmem:[%s1544_s27 + $0x4c] sm:$0xf] %vm932_vm2, %v1170_v38  ;;  %v564_v41 = vadd.f32 %v1534_v28, %v563_v40  ;;  %v1274_v42 = vpop.f32.mrb[41].mxu0  ;;  %978 = vst.msk [vmem:[%s1544_s27 + $0xb4] sm:$0xf] %vm932_vm2, %v1196_v39  ;;  %v668_v45 = vadd.f32 %v1534_v28, %v667_v43  ;;  %v1326_v46 = vpop.f32.mrb[41].mxu1 }
 0x136   : > { %v566_v44 = vpop.f32.mrb[42].mxu0  ;;  %v670_v50 = vpop.f32.mrb[42].mxu1 }
 0x137   : > { %v702_v47 = vmax.f32 %v564_v41, 0.0  ;;  %v567_v48 = vadd.f32 %v1534_v28, %v566_v44  ;;  %v1275_v49 = vpop.f32.mrb[43].mxu0  ;;  %v728_v51 = vmax.f32 %v668_v45, 0.0  ;;  %v671_v52 = vadd.f32 %v1534_v28, %v670_v50  ;;  %v1327_v53 = vpop.f32.mrb[43].mxu1 }
 0x139   : > { %v1171_v54 = vpack.c.bf16 %v702_v47, %v702_v47  ;;  %v703_v55 = vmax.f32 %v567_v48, 0.0  ;;  %v1197_v56 = vpack.c.bf16 %v728_v51, %v728_v51  ;;  %v729_v57 = vmax.f32 %v671_v52, 0.0 }
 0x13b   : > { %953 = vst.msk [vmem:[%s1544_s27 + $0x50] sm:$0xf] %vm932_vm2, %v1171_v54  ;;  %v1172_v58 = vpack.c.bf16 %v703_v55, %v703_v55  ;;  %979 = vst.msk [vmem:[%s1544_s27 + $0xb8] sm:$0xf] %vm932_vm2, %v1197_v56  ;;  %v1198_v59 = vpack.c.bf16 %v729_v57, %v729_v57 }
 0x13c   : > { %v571_v60 = vpop.f32.mrb[44].mxu0  ;;  %v675_v63 = vpop.f32.mrb[44].mxu1 }
 0x13d   : > { %954 = vst.msk [vmem:[%s1544_s27 + $0x54] sm:$0xf] %vm932_vm2, %v1172_v58  ;;  %v572_v61 = vadd.f32 %v1534_v28, %v571_v60  ;;  %v1278_v62 = vpop.f32.mrb[45].mxu0  ;;  %980 = vst.msk [vmem:[%s1544_s27 + $0xbc] sm:$0xf] %vm932_vm2, %v1198_v59  ;;  %v676_v1 = vadd.f32 %v1534_v28, %v675_v63  ;;  %v1330_v2 = vpop.f32.mrb[45].mxu1 }
 0x13e   : > { %v574_v0 = vpop.f32.mrb[46].mxu0  ;;  %v678_v6 = vpop.f32.mrb[46].mxu1 }
 0x13f   : > { %v704_v3 = vmax.f32 %v572_v61, 0.0  ;;  %v575_v4 = vadd.f32 %v1534_v28, %v574_v0  ;;  %v1279_v5 = vpop.f32.mrb[47].mxu0  ;;  %v730_v7 = vmax.f32 %v676_v1, 0.0  ;;  %v679_v8 = vadd.f32 %v1534_v28, %v678_v6  ;;  %v1331_v9 = vpop.f32.mrb[47].mxu1 }
 0x141   : > { %v1173_v10 = vpack.c.bf16 %v704_v3, %v704_v3  ;;  %v705_v11 = vmax.f32 %v575_v4, 0.0  ;;  %v1199_v12 = vpack.c.bf16 %v730_v7, %v730_v7  ;;  %v731_v13 = vmax.f32 %v679_v8, 0.0 }
 0x143   : > { %955 = vst.msk [vmem:[%s1544_s27 + $0x58] sm:$0xf] %vm932_vm2, %v1173_v10  ;;  %v1174_v14 = vpack.c.bf16 %v705_v11, %v705_v11  ;;  %981 = vst.msk [vmem:[%s1544_s27 + $0xc0] sm:$0xf] %vm932_vm2, %v1199_v12  ;;  %v1200_v15 = vpack.c.bf16 %v731_v13, %v731_v13 }
 0x144   : > { %v579_v16 = vpop.f32.mrb[48].mxu0 }
 0x145   : > { %956 = vst.msk [vmem:[%s1544_s27 + $0x5c] sm:$0xf] %vm932_vm2, %v1174_v14  ;;  %v580_v17 = vadd.f32 %v1534_v28, %v579_v16  ;;  %v1282_v18 = vpop.f32.mrb[49].mxu0  ;;  %982 = vst.msk [vmem:[%s1544_s27 + $0xc4] sm:$0xf] %vm932_vm2, %v1200_v15 }
 0x146   : > { %v582_v19 = vpop.f32.mrb[50].mxu0 }
 0x147   : > { %v706_v20 = vmax.f32 %v580_v17, 0.0  ;;  %v583_v21 = vadd.f32 %v1534_v28, %v582_v19  ;;  %v1283_v22 = vpop.f32.mrb[51].mxu0 }
 0x149   : > { %v1175_v23 = vpack.c.bf16 %v706_v20, %v706_v20  ;;  %v707_v24 = vmax.f32 %v583_v21, 0.0 }
 0x14b   : > { %957 = vst.msk [vmem:[%s1544_s27 + $0x60] sm:$0xf] %vm932_vm2, %v1175_v23  ;;  %v1176_v25 = vpack.c.bf16 %v707_v24, %v707_v24 }
 0x14d   : > { %958 = vst.msk [vmem:[%s1544_s27 + $0x64] sm:$0xf] %vm932_vm2, %v1176_v25 }
 0x14e PF: > { %s13_s12 = sadd.s32 1, %s1379_s12  }
 0x14f   : > { %p10_p4 = scmp.ge.s32.totalorder %s13_s12, 4  }
 0x151   :  { %12 = sbr.rel (!%p10_p4) target bundleno = 1 (0x1), region = 62 }

// kernel: qnetwork_duel_forward.6
= control target key start
LH: loop header
LB: loop body
LE: loop exit
PB: predicated region body
PF: predicated region fallthrough
CT: control target
= control target key end

     0   :  { %v659_v0 = vmov 0.0   ;;  %vm660_vm0 = vmmov 0   ;;  %vm142_vm1 = vcmask 523264   ;;  %vm444_vm2 = vcmask 60416   ;;  %s888_s1 = inlined_call_operand.vmem [shape: bf16[64,8], index: 1, kind: input, shape index: {}]   ;;  %s889_s0 = inlined_call_operand.vmem [shape: bf16[200,64], index: 0, kind: input, shape index: {}]   ;;  %s890_s2 = inlined_call_operand.vmem [shape: f32[1,8], index: 2, kind: input, shape index: {}]   ;;  %s891_s3 = inlined_call_operand.vmem [shape: bf16[200,8], index: 3, kind: output, shape index: {}]  }
   0x1   :  { %572 = vmatprep.subr.bf16.mxu0 %v659_v0  ;;  %v642_v1 = vld [vmem:[%s888_s1] sm:$0xff]   ;;  %632 = vmatprep.subr.bf16.mxu1 %v659_v0  ;;  %v643_v2 = vld [vmem:[%s888_s1 + $0x8] sm:$0xff]   ;;  %v644_v3 = vld [vmem:[%s888_s1 + $0x10] sm:$0xff]  }
   0x2   :  { %580 = vmatprep.mubr.msk.bf16.mxu0 %vm660_vm0, %v659_v0  ;;  %608 = vmatprep.mubr.msk.bf16.mxu1 %vm660_vm0, %v659_v0  ;;  %v645_v4 = vld [vmem:[%s888_s1 + $0x18] sm:$0xff]   ;;  %v646_v5 = vld [vmem:[%s889_s0] sm:$0xff]   ;;  %v648_v7 = vld [vmem:[%s889_s0 + $0x8] sm:$0xff]  }
   0x3   :  { %573 = vmatpush3.bf16.msra.mxu0 %v642_v1  ;;  %636 = vmatpush3.bf16.msra.mxu1 %v642_v1  ;;  %v647_v6 = vld [vmem:[%s889_s0 + $0x38] sm:$0xff]   ;;  %v649_v8 = vld [vmem:[%s889_s0 + $0x40] sm:$0xff]   ;;  %v650_v9 = vld [vmem:[%s889_s0 + $0x10] sm:$0xff]  }
   0x4   :  { %574 = vmatprep.subr.bf16.mxu0 %v659_v0  ;;  %633 = vmatprep.subr.bf16.mxu1 %v659_v0  ;;  %v651_v10 = vld [vmem:[%s889_s0 + $0x48] sm:$0xff]   ;;  %v652_v11 = vld [vmem:[%s889_s0 + $0x18] sm:$0xff]   ;;  %v653_v12 = vld [vmem:[%s889_s0 + $0x50] sm:$0xff]  }
   0x5   :  { %v654_v13 = vld [vmem:[%s889_s0 + $0x20] sm:$0xff]   ;;  %v655_v14 = vld [vmem:[%s889_s0 + $0x58] sm:$0xff]   ;;  %v656_v15 = vld [vmem:[%s889_s0 + $0x28] sm:$0xff]  }
   0x6   :  { %v657_v16 = vld [vmem:[%s889_s0 + $0x60] ss:$0 sps:$4 sm:$0xff]   ;;  %v658_v17 = vld [vmem:[%s889_s0 + $0x30] sm:$0xff]  }
   0x7   :  { %575 = vmatpush3.bf16.msra.mxu0 %v643_v2  ;;  %637 = vmatpush3.bf16.msra.mxu1 %v643_v2  ;;  %v761_v18 = vld [vmem:[%s890_s2] ss:$0 sm:$0xff] }
   0x8   :  { %576 = vmatprep.subr.bf16.mxu0 %v659_v0  ;;  %634 = vmatprep.subr.bf16.mxu1 %v659_v0 }
   0xb   :  { %577 = vmatpush3.bf16.msra.mxu0 %v644_v3  ;;  %638 = vmatpush3.bf16.msra.mxu1 %v644_v3 }
   0xc   :  { %578 = vmatprep.subr.bf16.mxu0 %v659_v0  ;;  %635 = vmatprep.subr.bf16.mxu1 %v659_v0 }
   0xf   :  { %579 = vmatpush3.bf16.msra.mxu0 %v645_v4  ;;  %639 = vmatpush3.bf16.msra.mxu1 %v645_v4 }
  0x12   :  { %581 = vmatmul.mubr.msk.bf16.vlgmr.msra.gmra.mrb[0].mxu0 %vm142_vm1, %v646_v5  ;;  %609 = vmatmul.mubr.msk.bf16.vlgmr.msra.gmra.mrb[0].mxu1 %vm142_vm1, %v647_v6 }
  0x13   :  { %584 = vmatprep.mubr.msk.bf16.mxu0 %vm660_vm0, %v659_v0  ;;  %612 = vmatprep.mubr.msk.bf16.mxu1 %vm660_vm0, %v659_v0 }
  0x1a   :  { %585 = vmatmul.mubr.msk.bf16.gmra.mrb[4].mxu0 %vm142_vm1, %v648_v7  ;;  %613 = vmatmul.mubr.msk.bf16.gmra.mrb[4].mxu1 %vm142_vm1, %v649_v8 }
  0x1b   :  { %588 = vmatprep.mubr.msk.bf16.mxu0 %vm660_vm0, %v659_v0  ;;  %616 = vmatprep.mubr.msk.bf16.mxu1 %vm660_vm0, %v659_v0 }
  0x22   :  { %589 = vmatmul.mubr.msk.bf16.gmra.mrb[8].mxu0 %vm142_vm1, %v650_v9  ;;  %617 = vmatmul.mubr.msk.bf16.gmra.mrb[8].mxu1 %vm142_vm1, %v651_v10 }
  0x23   :  { %592 = vmatprep.mubr.msk.bf16.mxu0 %vm660_vm0, %v659_v0  ;;  %620 = vmatprep.mubr.msk.bf16.mxu1 %vm660_vm0, %v659_v0 }
  0x2a   :  { %593 = vmatmul.mubr.msk.bf16.gmra.mrb[12].mxu0 %vm142_vm1, %v652_v11  ;;  %621 = vmatmul.mubr.msk.bf16.gmra.mrb[12].mxu1 %vm142_vm1, %v653_v12 }
  0x2b   :  { %596 = vmatprep.mubr.msk.bf16.mxu0 %vm660_vm0, %v659_v0  ;;  %624 = vmatprep.mubr.msk.bf16.mxu1 %vm660_vm0, %v659_v0 }
  0x32   :  { %597 = vmatmul.mubr.msk.bf16.gmra.mrb[16].mxu0 %vm142_vm1, %v654_v13  ;;  %625 = vmatmul.mubr.msk.bf16.gmra.mrb[16].mxu1 %vm142_vm1, %v655_v14 }
  0x33   :  { %600 = vmatprep.mubr.msk.bf16.mxu0 %vm660_vm0, %v659_v0  ;;  %628 = vmatprep.mubr.msk.bf16.mxu1 %vm660_vm0, %v659_v0 }
  0x3a   :  { %601 = vmatmul.mubr.msk.bf16.gmra.mrb[20].mxu0 %vm142_vm1, %v656_v15  ;;  %629 = vmatmul.mubr.msk.bf16.gmra.mrb[20].mxu1 %vm142_vm1, %v657_v16 }
  0x3b   :  { %604 = vmatprep.mubr.msk.bf16.mxu0 %vm660_vm0, %v659_v0 }
  0x42   :  { %605 = vmatmul.mubr.msk.bf16.gmra.mrb[24].mxu0 %vm142_vm1, %v658_v17 }
  0xe5   :  { %v216_v19 = vpop.f32.mrb[0].mxu0  ;;  %v272_v20 = vpop.f32.mrb[0].mxu1 }
  0xe6   :  { %v217_v21 = vadd.f32 %v761_v18, %v216_v19  ;;  %v582_v22 = vpop.f32.mrb[1].mxu0  ;;  %v273_v23 = vadd.f32 %v761_v18, %v272_v20  ;;  %v610_v24 = vpop.f32.mrb[1].mxu1 }
  0xe7   :  { %v219_v25 = vpop.f32.mrb[2].mxu0  ;;  %v275_v26 = vpop.f32.mrb[2].mxu1 }
  0xe8   :  { %v318_v27 = vmax.f32 %v217_v21, 0.0  ;;  %v220_v28 = vadd.f32 %v761_v18, %v219_v25  ;;  %v583_v29 = vpop.f32.mrb[3].mxu0  ;;  %v332_v30 = vmax.f32 %v273_v23, 0.0  ;;  %v276_v31 = vadd.f32 %v761_v18, %v275_v26  ;;  %v611_v32 = vpop.f32.mrb[3].mxu1 }
  0xea   :  { %v530_v33 = vpack.c.bf16 %v318_v27, %v318_v27  ;;  %v319_v34 = vmax.f32 %v220_v28, 0.0  ;;  %v544_v35 = vpack.c.bf16 %v332_v30, %v332_v30  ;;  %v333_v36 = vmax.f32 %v276_v31, 0.0 }
  0xec   :  { %445 = vst.msk [vmem:[%s891_s3] sm:$0xf] %vm444_vm2, %v530_v33  ;;  %v531_v37 = vpack.c.bf16 %v319_v34, %v319_v34  ;;  %459 = vst.msk [vmem:[%s891_s3 + $0x38] sm:$0xf] %vm444_vm2, %v544_v35  ;;  %v545_v38 = vpack.c.bf16 %v333_v36, %v333_v36 }
  0xed   :  { %v224_v39 = vpop.f32.mrb[4].mxu0  ;;  %v280_v40 = vpop.f32.mrb[4].mxu1 }
  0xee   :  { %446 = vst.msk [vmem:[%s891_s3 + $0x4] sm:$0xf] %vm444_vm2, %v531_v37  ;;  %v225_v41 = vadd.f32 %v761_v18, %v224_v39  ;;  %v586_v42 = vpop.f32.mrb[5].mxu0  ;;  %460 = vst.msk [vmem:[%s891_s3 + $0x3c] sm:$0xf] %vm444_vm2, %v545_v38  ;;  %v281_v43 = vadd.f32 %v761_v18, %v280_v40  ;;  %v614_v44 = vpop.f32.mrb[5].mxu1 }
  0xef   :  { %v227_v45 = vpop.f32.mrb[6].mxu0  ;;  %v283_v46 = vpop.f32.mrb[6].mxu1 }
  0xf0   :  { %v320_v47 = vmax.f32 %v225_v41, 0.0  ;;  %v228_v48 = vadd.f32 %v761_v18, %v227_v45  ;;  %v587_v49 = vpop.f32.mrb[7].mxu0  ;;  %v334_v50 = vmax.f32 %v281_v43, 0.0  ;;  %v284_v51 = vadd.f32 %v761_v18, %v283_v46  ;;  %v615_v52 = vpop.f32.mrb[7].mxu1 }
  0xf2   :  { %v532_v53 = vpack.c.bf16 %v320_v47, %v320_v47  ;;  %v321_v54 = vmax.f32 %v228_v48, 0.0  ;;  %v546_v55 = vpack.c.bf16 %v334_v50, %v334_v50  ;;  %v335_v56 = vmax.f32 %v284_v51, 0.0 }
  0xf4   :  { %447 = vst.msk [vmem:[%s891_s3 + $0x8] sm:$0xf] %vm444_vm2, %v532_v53  ;;  %v533_v57 = vpack.c.bf16 %v321_v54, %v321_v54  ;;  %461 = vst.msk [vmem:[%s891_s3 + $0x40] sm:$0xf] %vm444_vm2, %v546_v55  ;;  %v547_v58 = vpack.c.bf16 %v335_v56, %v335_v56 }
  0xf5   :  { %v232_v59 = vpop.f32.mrb[8].mxu0  ;;  %v288_v60 = vpop.f32.mrb[8].mxu1 }
  0xf6   :  { %448 = vst.msk [vmem:[%s891_s3 + $0xc] sm:$0xf] %vm444_vm2, %v533_v57  ;;  %v233_v61 = vadd.f32 %v761_v18, %v232_v59  ;;  %v590_v62 = vpop.f32.mrb[9].mxu0  ;;  %462 = vst.msk [vmem:[%s891_s3 + $0x44] sm:$0xf] %vm444_vm2, %v547_v58  ;;  %v289_v63 = vadd.f32 %v761_v18, %v288_v60  ;;  %v618_v0 = vpop.f32.mrb[9].mxu1 }
  0xf7   :  { %v235_v1 = vpop.f32.mrb[10].mxu0  ;;  %v291_v2 = vpop.f32.mrb[10].mxu1 }
  0xf8   :  { %v322_v3 = vmax.f32 %v233_v61, 0.0  ;;  %v236_v4 = vadd.f32 %v761_v18, %v235_v1  ;;  %v591_v5 = vpop.f32.mrb[11].mxu0  ;;  %v336_v6 = vmax.f32 %v289_v63, 0.0  ;;  %v292_v7 = vadd.f32 %v761_v18, %v291_v2  ;;  %v619_v8 = vpop.f32.mrb[11].mxu1 }
  0xfa   :  { %v534_v9 = vpack.c.bf16 %v322_v3, %v322_v3  ;;  %v323_v10 = vmax.f32 %v236_v4, 0.0  ;;  %v548_v11 = vpack.c.bf16 %v336_v6, %v336_v6  ;;  %v337_v12 = vmax.f32 %v292_v7, 0.0 }
  0xfc   :  { %449 = vst.msk [vmem:[%s891_s3 + $0x10] sm:$0xf] %vm444_vm2, %v534_v9  ;;  %v535_v13 = vpack.c.bf16 %v323_v10, %v323_v10  ;;  %463 = vst.msk [vmem:[%s891_s3 + $0x48] sm:$0xf] %vm444_vm2, %v548_v11  ;;  %v549_v14 = vpack.c.bf16 %v337_v12, %v337_v12 }
  0xfd   :  { %v240_v15 = vpop.f32.mrb[12].mxu0  ;;  %v296_v16 = vpop.f32.mrb[12].mxu1 }
  0xfe   :  { %450 = vst.msk [vmem:[%s891_s3 + $0x14] sm:$0xf] %vm444_vm2, %v535_v13  ;;  %v241_v17 = vadd.f32 %v761_v18, %v240_v15  ;;  %v594_v19 = vpop.f32.mrb[13].mxu0  ;;  %464 = vst.msk [vmem:[%s891_s3 + $0x4c] sm:$0xf] %vm444_vm2, %v549_v14  ;;  %v297_v20 = vadd.f32 %v761_v18, %v296_v16  ;;  %v622_v21 = vpop.f32.mrb[13].mxu1 }
  0xff   :  { %v243_v22 = vpop.f32.mrb[14].mxu0  ;;  %v299_v23 = vpop.f32.mrb[14].mxu1 }
 0x100   :  { %v324_v24 = vmax.f32 %v241_v17, 0.0  ;;  %v244_v25 = vadd.f32 %v761_v18, %v243_v22  ;;  %v595_v26 = vpop.f32.mrb[15].mxu0  ;;  %v338_v27 = vmax.f32 %v297_v20, 0.0  ;;  %v300_v28 = vadd.f32 %v761_v18, %v299_v23  ;;  %v623_v29 = vpop.f32.mrb[15].mxu1 }
 0x102   :  { %v536_v30 = vpack.c.bf16 %v324_v24, %v324_v24  ;;  %v325_v31 = vmax.f32 %v244_v25, 0.0  ;;  %v550_v32 = vpack.c.bf16 %v338_v27, %v338_v27  ;;  %v339_v33 = vmax.f32 %v300_v28, 0.0 }
 0x104   :  { %451 = vst.msk [vmem:[%s891_s3 + $0x18] sm:$0xf] %vm444_vm2, %v536_v30  ;;  %v537_v34 = vpack.c.bf16 %v325_v31, %v325_v31  ;;  %465 = vst.msk [vmem:[%s891_s3 + $0x50] sm:$0xf] %vm444_vm2, %v550_v32  ;;  %v551_v35 = vpack.c.bf16 %v339_v33, %v339_v33 }
 0x105   :  { %v248_v36 = vpop.f32.mrb[16].mxu0  ;;  %v304_v37 = vpop.f32.mrb[16].mxu1 }
 0x106   :  { %452 = vst.msk [vmem:[%s891_s3 + $0x1c] sm:$0xf] %vm444_vm2, %v537_v34  ;;  %v249_v38 = vadd.f32 %v761_v18, %v248_v36  ;;  %v598_v39 = vpop.f32.mrb[17].mxu0  ;;  %466 = vst.msk [vmem:[%s891_s3 + $0x54] sm:$0xf] %vm444_vm2, %v551_v35  ;;  %v305_v40 = vadd.f32 %v761_v18, %v304_v37  ;;  %v626_v41 = vpop.f32.mrb[17].mxu1 }
 0x107   :  { %v251_v42 = vpop.f32.mrb[18].mxu0  ;;  %v307_v43 = vpop.f32.mrb[18].mxu1 }
 0x108   :  { %v326_v44 = vmax.f32 %v249_v38, 0.0  ;;  %v252_v45 = vadd.f32 %v761_v18, %v251_v42  ;;  %v599_v46 = vpop.f32.mrb[19].mxu0  ;;  %v340_v47 = vmax.f32 %v305_v40, 0.0  ;;  %v308_v48 = vadd.f32 %v761_v18, %v307_v43  ;;  %v627_v49 = vpop.f32.mrb[19].mxu1 }
 0x10a   :  { %v538_v50 = vpack.c.bf16 %v326_v44, %v326_v44  ;;  %v327_v51 = vmax.f32 %v252_v45, 0.0  ;;  %v552_v52 = vpack.c.bf16 %v340_v47, %v340_v47  ;;  %v341_v53 = vmax.f32 %v308_v48, 0.0 }
 0x10c   :  { %453 = vst.msk [vmem:[%s891_s3 + $0x20] sm:$0xf] %vm444_vm2, %v538_v50  ;;  %v539_v54 = vpack.c.bf16 %v327_v51, %v327_v51  ;;  %467 = vst.msk [vmem:[%s891_s3 + $0x58] sm:$0xf] %vm444_vm2, %v552_v52  ;;  %v553_v55 = vpack.c.bf16 %v341_v53, %v341_v53 }
 0x10d   :  { %v256_v56 = vpop.f32.mrb[20].mxu0  ;;  %v312_v57 = vpop.f32.mrb[20].mxu1 }
 0x10e   :  { %454 = vst.msk [vmem:[%s891_s3 + $0x24] sm:$0xf] %vm444_vm2, %v539_v54  ;;  %v257_v58 = vadd.f32 %v761_v18, %v256_v56  ;;  %v602_v59 = vpop.f32.mrb[21].mxu0  ;;  %468 = vst.msk [vmem:[%s891_s3 + $0x5c] sm:$0xf] %vm444_vm2, %v553_v55  ;;  %v313_v60 = vadd.f32 %v761_v18, %v312_v57  ;;  %v630_v61 = vpop.f32.mrb[21].mxu1 }
 0x10f   :  { %v259_v62 = vpop.f32.mrb[22].mxu0  ;;  %v315_v63 = vpop.f32.mrb[22].mxu1 }
 0x110   :  { %v328_v0 = vmax.f32 %v257_v58, 0.0  ;;  %v260_v1 = vadd.f32 %v761_v18, %v259_v62  ;;  %v603_v2 = vpop.f32.mrb[23].mxu0  ;;  %v342_v3 = vmax.f32 %v313_v60, 0.0  ;;  %v631_v4 = vpop.f32.mrb[23].mxu1 }
 0x112   :  { %v540_v5 = vpack.c.bf16 %v328_v0, %v328_v0  ;;  %v329_v6 = vmax.f32 %v260_v1, 0.0  ;;  %v554_v7 = vpack.c.bf16 %v342_v3, %v342_v3 }
 0x114   :  { %455 = vst.msk [vmem:[%s891_s3 + $0x28] sm:$0xf] %vm444_vm2, %v540_v5  ;;  %v541_v8 = vpack.c.bf16 %v329_v6, %v329_v6  ;;  %469 = vst.msk [vmem:[%s891_s3 + $0x60] sm:$0xf] %vm444_vm2, %v554_v7 }
 0x115   :  { %v264_v9 = vpop.f32.mrb[24].mxu0 }
 0x116   :  { %456 = vst.msk [vmem:[%s891_s3 + $0x2c] sm:$0xf] %vm444_vm2, %v541_v8  ;;  %v265_v10 = vadd.f32 %v761_v18, %v264_v9  ;;  %v606_v11 = vpop.f32.mrb[25].mxu0 }
 0x117   :  { %v267_v12 = vpop.f32.mrb[26].mxu0 }
 0x118   :  { %v330_v13 = vmax.f32 %v265_v10, 0.0  ;;  %v268_v14 = vadd.f32 %v761_v18, %v267_v12  ;;  %v607_v15 = vpop.f32.mrb[27].mxu0 }
 0x11a   :  { %v542_v16 = vpack.c.bf16 %v330_v13, %v330_v13  ;;  %v331_v17 = vmax.f32 %v268_v14, 0.0 }
 0x11c   :  { %457 = vst.msk [vmem:[%s891_s3 + $0x30] sm:$0xf] %vm444_vm2, %v542_v16  ;;  %v543_v19 = vpack.c.bf16 %v331_v17, %v331_v17 }
 0x11e   :  { %458 = vst.msk [vmem:[%s891_s3 + $0x34] sm:$0xf] %vm444_vm2, %v543_v19 }

// kernel: qnetwork_duel_forward.7
= control target key start
LH: loop header
LB: loop body
LE: loop exit
PB: predicated region body
PF: predicated region fallthrough
CT: control target
= control target key end

     0   :  { %v237_v36 = vlaneseq  ;;  %v5050_v37 = vmov 1966171168   ;;  %vm1312_vm0 = vcmask 261120   ;;  %s6582_s0 = inlined_call_operand.vmem [shape: bf16[2,800], index: 0, kind: input, shape index: {}]   ;;  %s6583_s1 = inlined_call_operand.vmem [shape: bf16[800,400], index: 1, kind: input, shape index: {}]   ;;  %s6584_s2 = inlined_call_operand.vmem [shape: f32[1,400], index: 2, kind: input, shape index: {}]   ;;  %s6585_s3 = inlined_call_operand.vmem [shape: bf16[400,6], index: 3, kind: input, shape index: {}]   ;;  %s6586_s4 = inlined_call_operand.vmem [shape: f32[1,6], index: 4, kind: input, shape index: {}]   ;;  %s6587_s5 = inlined_call_operand.vmem [shape: bf16[800,400], index: 5, kind: input, shape index: {}]   ;;  %s6588_s6 = inlined_call_operand.vmem [shape: f32[1,400], index: 6, kind: input, shape index: {}]   ;;  %s6589_s7 = inlined_call_operand.vmem [shape: bf16[400,6], index: 7, kind: input, shape index: {}]   ;;  %s6590_s8 = inlined_call_operand.vmem [shape: f32[1,6], index: 8, kind: input, shape index: {}]   ;;  %s6591_s9 = inlined_call_operand.hbm [shape: f32[2,6], index: 9, kind: output, shape index: {}]  }
   0x1   :  { %v4375_v0 = vld [vmem:[%s6583_s1 + $0x4] ss:$16 sps:$4 sm:$0xff]   ;;  %v4377_v1 = vld [vmem:[%s6583_s1 + $0xc] ss:$16 sps:$4 sm:$0xff]   ;;  %v4379_v2 = vld [vmem:[%s6583_s1] ss:$16 sps:$4 sm:$0xff]   ;;  %v260_v38 = vunpack.c.l.s4 %v5050_v37 }
   0x2   :  { %1316 = vmatprep.subr.bf16.mxu0 %v4375_v0  ;;  %v4380_v3 = vld [vmem:[%s6583_s1 + $0x8] ss:$16 sps:$4 sm:$0xff]   ;;  %1480 = vmatprep.subr.bf16.mxu1 %v4377_v1  ;;  %v4381_v4 = vld [vmem:[%s6583_s1 + $0x24] ss:$16 sps:$4 sm:$0xff]   ;;  %v4383_v5 = vld [vmem:[%s6583_s1 + $0x2c] ss:$16 sps:$4 sm:$0xff]  }
   0x3   :  { %1317 = vmatpush1.bf16.msra.mxu0 %v4379_v2  ;;  %1481 = vmatpush1.bf16.msra.mxu1 %v4380_v3  ;;  %v4385_v6 = vld [vmem:[%s6583_s1 + $0x20] ss:$16 sps:$4 sm:$0xff]   ;;  %v4386_v7 = vld [vmem:[%s6583_s1 + $0x28] ss:$16 sps:$4 sm:$0xff]   ;;  %v4387_v8 = vld [vmem:[%s6583_s1 + $0x44] ss:$16 sps:$4 sm:$0xff]   ;;  %v261_v43 = vunpack.c.0.s8 %v260_v38 }
   0x4   :  { %1318 = vmatprep.subr.bf16.mxu0 %v4381_v4  ;;  %1482 = vmatprep.subr.bf16.mxu1 %v4383_v5  ;;  %v4389_v9 = vld [vmem:[%s6583_s1 + $0x4c] ss:$16 sps:$4 sm:$0xff]   ;;  %v4391_v10 = vld [vmem:[%s6583_s1 + $0x40] ss:$16 sps:$4 sm:$0xff]   ;;  %v4392_v11 = vld [vmem:[%s6583_s1 + $0x48] ss:$16 sps:$4 sm:$0xff]  }
   0x5   :  { %v4393_v12 = vld [vmem:[%s6583_s1 + $0x64] ss:$16 sps:$4 sm:$0xff]   ;;  %v4395_v13 = vld [vmem:[%s6583_s1 + $0x6c] ss:$16 sps:$4 sm:$0xff]   ;;  %v4397_v14 = vld [vmem:[%s6583_s1 + $0x60] ss:$16 sps:$4 sm:$0xff]  }
   0x6   :  { %v4398_v15 = vld [vmem:[%s6583_s1 + $0x68] ss:$16 sps:$4 sm:$0xff]   ;;  %v4399_v16 = vld [vmem:[%s6583_s1 + $0x84] ss:$16 sps:$4 sm:$0xff]   ;;  %v4401_v17 = vld [vmem:[%s6583_s1 + $0x8c] ss:$16 sps:$4 sm:$0xff]  }
   0x7   :  { %1319 = vmatpush1.bf16.msra.mxu0 %v4385_v6  ;;  %1483 = vmatpush1.bf16.msra.mxu1 %v4386_v7  ;;  %v4403_v18 = vld [vmem:[%s6583_s1 + $0x80] ss:$16 sps:$4 sm:$0xff]   ;;  %v4404_v19 = vld [vmem:[%s6583_s1 + $0x88] ss:$16 sps:$4 sm:$0xff]   ;;  %v4405_v20 = vld [vmem:[%s6583_s1 + $0xa4] ss:$16 sps:$4 sm:$0xff]  }
   0x8   :  { %1320 = vmatprep.subr.bf16.mxu0 %v4387_v8  ;;  %1484 = vmatprep.subr.bf16.mxu1 %v4389_v9  ;;  %v4407_v21 = vld [vmem:[%s6583_s1 + $0xac] ss:$16 sps:$4 sm:$0xff]   ;;  %v4409_v22 = vld [vmem:[%s6583_s1 + $0xa0] ss:$16 sps:$4 sm:$0xff]   ;;  %v4410_v23 = vld [vmem:[%s6583_s1 + $0xa8] ss:$16 sps:$4 sm:$0xff]  }
   0x9   :  { %v4411_v24 = vld [vmem:[%s6583_s1 + $0xc4] ss:$16 sps:$4 sm:$0xff]   ;;  %v4413_v25 = vld [vmem:[%s6583_s1 + $0xcc] ss:$16 sps:$4 sm:$0xff]   ;;  %v4415_v26 = vld [vmem:[%s6583_s1 + $0xc0] ss:$16 sps:$4 sm:$0xff]  }
   0xa   :  { %v4416_v27 = vld [vmem:[%s6583_s1 + $0xc8] ss:$16 sps:$4 sm:$0xff]   ;;  %v4417_v28 = vld [vmem:[%s6583_s1 + $0xe4] ss:$16 sps:$4 sm:$0xff]   ;;  %v4419_v29 = vld [vmem:[%s6583_s1 + $0xec] ss:$16 sps:$4 sm:$0xff]  }
   0xb   :  { %1321 = vmatpush1.bf16.msra.mxu0 %v4391_v10  ;;  %1485 = vmatpush1.bf16.msra.mxu1 %v4392_v11  ;;  %v4421_v30 = vld [vmem:[%s6583_s1 + $0xe0] ss:$16 sps:$4 sm:$0xff]   ;;  %v4422_v31 = vld [vmem:[%s6583_s1 + $0xe8] ss:$16 sps:$4 sm:$0xff]   ;;  %v4423_v32 = vld [vmem:[%s6583_s1 + $0x104] ss:$16 sps:$4 sm:$0xff]  }
   0xc   :  { %1322 = vmatprep.subr.bf16.mxu0 %v4393_v12  ;;  %1486 = vmatprep.subr.bf16.mxu1 %v4395_v13  ;;  %v4425_v33 = vld [vmem:[%s6583_s1 + $0x10c] ss:$16 sps:$4 sm:$0xff]   ;;  %v4427_v34 = vld [vmem:[%s6583_s1 + $0x100] ss:$16 sps:$4 sm:$0xff]   ;;  %v4428_v35 = vld [vmem:[%s6583_s1 + $0x108] ss:$16 sps:$4 sm:$0xff]  }
   0xd   :  { %v4429_v39 = vld [vmem:[%s6583_s1 + $0x124] ss:$16 sps:$4 sm:$0xff]   ;;  %v4431_v40 = vld [vmem:[%s6583_s1 + $0x12c] ss:$16 sps:$4 sm:$0xff]   ;;  %v4433_v41 = vld [vmem:[%s6583_s1 + $0x120] ss:$16 sps:$4 sm:$0xff]  }
   0xe   :  { %v5220_v42 = vshrl.u32 %v237_v36, 7  ;;  %v4434_v44 = vld [vmem:[%s6583_s1 + $0x128] ss:$16 sps:$4 sm:$0xff]   ;;  %v4435_v45 = vld [vmem:[%s6583_s1 + $0x144] ss:$16 sps:$4 sm:$0xff]  }
   0xf   :  { %1323 = vmatpush1.bf16.msra.mxu0 %v4397_v14  ;;  %1487 = vmatpush1.bf16.msra.mxu1 %v4398_v15  ;;  %v4437_v46 = vld [vmem:[%s6583_s1 + $0x14c] ss:$16 sps:$4 sm:$0xff]   ;;  %v4439_v47 = vld [vmem:[%s6583_s1 + $0x140] ss:$16 sps:$4 sm:$0xff]   ;;  %v4440_v48 = vld [vmem:[%s6583_s1 + $0x148] ss:$16 sps:$4 sm:$0xff]  }
  0x10   :  { %1324 = vmatprep.subr.bf16.mxu0 %v4399_v16  ;;  %1488 = vmatprep.subr.bf16.mxu1 %v4401_v17  ;;  %v264_v49 = vsub.s32 %v261_v43, %v5220_v42  ;;  %v4441_v50 = vld [vmem:[%s6583_s1 + $0x164] ss:$16 sps:$4 sm:$0xff]   ;;  %v4443_v51 = vld [vmem:[%s6583_s1 + $0x16c] ss:$16 sps:$4 sm:$0xff]   ;;  %v4445_v53 = vld [vmem:[%s6583_s1 + $0x160] ss:$16 sps:$4 sm:$0xff]  }
  0x11   :  { %v34_v52 = vld [vmem:[%s6582_s0] sm:$0x7f]  ;;  %v4446_v55 = vld [vmem:[%s6583_s1 + $0x168] ss:$16 sps:$4 sm:$0xff]   ;;  %v4449_v57 = vld [vmem:[%s6583_s1 + $0x18c] ss:$16 sps:$4 sm:$0xff]  }
  0x12   :  { %v265_v54 = vrot.slane %v34_v52, %v264_v49  ;;  %v4447_v56 = vld [vmem:[%s6583_s1 + $0x184] ss:$16 sps:$4 sm:$0xff]   ;;  %v4451_v59 = vld [vmem:[%s6583_s1 + $0x180] ss:$16 sps:$4 sm:$0xff]   ;;  %v4452_v61 = vld [vmem:[%s6583_s1 + $0x188] ss:$16 sps:$4 sm:$0xff]   ;;  %v258_v8 = vcombine.high %v34_v52, %v34_v52 }
  0x13   :  { %1325 = vmatpush1.bf16.msra.mxu0 %v4403_v18  ;;  %1489 = vmatpush1.bf16.msra.mxu1 %v4404_v19  ;;  %v4453_v62 = vld [vmem:[%s6583_s1 + $0x1a4] ss:$16 sps:$4 sm:$0xff]   ;;  %v4455_v63 = vld [vmem:[%s6583_s1 + $0x1ac] ss:$16 sps:$4 sm:$0xff]   ;;  %v4457_v0 = vld [vmem:[%s6583_s1 + $0x1a0] ss:$16 sps:$4 sm:$0xff]  }
  0x14   :  { %1326 = vmatprep.subr.bf16.mxu0 %v4405_v20  ;;  %1490 = vmatprep.subr.bf16.mxu1 %v4407_v21  ;;  %v273_v58 = vcombine.high %v265_v54, %v265_v54  ;;  %v4458_v1 = vld [vmem:[%s6583_s1 + $0x1a8] ss:$16 sps:$4 sm:$0xff]   ;;  %v4459_v2 = vld [vmem:[%s6583_s1 + $0x1c4] ss:$16 sps:$4 sm:$0xff]   ;;  %v4461_v3 = vld [vmem:[%s6583_s1 + $0x1cc] ss:$16 sps:$4 sm:$0xff]   ;;  %v272_v11 = vrot.slane %v258_v8, %v264_v49  ;;  %v5314_v16 = vrot.slane %v265_v54, %v264_v49 }
  0x15   :  { %v4463_v4 = vld [vmem:[%s6583_s1 + $0x1c0] ss:$16 sps:$4 sm:$0xff]   ;;  %v4464_v5 = vld [vmem:[%s6583_s1 + $0x1c8] ss:$16 sps:$4 sm:$0xff]   ;;  %v4465_v6 = vld [vmem:[%s6583_s1 + $0x1e4] ss:$16 sps:$4 sm:$0xff]  }
  0x16   :  { %v5262_v60 = vrot.slane %v273_v58, %v264_v49  ;;  %v4467_v7 = vld [vmem:[%s6583_s1 + $0x1ec] ss:$16 sps:$4 sm:$0xff]   ;;  %v4469_v9 = vld [vmem:[%s6583_s1 + $0x1e0] ss:$16 sps:$4 sm:$0xff]   ;;  %v4470_v10 = vld [vmem:[%s6583_s1 + $0x1e8] ss:$16 sps:$4 sm:$0xff]   ;;  %v274_v14 = vcombine.high %v272_v11, %v272_v11  ;;  %v5321_v19 = vrot.slane %v272_v11, %v264_v49 }
  0x17   :  { %1327 = vmatpush1.bf16.msra.mxu0 %v4409_v22  ;;  %1491 = vmatpush1.bf16.msra.mxu1 %v4410_v23  ;;  %v4473_v12 = vld [vmem:[%s6583_s1 + $0x204] ss:$16 sps:$4 sm:$0xff]   ;;  %v4476_v13 = vld [vmem:[%s6583_s1 + $0x20c] ss:$16 sps:$4 sm:$0xff]   ;;  %v4471_v15 = vld [vmem:[%s6583_s1 + $0x200] ss:$16 sps:$4 sm:$0xff]  }
  0x18   :  { %1328 = vmatprep.subr.bf16.mxu0 %v4411_v24  ;;  %1492 = vmatprep.subr.bf16.mxu1 %v4413_v25  ;;  %v4474_v17 = vld [vmem:[%s6583_s1 + $0x208] ss:$16 sps:$4 sm:$0xff]   ;;  %v5319_v18 = vrot.slane %v274_v14, %v264_v49  ;;  %v4479_v20 = vld [vmem:[%s6583_s1 + $0x224] ss:$16 sps:$4 sm:$0xff]   ;;  %v4482_v21 = vld [vmem:[%s6583_s1 + $0x22c] ss:$16 sps:$4 sm:$0xff]   ;;  %v5331_v22 = vcombine.high %v5262_v60, %v5262_v60 }
  0x19   :  { %1348 = vmatprep.mubr.bf16.mxu0 %v5262_v60  ;;  %1512 = vmatprep.mubr.bf16.mxu1 %v5262_v60  ;;  %v4477_v23 = vld [vmem:[%s6583_s1 + $0x220] ss:$16 sps:$4 sm:$0xff]   ;;  %v4480_v24 = vld [vmem:[%s6583_s1 + $0x228] ss:$16 sps:$4 sm:$0xff]   ;;  %v4485_v25 = vld [vmem:[%s6583_s1 + $0x244] ss:$16 sps:$4 sm:$0xff]  }
  0x1a   :  { %v4498_v36 = vld [vmem:[%s6583_s1 + $0x288] ss:$16 sps:$4 sm:$0xff]   ;;  %v4503_v37 = vld [vmem:[%s6583_s1 + $0x2a4] ss:$16 sps:$4 sm:$0xff]   ;;  %v4506_v38 = vld [vmem:[%s6583_s1 + $0x2ac] ss:$16 sps:$4 sm:$0xff]  }
  0x1b   :  { %1329 = vmatpush1.bf16.msra.mxu0 %v4415_v26  ;;  %1493 = vmatpush1.bf16.msra.mxu1 %v4416_v27  ;;  %v4488_v26 = vld [vmem:[%s6583_s1 + $0x24c] ss:$16 sps:$4 sm:$0xff]   ;;  %v4483_v27 = vld [vmem:[%s6583_s1 + $0x240] ss:$16 sps:$4 sm:$0xff]   ;;  %v4516_v49 = vld [vmem:[%s6583_s1 + $0x2e8] ss:$16 sps:$4 sm:$0xff]  }
  0x1c   :  { %1330 = vmatprep.subr.bf16.mxu0 %v4417_v28  ;;  %1494 = vmatprep.subr.bf16.mxu1 %v4419_v29  ;;  %v4486_v28 = vld [vmem:[%s6583_s1 + $0x248] ss:$16 sps:$4 sm:$0xff]   ;;  %v4491_v29 = vld [vmem:[%s6583_s1 + $0x264] ss:$16 sps:$4 sm:$0xff]   ;;  %v4512_v43 = vld [vmem:[%s6583_s1 + $0x2cc] ss:$16 sps:$4 sm:$0xff]  }
  0x1d   :  { %v4519_v52 = vld [vmem:[%s6583_s1 + $0x300] ss:$16 sps:$4 sm:$0xff]   ;;  %v4527_v54 = vld [vmem:[%s6583_s1 + $0x324] ss:$16 sps:$4 sm:$0xff]   ;;  %v4554_v8 = vld [vmem:[%s6583_s1 + $0x3ac] ss:$16 sps:$4 sm:$0xff]  }
  0x1e   :  { %v4533_v58 = vld [vmem:[%s6583_s1 + $0x344] ss:$16 sps:$4 sm:$0xff]   ;;  %v4558_v14 = vld [vmem:[%s6583_s1 + $0x3c8] ss:$16 sps:$4 sm:$0xff]  }
  0x1f   :  { %1331 = vmatpush1.bf16.msra.mxu0 %v4421_v30  ;;  %1495 = vmatpush1.bf16.msra.mxu1 %v4422_v31  ;;  %v4494_v30 = vld [vmem:[%s6583_s1 + $0x26c] ss:$16 sps:$4 sm:$0xff]   ;;  %v4489_v31 = vld [vmem:[%s6583_s1 + $0x260] ss:$16 sps:$4 sm:$0xff]   ;;  %v4557_v11 = vld [vmem:[%s6583_s1 + $0x3c4] ss:$16 sps:$4 sm:$0xff]  }
  0x20   :  { %1332 = vmatprep.subr.bf16.mxu0 %v4423_v32  ;;  %1496 = vmatprep.subr.bf16.mxu1 %v4425_v33  ;;  %v4492_v32 = vld [vmem:[%s6583_s1 + $0x268] ss:$16 sps:$4 sm:$0xff]   ;;  %v4497_v33 = vld [vmem:[%s6583_s1 + $0x284] ss:$16 sps:$4 sm:$0xff]  }
  0x23   :  { %1333 = vmatpush1.bf16.msra.mxu0 %v4427_v34  ;;  %1497 = vmatpush1.bf16.msra.mxu1 %v4428_v35  ;;  %v4500_v34 = vld [vmem:[%s6583_s1 + $0x28c] ss:$16 sps:$4 sm:$0xff]   ;;  %v4495_v35 = vld [vmem:[%s6583_s1 + $0x280] ss:$16 sps:$4 sm:$0xff]  }
  0x24   :  { %1334 = vmatprep.subr.bf16.mxu0 %v4429_v39  ;;  %1498 = vmatprep.subr.bf16.mxu1 %v4431_v40  ;;  %v4501_v39 = vld [vmem:[%s6583_s1 + $0x2a0] ss:$16 sps:$4 sm:$0xff]   ;;  %v4504_v40 = vld [vmem:[%s6583_s1 + $0x2a8] ss:$16 sps:$4 sm:$0xff]  }
  0x27   :  { %1335 = vmatpush1.bf16.msra.mxu0 %v4433_v41  ;;  %1499 = vmatpush1.bf16.msra.mxu1 %v4434_v44  ;;  %v4509_v41 = vld [vmem:[%s6583_s1 + $0x2c4] ss:$16 sps:$4 sm:$0xff]   ;;  %v4507_v44 = vld [vmem:[%s6583_s1 + $0x2c0] ss:$16 sps:$4 sm:$0xff]  }
  0x28   :  { %1336 = vmatprep.subr.bf16.mxu0 %v4435_v45  ;;  %1500 = vmatprep.subr.bf16.mxu1 %v4437_v46  ;;  %v4510_v45 = vld [vmem:[%s6583_s1 + $0x2c8] ss:$16 sps:$4 sm:$0xff]   ;;  %v4515_v46 = vld [vmem:[%s6583_s1 + $0x2e4] ss:$16 sps:$4 sm:$0xff]  }
  0x2b   :  { %1337 = vmatpush1.bf16.msra.mxu0 %v4439_v47  ;;  %1501 = vmatpush1.bf16.msra.mxu1 %v4440_v48  ;;  %v4518_v47 = vld [vmem:[%s6583_s1 + $0x2ec] ss:$16 sps:$4 sm:$0xff]   ;;  %v4513_v48 = vld [vmem:[%s6583_s1 + $0x2e0] ss:$16 sps:$4 sm:$0xff]  }
  0x2c   :  { %1338 = vmatprep.subr.bf16.mxu0 %v4441_v50  ;;  %1502 = vmatprep.subr.bf16.mxu1 %v4443_v51  ;;  %v4521_v50 = vld [vmem:[%s6583_s1 + $0x304] ss:$16 sps:$4 sm:$0xff]   ;;  %v4524_v51 = vld [vmem:[%s6583_s1 + $0x30c] ss:$16 sps:$4 sm:$0xff]  }
  0x2f   :  { %1339 = vmatpush1.bf16.msra.mxu0 %v4445_v53  ;;  %1503 = vmatpush1.bf16.msra.mxu1 %v4446_v55  ;;  %v4522_v53 = vld [vmem:[%s6583_s1 + $0x308] ss:$16 sps:$4 sm:$0xff]   ;;  %v4530_v55 = vld [vmem:[%s6583_s1 + $0x32c] ss:$16 sps:$4 sm:$0xff]  }
  0x30   :  { %1340 = vmatprep.subr.bf16.mxu0 %v4447_v56  ;;  %1504 = vmatprep.subr.bf16.mxu1 %v4449_v57  ;;  %v4525_v56 = vld [vmem:[%s6583_s1 + $0x320] ss:$16 sps:$4 sm:$0xff]   ;;  %v4528_v57 = vld [vmem:[%s6583_s1 + $0x328] ss:$16 sps:$4 sm:$0xff]  }
  0x33   :  { %1341 = vmatpush1.bf16.msra.mxu0 %v4451_v59  ;;  %1505 = vmatpush1.bf16.msra.mxu1 %v4452_v61  ;;  %v4536_v59 = vld [vmem:[%s6583_s1 + $0x34c] ss:$16 sps:$4 sm:$0xff]   ;;  %v4531_v61 = vld [vmem:[%s6583_s1 + $0x340] ss:$16 sps:$4 sm:$0xff]  }
  0x34   :  { %1342 = vmatprep.subr.bf16.mxu0 %v4453_v62  ;;  %1506 = vmatprep.subr.bf16.mxu1 %v4455_v63  ;;  %v4534_v62 = vld [vmem:[%s6583_s1 + $0x348] ss:$16 sps:$4 sm:$0xff]   ;;  %v4539_v63 = vld [vmem:[%s6583_s1 + $0x364] ss:$16 sps:$4 sm:$0xff]  }
  0x37   :  { %1343 = vmatpush1.bf16.msra.mxu0 %v4457_v0  ;;  %1507 = vmatpush1.bf16.msra.mxu1 %v4458_v1  ;;  %v4542_v0 = vld [vmem:[%s6583_s1 + $0x36c] ss:$16 sps:$4 sm:$0xff]   ;;  %v4537_v1 = vld [vmem:[%s6583_s1 + $0x360] ss:$16 sps:$4 sm:$0xff]  }
  0x38   :  { %1344 = vmatprep.subr.bf16.mxu0 %v4459_v2  ;;  %1508 = vmatprep.subr.bf16.mxu1 %v4461_v3  ;;  %v4540_v2 = vld [vmem:[%s6583_s1 + $0x368] ss:$16 sps:$4 sm:$0xff]   ;;  %v4545_v3 = vld [vmem:[%s6583_s1 + $0x384] ss:$16 sps:$4 sm:$0xff]  }
  0x3b   :  { %1345 = vmatpush1.bf16.msra.mxu0 %v4463_v4  ;;  %1509 = vmatpush1.bf16.msra.mxu1 %v4464_v5  ;;  %v4548_v4 = vld [vmem:[%s6583_s1 + $0x38c] ss:$16 sps:$4 sm:$0xff]   ;;  %v4543_v5 = vld [vmem:[%s6583_s1 + $0x380] ss:$16 sps:$4 sm:$0xff]  }
  0x3c   :  { %1346 = vmatprep.subr.bf16.mxu0 %v4465_v6  ;;  %1510 = vmatprep.subr.bf16.mxu1 %v4467_v7  ;;  %v4546_v6 = vld [vmem:[%s6583_s1 + $0x388] ss:$16 sps:$4 sm:$0xff]   ;;  %v4551_v7 = vld [vmem:[%s6583_s1 + $0x3a4] ss:$16 sps:$4 sm:$0xff]  }
  0x3f   :  { %1347 = vmatpush1.bf16.msra.mxu0 %v4469_v9  ;;  %1511 = vmatpush1.bf16.msra.mxu1 %v4470_v10  ;;  %v4549_v9 = vld [vmem:[%s6583_s1 + $0x3a0] ss:$16 sps:$4 sm:$0xff]   ;;  %v4552_v10 = vld [vmem:[%s6583_s1 + $0x3a8] ss:$16 sps:$4 sm:$0xff]  }
  0x40   :  { %1357 = vmatprep.subr.bf16.mxu0 %v4473_v12  ;;  %1521 = vmatprep.subr.bf16.mxu1 %v4476_v13  ;;  %v4560_v12 = vld [vmem:[%s6583_s1 + $0x3cc] ss:$16 sps:$4 sm:$0xff]   ;;  %v4555_v13 = vld [vmem:[%s6583_s1 + $0x3c0] ss:$16 sps:$4 sm:$0xff]  }
  0x42   :  { %1349 = vmatmul.mubr.bf16.vlgmr.msra.gmra.mrb[0].mxu0 %v5314_v16  ;;  %1513 = vmatmul.mubr.bf16.vlgmr.msra.gmra.mrb[0].mxu1 %v5314_v16 }
  0x43   :  { %1358 = vmatpush1.bf16.msra.mxu0 %v4471_v15  ;;  %1522 = vmatpush1.bf16.msra.mxu1 %v4474_v17  ;;  %v4563_v15 = vld [vmem:[%s6583_s1 + $0x3e4] ss:$16 sps:$4 sm:$0xff]   ;;  %v4566_v17 = vld [vmem:[%s6583_s1 + $0x3ec] ss:$16 sps:$4 sm:$0xff]  }
  0x44   :  { %1359 = vmatprep.subr.bf16.mxu0 %v4479_v20  ;;  %1523 = vmatprep.subr.bf16.mxu1 %v4482_v21  ;;  %v4561_v20 = vld [vmem:[%s6583_s1 + $0x3e0] ss:$16 sps:$4 sm:$0xff]   ;;  %v4564_v21 = vld [vmem:[%s6583_s1 + $0x3e8] ss:$16 sps:$4 sm:$0xff]  }
  0x45   :  { %1389 = vmatprep.mubr.bf16.mxu0 %v5331_v22  ;;  %1553 = vmatprep.mubr.bf16.mxu1 %v5331_v22 }
  0x47   :  { %1360 = vmatpush1.bf16.msra.mxu0 %v4477_v23  ;;  %1524 = vmatpush1.bf16.msra.mxu1 %v4480_v24  ;;  %v4569_v23 = vld [vmem:[%s6583_s1 + $0x404] ss:$16 sps:$4 sm:$0xff]   ;;  %v4572_v24 = vld [vmem:[%s6583_s1 + $0x40c] ss:$16 sps:$4 sm:$0xff]  }
  0x48   :  { %1361 = vmatprep.subr.bf16.mxu0 %v4485_v25  ;;  %1525 = vmatprep.subr.bf16.mxu1 %v4488_v26  ;;  %v4567_v25 = vld [vmem:[%s6583_s1 + $0x400] ss:$16 sps:$4 sm:$0xff]   ;;  %v5522_v26 = vcombine.high %v5314_v16, %v5314_v16 }
  0x4b   :  { %1362 = vmatpush1.bf16.msra.mxu0 %v4483_v27  ;;  %1526 = vmatpush1.bf16.msra.mxu1 %v4486_v28  ;;  %v4570_v27 = vld [vmem:[%s6583_s1 + $0x408] ss:$16 sps:$4 sm:$0xff]   ;;  %v4575_v28 = vld [vmem:[%s6583_s1 + $0x424] ss:$16 sps:$4 sm:$0xff]  }
  0x4c   :  { %1363 = vmatprep.subr.bf16.mxu0 %v4491_v29  ;;  %1527 = vmatprep.subr.bf16.mxu1 %v4494_v30  ;;  %v4578_v29 = vld [vmem:[%s6583_s1 + $0x42c] ss:$16 sps:$4 sm:$0xff]   ;;  %v4573_v30 = vld [vmem:[%s6583_s1 + $0x420] ss:$16 sps:$4 sm:$0xff]  }
  0x4f   :  { %1364 = vmatpush1.bf16.msra.mxu0 %v4489_v31  ;;  %1528 = vmatpush1.bf16.msra.mxu1 %v4492_v32  ;;  %v4576_v31 = vld [vmem:[%s6583_s1 + $0x428] ss:$16 sps:$4 sm:$0xff]   ;;  %v4581_v32 = vld [vmem:[%s6583_s1 + $0x444] ss:$16 sps:$4 sm:$0xff]  }
  0x50   :  { %1365 = vmatprep.subr.bf16.mxu0 %v4497_v33  ;;  %1529 = vmatprep.subr.bf16.mxu1 %v4500_v34  ;;  %v4584_v33 = vld [vmem:[%s6583_s1 + $0x44c] ss:$16 sps:$4 sm:$0xff]   ;;  %v4579_v34 = vld [vmem:[%s6583_s1 + $0x440] ss:$16 sps:$4 sm:$0xff]  }
  0x53   :  { %1366 = vmatpush1.bf16.msra.mxu0 %v4495_v35  ;;  %1530 = vmatpush1.bf16.msra.mxu1 %v4498_v36  ;;  %v4582_v35 = vld [vmem:[%s6583_s1 + $0x448] ss:$16 sps:$4 sm:$0xff]   ;;  %v4587_v36 = vld [vmem:[%s6583_s1 + $0x464] ss:$16 sps:$4 sm:$0xff]  }
  0x54   :  { %1367 = vmatprep.subr.bf16.mxu0 %v4503_v37  ;;  %1531 = vmatprep.subr.bf16.mxu1 %v4506_v38  ;;  %v4590_v37 = vld [vmem:[%s6583_s1 + $0x46c] ss:$16 sps:$4 sm:$0xff]   ;;  %v4585_v38 = vld [vmem:[%s6583_s1 + $0x460] ss:$16 sps:$4 sm:$0xff]  }
  0x57   :  { %1368 = vmatpush1.bf16.msra.mxu0 %v4501_v39  ;;  %1532 = vmatpush1.bf16.msra.mxu1 %v4504_v40  ;;  %v4588_v39 = vld [vmem:[%s6583_s1 + $0x468] ss:$16 sps:$4 sm:$0xff]   ;;  %v4593_v40 = vld [vmem:[%s6583_s1 + $0x484] ss:$16 sps:$4 sm:$0xff]  }
  0x58   :  { %1369 = vmatprep.subr.bf16.mxu0 %v4509_v41  ;;  %1533 = vmatprep.subr.bf16.mxu1 %v4512_v43  ;;  %v4596_v41 = vld [vmem:[%s6583_s1 + $0x48c] ss:$16 sps:$4 sm:$0xff]   ;;  %v4591_v43 = vld [vmem:[%s6583_s1 + $0x480] ss:$16 sps:$4 sm:$0xff]  }
  0x5b   :  { %1370 = vmatpush1.bf16.msra.mxu0 %v4507_v44  ;;  %1534 = vmatpush1.bf16.msra.mxu1 %v4510_v45  ;;  %v4594_v44 = vld [vmem:[%s6583_s1 + $0x488] ss:$16 sps:$4 sm:$0xff]   ;;  %v4599_v45 = vld [vmem:[%s6583_s1 + $0x4a4] ss:$16 sps:$4 sm:$0xff]  }
  0x5c   :  { %1371 = vmatprep.subr.bf16.mxu0 %v4515_v46  ;;  %1535 = vmatprep.subr.bf16.mxu1 %v4518_v47  ;;  %v4602_v46 = vld [vmem:[%s6583_s1 + $0x4ac] ss:$16 sps:$4 sm:$0xff]   ;;  %v4597_v47 = vld [vmem:[%s6583_s1 + $0x4a0] ss:$16 sps:$4 sm:$0xff]  }
  0x5f   :  { %1372 = vmatpush1.bf16.msra.mxu0 %v4513_v48  ;;  %1536 = vmatpush1.bf16.msra.mxu1 %v4516_v49  ;;  %v4600_v48 = vld [vmem:[%s6583_s1 + $0x4a8] ss:$16 sps:$4 sm:$0xff]   ;;  %v4605_v49 = vld [vmem:[%s6583_s1 + $0x4c4] ss:$16 sps:$4 sm:$0xff]  }
  0x60   :  { %1373 = vmatprep.subr.bf16.mxu0 %v4521_v50  ;;  %1537 = vmatprep.subr.bf16.mxu1 %v4524_v51  ;;  %v4608_v50 = vld [vmem:[%s6583_s1 + $0x4cc] ss:$16 sps:$4 sm:$0xff]   ;;  %v4603_v51 = vld [vmem:[%s6583_s1 + $0x4c0] ss:$16 sps:$4 sm:$0xff]  }
  0x63   :  { %1374 = vmatpush1.bf16.msra.mxu0 %v4519_v52  ;;  %1538 = vmatpush1.bf16.msra.mxu1 %v4522_v53  ;;  %v4606_v52 = vld [vmem:[%s6583_s1 + $0x4c8] ss:$16 sps:$4 sm:$0xff]   ;;  %v4611_v53 = vld [vmem:[%s6583_s1 + $0x4e4] ss:$16 sps:$4 sm:$0xff]  }
  0x64   :  { %1375 = vmatprep.subr.bf16.mxu0 %v4527_v54  ;;  %1539 = vmatprep.subr.bf16.mxu1 %v4530_v55  ;;  %v4614_v54 = vld [vmem:[%s6583_s1 + $0x4ec] ss:$16 sps:$4 sm:$0xff]   ;;  %v4609_v55 = vld [vmem:[%s6583_s1 + $0x4e0] ss:$16 sps:$4 sm:$0xff]  }
  0x67   :  { %1376 = vmatpush1.bf16.msra.mxu0 %v4525_v56  ;;  %1540 = vmatpush1.bf16.msra.mxu1 %v4528_v57  ;;  %v4612_v56 = vld [vmem:[%s6583_s1 + $0x4e8] ss:$16 sps:$4 sm:$0xff]   ;;  %v4617_v57 = vld [vmem:[%s6583_s1 + $0x504] ss:$16 sps:$4 sm:$0xff]  }
  0x68   :  { %1377 = vmatprep.subr.bf16.mxu0 %v4533_v58  ;;  %1541 = vmatprep.subr.bf16.mxu1 %v4536_v59  ;;  %v4620_v58 = vld [vmem:[%s6583_s1 + $0x50c] ss:$16 sps:$4 sm:$0xff]   ;;  %v4615_v59 = vld [vmem:[%s6583_s1 + $0x500] ss:$16 sps:$4 sm:$0xff]  }
  0x6b   :  { %1378 = vmatpush1.bf16.msra.mxu0 %v4531_v61  ;;  %1542 = vmatpush1.bf16.msra.mxu1 %v4534_v62  ;;  %v4618_v61 = vld [vmem:[%s6583_s1 + $0x508] ss:$16 sps:$4 sm:$0xff]   ;;  %v4623_v62 = vld [vmem:[%s6583_s1 + $0x524] ss:$16 sps:$4 sm:$0xff]  }
  0x6c   :  { %1379 = vmatprep.subr.bf16.mxu0 %v4539_v63  ;;  %1543 = vmatprep.subr.bf16.mxu1 %v4542_v0  ;;  %v4626_v63 = vld [vmem:[%s6583_s1 + $0x52c] ss:$16 sps:$4 sm:$0xff]   ;;  %v4621_v0 = vld [vmem:[%s6583_s1 + $0x520] ss:$16 sps:$4 sm:$0xff]  }
  0x6f   :  { %1380 = vmatpush1.bf16.msra.mxu0 %v4537_v1  ;;  %1544 = vmatpush1.bf16.msra.mxu1 %v4540_v2  ;;  %v4624_v1 = vld [vmem:[%s6583_s1 + $0x528] ss:$16 sps:$4 sm:$0xff]   ;;  %v4629_v2 = vld [vmem:[%s6583_s1 + $0x544] ss:$16 sps:$4 sm:$0xff]  }
  0x70   :  { %1381 = vmatprep.subr.bf16.mxu0 %v4545_v3  ;;  %1545 = vmatprep.subr.bf16.mxu1 %v4548_v4  ;;  %v4632_v3 = vld [vmem:[%s6583_s1 + $0x54c] ss:$16 sps:$4 sm:$0xff]   ;;  %v4627_v4 = vld [vmem:[%s6583_s1 + $0x540] ss:$16 sps:$4 sm:$0xff]  }
  0x73   :  { %1382 = vmatpush1.bf16.msra.mxu0 %v4543_v5  ;;  %1546 = vmatpush1.bf16.msra.mxu1 %v4546_v6  ;;  %v4630_v5 = vld [vmem:[%s6583_s1 + $0x548] ss:$16 sps:$4 sm:$0xff]   ;;  %v4635_v6 = vld [vmem:[%s6583_s1 + $0x564] ss:$16 sps:$4 sm:$0xff]  }
  0x74   :  { %1383 = vmatprep.subr.bf16.mxu0 %v4551_v7  ;;  %1547 = vmatprep.subr.bf16.mxu1 %v4554_v8  ;;  %v4638_v7 = vld [vmem:[%s6583_s1 + $0x56c] ss:$16 sps:$4 sm:$0xff]   ;;  %v4633_v8 = vld [vmem:[%s6583_s1 + $0x560] ss:$16 sps:$4 sm:$0xff]  }
  0x77   :  { %1384 = vmatpush1.bf16.msra.mxu0 %v4549_v9  ;;  %1548 = vmatpush1.bf16.msra.mxu1 %v4552_v10  ;;  %v4636_v9 = vld [vmem:[%s6583_s1 + $0x568] ss:$16 sps:$4 sm:$0xff]   ;;  %v4641_v10 = vld [vmem:[%s6583_s1 + $0x584] ss:$16 sps:$4 sm:$0xff]  }
  0x78   :  { %1385 = vmatprep.subr.bf16.mxu0 %v4557_v11  ;;  %1549 = vmatprep.subr.bf16.mxu1 %v4560_v12  ;;  %v4644_v11 = vld [vmem:[%s6583_s1 + $0x58c] ss:$16 sps:$4 sm:$0xff]   ;;  %v4639_v12 = vld [vmem:[%s6583_s1 + $0x580] ss:$16 sps:$4 sm:$0xff]  }
  0x7b   :  { %1386 = vmatpush1.bf16.msra.mxu0 %v4555_v13  ;;  %1550 = vmatpush1.bf16.msra.mxu1 %v4558_v14  ;;  %v4642_v13 = vld [vmem:[%s6583_s1 + $0x588] ss:$16 sps:$4 sm:$0xff]   ;;  %v4647_v14 = vld [vmem:[%s6583_s1 + $0x5a4] ss:$16 sps:$4 sm:$0xff]  }
  0x7c   :  { %1387 = vmatprep.subr.bf16.mxu0 %v4563_v15  ;;  %1551 = vmatprep.subr.bf16.mxu1 %v4566_v17  ;;  %v4650_v15 = vld [vmem:[%s6583_s1 + $0x5ac] ss:$16 sps:$4 sm:$0xff]   ;;  %v4645_v17 = vld [vmem:[%s6583_s1 + $0x5a0] ss:$16 sps:$4 sm:$0xff]  }
  0x7f   :  { %1388 = vmatpush1.bf16.msra.mxu0 %v4561_v20  ;;  %1552 = vmatpush1.bf16.msra.mxu1 %v4564_v21  ;;  %v4648_v20 = vld [vmem:[%s6583_s1 + $0x5a8] ss:$16 sps:$4 sm:$0xff]   ;;  %v4653_v21 = vld [vmem:[%s6583_s1 + $0x5c4] ss:$16 sps:$4 sm:$0xff]  }
  0x80   :  { %1398 = vmatprep.subr.bf16.mxu0 %v4569_v23  ;;  %1562 = vmatprep.subr.bf16.mxu1 %v4572_v24  ;;  %v4656_v23 = vld [vmem:[%s6583_s1 + $0x5cc] ss:$16 sps:$4 sm:$0xff]   ;;  %v4651_v24 = vld [vmem:[%s6583_s1 + $0x5c0] ss:$16 sps:$4 sm:$0xff]  }
  0x82   :  { %1390 = vmatmul.mubr.bf16.vlgmr.msra.gmra.mrb[0].mxu0 %v5522_v26  ;;  %1554 = vmatmul.mubr.bf16.vlgmr.msra.gmra.mrb[0].mxu1 %v5522_v26 }
  0x83   :  { %1399 = vmatpush1.bf16.msra.mxu0 %v4567_v25  ;;  %1563 = vmatpush1.bf16.msra.mxu1 %v4570_v27  ;;  %v4654_v25 = vld [vmem:[%s6583_s1 + $0x5c8] ss:$16 sps:$4 sm:$0xff]   ;;  %v4659_v27 = vld [vmem:[%s6583_s1 + $0x5e4] ss:$16 sps:$4 sm:$0xff]  }
  0x84   :  { %1400 = vmatprep.subr.bf16.mxu0 %v4575_v28  ;;  %1564 = vmatprep.subr.bf16.mxu1 %v4578_v29  ;;  %v4662_v28 = vld [vmem:[%s6583_s1 + $0x5ec] ss:$16 sps:$4 sm:$0xff]   ;;  %v4657_v29 = vld [vmem:[%s6583_s1 + $0x5e0] ss:$16 sps:$4 sm:$0xff]  }
  0x85   :  { %1430 = vmatprep.mubr.bf16.mxu0 %v5319_v18  ;;  %1594 = vmatprep.mubr.bf16.mxu1 %v5319_v18 }
  0x87   :  { %1401 = vmatpush1.bf16.msra.mxu0 %v4573_v30  ;;  %1565 = vmatpush1.bf16.msra.mxu1 %v4576_v31  ;;  %v4660_v30 = vld [vmem:[%s6583_s1 + $0x5e8] ss:$16 sps:$4 sm:$0xff]   ;;  %v4666_v31 = vld [vmem:[%s6583_s1 + $0x604] ss:$16 sps:$4 sm:$0xff]  }
  0x88   :  { %1402 = vmatprep.subr.bf16.mxu0 %v4581_v32  ;;  %1566 = vmatprep.subr.bf16.mxu1 %v4584_v33  ;;  %v4669_v32 = vld [vmem:[%s6583_s1 + $0x60c] ss:$16 sps:$4 sm:$0xff]   ;;  %v4664_v33 = vld [vmem:[%s6583_s1 + $0x600] ss:$16 sps:$4 sm:$0xff]  }
  0x8b   :  { %1403 = vmatpush1.bf16.msra.mxu0 %v4579_v34  ;;  %1567 = vmatpush1.bf16.msra.mxu1 %v4582_v35  ;;  %v4667_v34 = vld [vmem:[%s6583_s1 + $0x608] ss:$16 sps:$4 sm:$0xff]   ;;  %v4672_v35 = vld [vmem:[%s6583_s1 + $0x624] ss:$16 sps:$4 sm:$0xff]  }
  0x8c   :  { %1404 = vmatprep.subr.bf16.mxu0 %v4587_v36  ;;  %1568 = vmatprep.subr.bf16.mxu1 %v4590_v37  ;;  %v4675_v36 = vld [vmem:[%s6583_s1 + $0x62c] ss:$16 sps:$4 sm:$0xff]   ;;  %v4670_v37 = vld [vmem:[%s6583_s1 + $0x620] ss:$16 sps:$4 sm:$0xff]  }
  0x8f   :  { %1405 = vmatpush1.bf16.msra.mxu0 %v4585_v38  ;;  %1569 = vmatpush1.bf16.msra.mxu1 %v4588_v39  ;;  %v4673_v38 = vld [vmem:[%s6583_s1 + $0x628] ss:$16 sps:$4 sm:$0xff]   ;;  %v4677_v39 = vld [vmem:[%s6585_s3 + $0x40] sm:$0xff]  }
  0x90   :  { %1406 = vmatprep.subr.bf16.mxu0 %v4593_v40  ;;  %1570 = vmatprep.subr.bf16.mxu1 %v4596_v41  ;;  %v5051_v40 = vmov 0   ;;  %v4676_v41 = vld [vmem:[%s6585_s3 + $0x80] sm:$0xff]  }
  0x93   :  { %1407 = vmatpush1.bf16.msra.mxu0 %v4591_v43  ;;  %1571 = vmatpush1.bf16.msra.mxu1 %v4594_v44  ;;  %v4678_v43 = vld [vmem:[%s6585_s3] sm:$0xff]   ;;  %v5751_v44 = vcombine.high %v5321_v19, %v5321_v19 }
  0x94   :  { %1408 = vmatprep.subr.bf16.mxu0 %v4599_v45  ;;  %1572 = vmatprep.subr.bf16.mxu1 %v4602_v46  ;;  %v4680_v45 = vld [vmem:[%s6585_s3 + $0x48] sm:$0xff]  }
  0x95   :  { %v4679_v46 = vld [vmem:[%s6585_s3 + $0x88] sm:$0xff]  }
  0x97   :  { %1409 = vmatpush1.bf16.msra.mxu0 %v4597_v47  ;;  %1573 = vmatpush1.bf16.msra.mxu1 %v4600_v48  ;;  %v4681_v47 = vld [vmem:[%s6585_s3 + $0x8] sm:$0xff]   ;;  %v4683_v48 = vld [vmem:[%s6585_s3 + $0x50] sm:$0xff]  }
  0x98   :  { %1410 = vmatprep.subr.bf16.mxu0 %v4605_v49  ;;  %1574 = vmatprep.subr.bf16.mxu1 %v4608_v50  ;;  %v4682_v49 = vld [vmem:[%s6585_s3 + $0x90] sm:$0xff]  }
  0x99   :  { %v4684_v50 = vld [vmem:[%s6585_s3 + $0x10] sm:$0xff]  }
  0x9b   :  { %1411 = vmatpush1.bf16.msra.mxu0 %v4603_v51  ;;  %1575 = vmatpush1.bf16.msra.mxu1 %v4606_v52  ;;  %v4686_v51 = vld [vmem:[%s6585_s3 + $0x58] sm:$0xff]  }
  0x9c   :  { %1412 = vmatprep.subr.bf16.mxu0 %v4611_v53  ;;  %1576 = vmatprep.subr.bf16.mxu1 %v4614_v54  ;;  %v4685_v52 = vld [vmem:[%s6585_s3 + $0x98] sm:$0xff]   ;;  %v4689_v54 = vld [vmem:[%s6585_s3 + $0x60] sm:$0xff]  }
  0x9d   :  { %v4687_v53 = vld [vmem:[%s6585_s3 + $0x18] sm:$0xff]  }
  0x9f   :  { %1413 = vmatpush1.bf16.msra.mxu0 %v4609_v55  ;;  %1577 = vmatpush1.bf16.msra.mxu1 %v4612_v56  ;;  %v4688_v55 = vld [vmem:[%s6585_s3 + $0xa0] sm:$0xff]  }
  0xa0   :  { %1414 = vmatprep.subr.bf16.mxu0 %v4617_v57  ;;  %1578 = vmatprep.subr.bf16.mxu1 %v4620_v58  ;;  %v4690_v56 = vld [vmem:[%s6585_s3 + $0x20] sm:$0xff]   ;;  %v4692_v57 = vld [vmem:[%s6585_s3 + $0x68] sm:$0xff]  }
  0xa1   :  { %v4691_v58 = vld [vmem:[%s6585_s3 + $0xa8] sm:$0xff]  }
  0xa3   :  { %1415 = vmatpush1.bf16.msra.mxu0 %v4615_v59  ;;  %1579 = vmatpush1.bf16.msra.mxu1 %v4618_v61  ;;  %v4693_v59 = vld [vmem:[%s6585_s3 + $0x28] sm:$0xff]   ;;  %v4694_v61 = vld [vmem:[%s6585_s3 + $0xb0] sm:$0xff]  }
  0xa4   :  { %1416 = vmatprep.subr.bf16.mxu0 %v4623_v62  ;;  %1580 = vmatprep.subr.bf16.mxu1 %v4626_v63 }
  0xa7   :  { %1417 = vmatpush1.bf16.msra.mxu0 %v4621_v0  ;;  %1581 = vmatpush1.bf16.msra.mxu1 %v4624_v1 }
  0xa8   :  { %1418 = vmatprep.subr.bf16.mxu0 %v4629_v2  ;;  %1582 = vmatprep.subr.bf16.mxu1 %v4632_v3 }
  0xab   :  { %1419 = vmatpush1.bf16.msra.mxu0 %v4627_v4  ;;  %1583 = vmatpush1.bf16.msra.mxu1 %v4630_v5 }
  0xac   :  { %1420 = vmatprep.subr.bf16.mxu0 %v4635_v6  ;;  %1584 = vmatprep.subr.bf16.mxu1 %v4638_v7 }
  0xaf   :  { %1421 = vmatpush1.bf16.msra.mxu0 %v4633_v8  ;;  %1585 = vmatpush1.bf16.msra.mxu1 %v4636_v9 }
  0xb0   :  { %1422 = vmatprep.subr.bf16.mxu0 %v4641_v10  ;;  %1586 = vmatprep.subr.bf16.mxu1 %v4644_v11 }
  0xb3   :  { %1423 = vmatpush1.bf16.msra.mxu0 %v4639_v12  ;;  %1587 = vmatpush1.bf16.msra.mxu1 %v4642_v13 }
  0xb4   :  { %1424 = vmatprep.subr.bf16.mxu0 %v4647_v14  ;;  %1588 = vmatprep.subr.bf16.mxu1 %v4650_v15 }
  0xb7   :  { %1425 = vmatpush1.bf16.msra.mxu0 %v4645_v17  ;;  %1589 = vmatpush1.bf16.msra.mxu1 %v4648_v20 }
  0xb8   :  { %1426 = vmatprep.subr.bf16.mxu0 %v4653_v21  ;;  %1590 = vmatprep.subr.bf16.mxu1 %v4656_v23 }
  0xbb   :  { %1427 = vmatpush1.bf16.msra.mxu0 %v4651_v24  ;;  %1591 = vmatpush1.bf16.msra.mxu1 %v4654_v25 }
  0xbc   :  { %1428 = vmatprep.subr.bf16.mxu0 %v4659_v27  ;;  %1592 = vmatprep.subr.bf16.mxu1 %v4662_v28 }
  0xbf   :  { %1429 = vmatpush1.bf16.msra.mxu0 %v4657_v29  ;;  %1593 = vmatpush1.bf16.msra.mxu1 %v4660_v30 }
  0xc0   :  { %1439 = vmatprep.subr.bf16.mxu0 %v4666_v31  ;;  %1603 = vmatprep.subr.bf16.mxu1 %v4669_v32 }
  0xc2   :  { %1431 = vmatmul.mubr.bf16.vlgmr.msra.gmra.mrb[0].mxu0 %v5321_v19  ;;  %1595 = vmatmul.mubr.bf16.vlgmr.msra.gmra.mrb[0].mxu1 %v5321_v19 }
  0xc3   :  { %1440 = vmatpush1.bf16.msra.mxu0 %v4664_v33  ;;  %1604 = vmatpush1.bf16.msra.mxu1 %v4667_v34 }
  0xc4   :  { %1441 = vmatprep.subr.bf16.mxu0 %v4672_v35  ;;  %1605 = vmatprep.subr.bf16.mxu1 %v4675_v36 }
  0xc5   :  { %1471 = vmatprep.mubr.bf16.mxu0 %v5051_v40  ;;  %1635 = vmatprep.mubr.bf16.mxu1 %v5051_v40 }
  0xc7   :  { %1442 = vmatpush1.bf16.msra.mxu0 %v4670_v37  ;;  %1606 = vmatpush1.bf16.msra.mxu1 %v4673_v38 }
  0xc8   :  { %1903 = vmatprep.subr.bf16.mxu1 %v5051_v40  ;;  %4272 = vmatprep.subr.bf16.mxu0 %v4677_v39 }
  0xce   :  { %4014 = vmatmul.mubr.msk.bf16.vlgmr.msra.gmra.mrb[0].mxu0 %vm1312_vm0, %v5751_v44  ;;  %4015 = vmatmul.mubr.msk.bf16.vlgmr.msra.gmra.mrb[0].mxu1 %vm1312_vm0, %v5751_v44 }
  0xcf   :  { %1904 = vmatpush1.bf16.msra.mxu1 %v4676_v41  ;;  %4273 = vmatpush3.bf16.msra.mxu0 %v4678_v43 }
  0xd0   :  { %1905 = vmatprep.subr.bf16.mxu1 %v5051_v40  ;;  %4274 = vmatprep.subr.bf16.mxu0 %v4680_v45 }
  0xd3   :  { %1906 = vmatpush1.bf16.msra.mxu1 %v4679_v46  ;;  %4275 = vmatpush3.bf16.msra.mxu0 %v4681_v47 }
  0xd4   :  { %1907 = vmatprep.subr.bf16.mxu1 %v5051_v40  ;;  %4276 = vmatprep.subr.bf16.mxu0 %v4683_v48 }
  0xd7   :  { %1908 = vmatpush1.bf16.msra.mxu1 %v4682_v49  ;;  %4277 = vmatpush3.bf16.msra.mxu0 %v4684_v50 }
  0xd8   :  { %1909 = vmatprep.subr.bf16.mxu1 %v5051_v40  ;;  %4278 = vmatprep.subr.bf16.mxu0 %v4686_v51 }
  0xdb   :  { %1910 = vmatpush1.bf16.msra.mxu1 %v4685_v52  ;;  %4279 = vmatpush3.bf16.msra.mxu0 %v4687_v53 }
  0xdc   :  { %1911 = vmatprep.subr.bf16.mxu1 %v5051_v40  ;;  %4280 = vmatprep.subr.bf16.mxu0 %v4689_v54 }
  0xdf   :  { %1912 = vmatpush1.bf16.msra.mxu1 %v4688_v55  ;;  %4281 = vmatpush3.bf16.msra.mxu0 %v4690_v56 }
  0xe0   :  { %1913 = vmatprep.subr.bf16.mxu1 %v5051_v40  ;;  %4282 = vmatprep.subr.bf16.mxu0 %v4692_v57 }
  0xe3   :  { %1914 = vmatpush1.bf16.msra.mxu1 %v4691_v58  ;;  %4283 = vmatpush3.bf16.msra.mxu0 %v4693_v59 }
  0xe4   :  { %1915 = vmatprep.subr.bf16.mxu1 %v5051_v40 }
  0xe7   :  { %1916 = vmatpush1.bf16.msra.mxu1 %v4694_v61 }
  0xe8   :  { %1917 = vmatprep.subr.bf16.mxu1 %v5051_v40 }
  0xe9   :  { %14 = vsyncpa [#allocation3], 0  ;;  %v4695_v62 = vld [vmem:[%s6585_s3 + $0x70] sm:$0xff]   ;;  %v4697_v0 = vld [vmem:[%s6585_s3 + $0xb8] sm:$0xff]   ;;  %v239_v6 = vsub.s32 0, %v5220_v42  ;;  %v247_v7 = vsub.s32 2, %v5220_v42 }
  0xea   :  { %v4696_v63 = vld [vmem:[%s6585_s3 + $0x30] sm:$0xff]   ;;  %4284 = vmatprep.subr.bf16.mxu0 %v4695_v62  ;;  %v4698_v1 = vld [vmem:[%s6585_s3 + $0x78] sm:$0xff]   ;;  %v4700_v3 = vld [vmem:[%s6585_s3 + $0xc0] sm:$0xff]   ;;  %v243_v9 = vsub.s32 1, %v5220_v42  ;;  %v251_v10 = vsub.s32 3, %v5220_v42  ;;  %vm1859_vm1 = vcmask 130048  }
  0xeb   :  { %4285 = vmatpush3.bf16.msra.mxu0 %v4696_v63  ;;  %1918 = vmatpush1.bf16.msra.mxu1 %v4697_v0  ;;  %v4699_v2 = vld [vmem:[%s6585_s3 + $0x38] sm:$0xff]   ;;  %v4703_v4 = vld [vmem:[%s6587_s5 + $0x4] ss:$16 sps:$4 sm:$0xff]   ;;  %v235_v8 = vld [vmem:[%s6584_s2] sm:$0xf]  ;;  %vm3792_vm2 = vcmask 41984  }
  0xec   :  { %1919 = vmatprep.subr.bf16.mxu1 %v5051_v40  ;;  %4286 = vmatprep.subr.bf16.mxu0 %v4698_v1  ;;  %v4706_v5 = vld [vmem:[%s6587_s5 + $0xc] ss:$16 sps:$4 sm:$0xff]   ;;  %v240_v11 = vrot.slane %v235_v8, %v239_v6  ;;  %v248_v12 = vrot.slane %v235_v8, %v247_v7  ;;  %v244_v13 = vrot.slane %v235_v8, %v243_v9  ;;  %v4701_v38 = vld [vmem:[%s6587_s5] ss:$16 sps:$4 sm:$0xff]   ;;  %v4704_v39 = vld [vmem:[%s6587_s5 + $0x8] ss:$16 sps:$4 sm:$0xff]  }
  0xed   :  { %v252_v14 = vrot.slane %v235_v8, %v251_v10  ;;  %v4709_v45 = vld [vmem:[%s6587_s5 + $0x24] ss:$16 sps:$4 sm:$0xff]   ;;  %v4712_v46 = vld [vmem:[%s6587_s5 + $0x2c] ss:$16 sps:$4 sm:$0xff]   ;;  %v4707_v47 = vld [vmem:[%s6587_s5 + $0x20] ss:$16 sps:$4 sm:$0xff]  }
  0xee   :  { %v4710_v48 = vld [vmem:[%s6587_s5 + $0x28] ss:$16 sps:$4 sm:$0xff]   ;;  %v4715_v49 = vld [vmem:[%s6587_s5 + $0x44] ss:$16 sps:$4 sm:$0xff]   ;;  %v4718_v50 = vld [vmem:[%s6587_s5 + $0x4c] ss:$16 sps:$4 sm:$0xff]  }
  0xef   :  { %4287 = vmatpush3.bf16.msra.mxu0 %v4699_v2  ;;  %1920 = vmatpush1.bf16.msra.mxu1 %v4700_v3  ;;  %v4713_v51 = vld [vmem:[%s6587_s5 + $0x40] ss:$16 sps:$4 sm:$0xff]   ;;  %v4716_v52 = vld [vmem:[%s6587_s5 + $0x48] ss:$16 sps:$4 sm:$0xff]   ;;  %v4721_v53 = vld [vmem:[%s6587_s5 + $0x64] ss:$16 sps:$4 sm:$0xff]  }
  0xf0   :  { %3165 = vmatprep.subr.bf16.mxu0 %v4703_v4  ;;  %3329 = vmatprep.subr.bf16.mxu1 %v4706_v5  ;;  %v4719_v54 = vld [vmem:[%s6587_s5 + $0x60] ss:$16 sps:$4 sm:$0xff]   ;;  %v4722_v55 = vld [vmem:[%s6587_s5 + $0x68] ss:$16 sps:$4 sm:$0xff]   ;;  %v4727_v56 = vld [vmem:[%s6587_s5 + $0x84] ss:$16 sps:$4 sm:$0xff]  }
  0xf1   :  { %v4730_v57 = vld [vmem:[%s6587_s5 + $0x8c] ss:$16 sps:$4 sm:$0xff]   ;;  %v4725_v58 = vld [vmem:[%s6587_s5 + $0x80] ss:$16 sps:$4 sm:$0xff]   ;;  %v4728_v59 = vld [vmem:[%s6587_s5 + $0x88] ss:$16 sps:$4 sm:$0xff]  }
  0xf2   :  { %v4733_v61 = vld [vmem:[%s6587_s5 + $0xa4] ss:$16 sps:$4 sm:$0xff]   ;;  %v4736_v62 = vld [vmem:[%s6587_s5 + $0xac] ss:$16 sps:$4 sm:$0xff]   ;;  %v4731_v63 = vld [vmem:[%s6587_s5 + $0xa0] ss:$16 sps:$4 sm:$0xff]  }
  0xf3   :  { %v4734_v0 = vld [vmem:[%s6587_s5 + $0xa8] ss:$16 sps:$4 sm:$0xff]   ;;  %v4739_v1 = vld [vmem:[%s6587_s5 + $0xc4] ss:$16 sps:$4 sm:$0xff]   ;;  %v4742_v2 = vld [vmem:[%s6587_s5 + $0xcc] ss:$16 sps:$4 sm:$0xff]  }
  0xf4   :  { %v4737_v3 = vld [vmem:[%s6587_s5 + $0xc0] ss:$16 sps:$4 sm:$0xff]   ;;  %v4740_v4 = vld [vmem:[%s6587_s5 + $0xc8] ss:$16 sps:$4 sm:$0xff]   ;;  %v4745_v5 = vld [vmem:[%s6587_s5 + $0xe4] ss:$16 sps:$4 sm:$0xff]  }
  0xf5   :  { %v4748_v8 = vld [vmem:[%s6587_s5 + $0xec] ss:$16 sps:$4 sm:$0xff]   ;;  %s5052_s24 = smov [#allocation2]  }
  0xf6   :  { %s3806_s25 = sshll.u32 %s5052_s24, 4  ;;  %s3807_s25 = int_to_ptr.vmem [resolvable:$true] %s3806_s25 }
  0xf7   :  { %p5031_p1 = scmp.lt.s32.totalorder %s3807_s25, %s3807_s25 }
 0x1a1   :  { %v1473_v15 = vpop.f32.mrb[0].mxu0  ;;  %v1637_v17 = vpop.f32.mrb[0].mxu1 }
 0x1a2   :  { %v4316_v20 = vadd.f32 %v1473_v15, %v240_v11  ;;  %v4318_v21 = vadd.f32 %v1637_v17, %v248_v12  ;;  %v1475_v23 = vpop.f32.mrb[1].mxu0  ;;  %v1639_v24 = vpop.f32.mrb[1].mxu1  ;;  %v4743_v11 = vld [vmem:[%s6587_s5 + $0xe0] ss:$16 sps:$4 sm:$0xff]   ;;  %v4746_v12 = vld [vmem:[%s6587_s5 + $0xe8] ss:$16 sps:$4 sm:$0xff]  }
 0x1a3   :  { %v4317_v25 = vadd.f32 %v1475_v23, %v244_v13  ;;  %v4319_v27 = vadd.f32 %v1639_v24, %v252_v14  ;;  %v1477_v28 = vpop.f32.mrb[2].mxu0  ;;  %v1641_v29 = vpop.f32.mrb[2].mxu1  ;;  %v4751_v13 = vld [vmem:[%s6587_s5 + $0x104] ss:$16 sps:$4 sm:$0xff]   ;;  %v4754_v14 = vld [vmem:[%s6587_s5 + $0x10c] ss:$16 sps:$4 sm:$0xff]  }
 0x1a4   :  { %v1644_v30 = vmax.f32 %v4316_v20, 0.0  ;;  %v1646_v31 = vmax.f32 %v4318_v21, 0.0  ;;  %v1478_v32 = vpop.f32.mrb[3].mxu0  ;;  %v1642_v33 = vpop.f32.mrb[3].mxu1  ;;  %v4749_v15 = vld [vmem:[%s6587_s5 + $0x100] ss:$16 sps:$4 sm:$0xff]  }
 0x1a5   :  { %v1645_v34 = vmax.f32 %v4317_v25, 0.0  ;;  %v1647_v35 = vmax.f32 %v4319_v27, 0.0  ;;  %v4752_v17 = vld [vmem:[%s6587_s5 + $0x108] ss:$16 sps:$4 sm:$0xff]   ;;  %v4757_v20 = vld [vmem:[%s6587_s5 + $0x124] ss:$16 sps:$4 sm:$0xff]  }
 0x1a6   :  { %v1648_v41 = vpack.c.bf16 %v1644_v30, %v1644_v30  ;;  %v1650_v43 = vpack.c.bf16 %v1646_v31, %v1646_v31  ;;  %v4760_v21 = vld [vmem:[%s6587_s5 + $0x12c] ss:$16 sps:$4 sm:$0xff]   ;;  %v4755_v23 = vld [vmem:[%s6587_s5 + $0x120] ss:$16 sps:$4 sm:$0xff]   ;;  %v4758_v24 = vld [vmem:[%s6587_s5 + $0x128] ss:$16 sps:$4 sm:$0xff]  }
 0x1a7   :  { %v1649_v36 = vpack.c.bf16 %v1645_v34, %v1645_v34  ;;  %v1651_v37 = vpack.c.bf16 %v1647_v35, %v1647_v35  ;;  %v4763_v25 = vld [vmem:[%s6587_s5 + $0x144] ss:$16 sps:$4 sm:$0xff]   ;;  %v4766_v27 = vld [vmem:[%s6587_s5 + $0x14c] ss:$16 sps:$4 sm:$0xff]   ;;  %v4761_v28 = vld [vmem:[%s6587_s5 + $0x140] ss:$16 sps:$4 sm:$0xff]  }
 0x1a8   :  { %v4764_v29 = vld [vmem:[%s6587_s5 + $0x148] ss:$16 sps:$4 sm:$0xff]   ;;  %v4769_v30 = vld [vmem:[%s6587_s5 + $0x164] ss:$16 sps:$4 sm:$0xff]   ;;  %v4772_v31 = vld [vmem:[%s6587_s5 + $0x16c] ss:$16 sps:$4 sm:$0xff]  }
 0x1a9   :  { %1895 = vmatprep.mubr.bf16.mxu0 %v1649_v36  ;;  %4042 = vmatprep.mubr.msk.bf16.mxu1 %vm1859_vm1, %v1651_v37  ;;  %v4767_v32 = vld [vmem:[%s6587_s5 + $0x160] ss:$16 sps:$4 sm:$0xff]   ;;  %v4770_v33 = vld [vmem:[%s6587_s5 + $0x168] ss:$16 sps:$4 sm:$0xff]   ;;  %v4775_v34 = vld [vmem:[%s6587_s5 + $0x184] ss:$16 sps:$4 sm:$0xff]  }
 0x1aa   :  { %1896 = vmatmul.mubr.bf16.vlgmr.msra.gmra.mrb[4].mxu0 %v1648_v41  ;;  %1936 = vmatmul.mubr.bf16.vlgmr.msra.gmra.mrb[4].mxu1 %v1650_v43  ;;  %v4778_v35 = vld [vmem:[%s6587_s5 + $0x18c] ss:$16 sps:$4 sm:$0xff]   ;;  %v4773_v36 = vld [vmem:[%s6587_s5 + $0x180] ss:$16 sps:$4 sm:$0xff]   ;;  %v4776_v37 = vld [vmem:[%s6587_s5 + $0x188] ss:$16 sps:$4 sm:$0xff]  }
 0x1ab   :  { %3166 = vmatpush1.bf16.msra.mxu0 %v4701_v38  ;;  %3330 = vmatpush1.bf16.msra.mxu1 %v4704_v39  ;;  %v4781_v38 = vld [vmem:[%s6587_s5 + $0x1a4] ss:$16 sps:$4 sm:$0xff]   ;;  %v4784_v39 = vld [vmem:[%s6587_s5 + $0x1ac] ss:$16 sps:$4 sm:$0xff]   ;;  %v4779_v41 = vld [vmem:[%s6587_s5 + $0x1a0] ss:$16 sps:$4 sm:$0xff]  }
 0x1ac   :  { %3167 = vmatprep.subr.bf16.mxu0 %v4709_v45  ;;  %3331 = vmatprep.subr.bf16.mxu1 %v4712_v46  ;;  %v4782_v43 = vld [vmem:[%s6587_s5 + $0x1a8] ss:$16 sps:$4 sm:$0xff]   ;;  %v4787_v45 = vld [vmem:[%s6587_s5 + $0x1c4] ss:$16 sps:$4 sm:$0xff]   ;;  %v4790_v46 = vld [vmem:[%s6587_s5 + $0x1cc] ss:$16 sps:$4 sm:$0xff]  }
 0x1ad   :  { %3197 = vmatprep.mubr.bf16.mxu0 %v5262_v60  ;;  %3361 = vmatprep.mubr.bf16.mxu1 %v5262_v60  ;;  %v4724_v60 = vld [vmem:[%s6587_s5 + $0x6c] ss:$16 sps:$4 sm:$0xff]  }
 0x1af   :  { %3168 = vmatpush1.bf16.msra.mxu0 %v4707_v47  ;;  %3332 = vmatpush1.bf16.msra.mxu1 %v4710_v48  ;;  %v4785_v47 = vld [vmem:[%s6587_s5 + $0x1c0] ss:$16 sps:$4 sm:$0xff]   ;;  %v4788_v48 = vld [vmem:[%s6587_s5 + $0x1c8] ss:$16 sps:$4 sm:$0xff]  }
 0x1b0   :  { %3169 = vmatprep.subr.bf16.mxu0 %v4715_v49  ;;  %3333 = vmatprep.subr.bf16.mxu1 %v4718_v50  ;;  %v4793_v49 = vld [vmem:[%s6587_s5 + $0x1e4] ss:$16 sps:$4 sm:$0xff]   ;;  %v4796_v50 = vld [vmem:[%s6587_s5 + $0x1ec] ss:$16 sps:$4 sm:$0xff]  }
 0x1b3   :  { %3170 = vmatpush1.bf16.msra.mxu0 %v4713_v51  ;;  %3334 = vmatpush1.bf16.msra.mxu1 %v4716_v52  ;;  %v4791_v51 = vld [vmem:[%s6587_s5 + $0x1e0] ss:$16 sps:$4 sm:$0xff]   ;;  %v4794_v52 = vld [vmem:[%s6587_s5 + $0x1e8] ss:$16 sps:$4 sm:$0xff]  }
 0x1b4   :  { %3171 = vmatprep.subr.bf16.mxu0 %v4721_v53  ;;  %3335 = vmatprep.subr.bf16.mxu1 %v4724_v60  ;;  %v4799_v53 = vld [vmem:[%s6587_s5 + $0x204] ss:$16 sps:$4 sm:$0xff]   ;;  %v4802_v60 = vld [vmem:[%s6587_s5 + $0x20c] ss:$16 sps:$4 sm:$0xff]  }
 0x1b7   :  { %3172 = vmatpush1.bf16.msra.mxu0 %v4719_v54  ;;  %3336 = vmatpush1.bf16.msra.mxu1 %v4722_v55  ;;  %v4797_v54 = vld [vmem:[%s6587_s5 + $0x200] ss:$16 sps:$4 sm:$0xff]   ;;  %v4800_v55 = vld [vmem:[%s6587_s5 + $0x208] ss:$16 sps:$4 sm:$0xff]  }
 0x1b8   :  { %3173 = vmatprep.subr.bf16.mxu0 %v4727_v56  ;;  %3337 = vmatprep.subr.bf16.mxu1 %v4730_v57  ;;  %v4805_v56 = vld [vmem:[%s6587_s5 + $0x224] ss:$16 sps:$4 sm:$0xff]   ;;  %v4808_v57 = vld [vmem:[%s6587_s5 + $0x22c] ss:$16 sps:$4 sm:$0xff]  }
 0x1bb   :  { %3174 = vmatpush1.bf16.msra.mxu0 %v4725_v58  ;;  %3338 = vmatpush1.bf16.msra.mxu1 %v4728_v59  ;;  %v4803_v58 = vld [vmem:[%s6587_s5 + $0x220] ss:$16 sps:$4 sm:$0xff]   ;;  %v4806_v59 = vld [vmem:[%s6587_s5 + $0x228] ss:$16 sps:$4 sm:$0xff]  }
 0x1bc   :  { %3175 = vmatprep.subr.bf16.mxu0 %v4733_v61  ;;  %3339 = vmatprep.subr.bf16.mxu1 %v4736_v62  ;;  %v4811_v61 = vld [vmem:[%s6587_s5 + $0x244] ss:$16 sps:$4 sm:$0xff]   ;;  %v4809_v62 = vld [vmem:[%s6587_s5 + $0x240] ss:$16 sps:$4 sm:$0xff]  }
 0x1bf   :  { %3176 = vmatpush1.bf16.msra.mxu0 %v4731_v63  ;;  %3340 = vmatpush1.bf16.msra.mxu1 %v4734_v0  ;;  %v4812_v63 = vld [vmem:[%s6587_s5 + $0x248] ss:$16 sps:$4 sm:$0xff]   ;;  %v4817_v0 = vld [vmem:[%s6587_s5 + $0x264] ss:$16 sps:$4 sm:$0xff]  }
 0x1c0   :  { %3177 = vmatprep.subr.bf16.mxu0 %v4739_v1  ;;  %3341 = vmatprep.subr.bf16.mxu1 %v4742_v2  ;;  %v4815_v1 = vld [vmem:[%s6587_s5 + $0x260] ss:$16 sps:$4 sm:$0xff]   ;;  %v4818_v2 = vld [vmem:[%s6587_s5 + $0x268] ss:$16 sps:$4 sm:$0xff]  }
 0x1c3   :  { %3178 = vmatpush1.bf16.msra.mxu0 %v4737_v3  ;;  %3342 = vmatpush1.bf16.msra.mxu1 %v4740_v4  ;;  %v4823_v3 = vld [vmem:[%s6587_s5 + $0x284] ss:$16 sps:$4 sm:$0xff]   ;;  %v4826_v4 = vld [vmem:[%s6587_s5 + $0x28c] ss:$16 sps:$4 sm:$0xff]  }
 0x1c4   :  { %3179 = vmatprep.subr.bf16.mxu0 %v4745_v5  ;;  %3343 = vmatprep.subr.bf16.mxu1 %v4748_v8  ;;  %v4821_v5 = vld [vmem:[%s6587_s5 + $0x280] ss:$16 sps:$4 sm:$0xff]   ;;  %v4824_v8 = vld [vmem:[%s6587_s5 + $0x288] ss:$16 sps:$4 sm:$0xff]  }
 0x1c7   :  { %3180 = vmatpush1.bf16.msra.mxu0 %v4743_v11  ;;  %3344 = vmatpush1.bf16.msra.mxu1 %v4746_v12  ;;  %v4829_v11 = vld [vmem:[%s6587_s5 + $0x2a4] ss:$16 sps:$4 sm:$0xff]   ;;  %v4832_v12 = vld [vmem:[%s6587_s5 + $0x2ac] ss:$16 sps:$4 sm:$0xff]  }
 0x1c8   :  { %3181 = vmatprep.subr.bf16.mxu0 %v4751_v13  ;;  %3345 = vmatprep.subr.bf16.mxu1 %v4754_v14  ;;  %v4827_v13 = vld [vmem:[%s6587_s5 + $0x2a0] ss:$16 sps:$4 sm:$0xff]   ;;  %v4830_v14 = vld [vmem:[%s6587_s5 + $0x2a8] ss:$16 sps:$4 sm:$0xff]  }
 0x1cb   :  { %3182 = vmatpush1.bf16.msra.mxu0 %v4749_v15  ;;  %3346 = vmatpush1.bf16.msra.mxu1 %v4752_v17  ;;  %v4835_v15 = vld [vmem:[%s6587_s5 + $0x2c4] ss:$16 sps:$4 sm:$0xff]   ;;  %v4838_v17 = vld [vmem:[%s6587_s5 + $0x2cc] ss:$16 sps:$4 sm:$0xff]  }
 0x1cc   :  { %3183 = vmatprep.subr.bf16.mxu0 %v4757_v20  ;;  %3347 = vmatprep.subr.bf16.mxu1 %v4760_v21  ;;  %v4833_v20 = vld [vmem:[%s6587_s5 + $0x2c0] ss:$16 sps:$4 sm:$0xff]   ;;  %v4836_v21 = vld [vmem:[%s6587_s5 + $0x2c8] ss:$16 sps:$4 sm:$0xff]  }
 0x1cf   :  { %3184 = vmatpush1.bf16.msra.mxu0 %v4755_v23  ;;  %3348 = vmatpush1.bf16.msra.mxu1 %v4758_v24  ;;  %v4841_v23 = vld [vmem:[%s6587_s5 + $0x2e4] ss:$16 sps:$4 sm:$0xff]   ;;  %v4844_v24 = vld [vmem:[%s6587_s5 + $0x2ec] ss:$16 sps:$4 sm:$0xff]  }
 0x1d0   :  { %3185 = vmatprep.subr.bf16.mxu0 %v4763_v25  ;;  %3349 = vmatprep.subr.bf16.mxu1 %v4766_v27  ;;  %v4839_v25 = vld [vmem:[%s6587_s5 + $0x2e0] ss:$16 sps:$4 sm:$0xff]   ;;  %v4842_v27 = vld [vmem:[%s6587_s5 + $0x2e8] ss:$16 sps:$4 sm:$0xff]  }
 0x1d3   :  { %3186 = vmatpush1.bf16.msra.mxu0 %v4761_v28  ;;  %3350 = vmatpush1.bf16.msra.mxu1 %v4764_v29  ;;  %v4847_v28 = vld [vmem:[%s6587_s5 + $0x304] ss:$16 sps:$4 sm:$0xff]   ;;  %v4850_v29 = vld [vmem:[%s6587_s5 + $0x30c] ss:$16 sps:$4 sm:$0xff]  }
 0x1d4   :  { %3187 = vmatprep.subr.bf16.mxu0 %v4769_v30  ;;  %3351 = vmatprep.subr.bf16.mxu1 %v4772_v31  ;;  %v4845_v30 = vld [vmem:[%s6587_s5 + $0x300] ss:$16 sps:$4 sm:$0xff]   ;;  %v4848_v31 = vld [vmem:[%s6587_s5 + $0x308] ss:$16 sps:$4 sm:$0xff]  }
 0x1d7   :  { %3188 = vmatpush1.bf16.msra.mxu0 %v4767_v32  ;;  %3352 = vmatpush1.bf16.msra.mxu1 %v4770_v33  ;;  %v4853_v32 = vld [vmem:[%s6587_s5 + $0x324] ss:$16 sps:$4 sm:$0xff]   ;;  %v4856_v33 = vld [vmem:[%s6587_s5 + $0x32c] ss:$16 sps:$4 sm:$0xff]  }
 0x1d8   :  { %3189 = vmatprep.subr.bf16.mxu0 %v4775_v34  ;;  %3353 = vmatprep.subr.bf16.mxu1 %v4778_v35  ;;  %v4851_v34 = vld [vmem:[%s6587_s5 + $0x320] ss:$16 sps:$4 sm:$0xff]   ;;  %v4854_v35 = vld [vmem:[%s6587_s5 + $0x328] ss:$16 sps:$4 sm:$0xff]  }
 0x1db   :  { %3190 = vmatpush1.bf16.msra.mxu0 %v4773_v36  ;;  %3354 = vmatpush1.bf16.msra.mxu1 %v4776_v37  ;;  %v4859_v36 = vld [vmem:[%s6587_s5 + $0x344] ss:$16 sps:$4 sm:$0xff]   ;;  %v4862_v37 = vld [vmem:[%s6587_s5 + $0x34c] ss:$16 sps:$4 sm:$0xff]  }
 0x1dc   :  { %3191 = vmatprep.subr.bf16.mxu0 %v4781_v38  ;;  %3355 = vmatprep.subr.bf16.mxu1 %v4784_v39  ;;  %v4857_v38 = vld [vmem:[%s6587_s5 + $0x340] ss:$16 sps:$4 sm:$0xff]   ;;  %v4860_v39 = vld [vmem:[%s6587_s5 + $0x348] ss:$16 sps:$4 sm:$0xff]  }
 0x1df   :  { %3192 = vmatpush1.bf16.msra.mxu0 %v4779_v41  ;;  %3356 = vmatpush1.bf16.msra.mxu1 %v4782_v43  ;;  %v4865_v41 = vld [vmem:[%s6587_s5 + $0x364] ss:$16 sps:$4 sm:$0xff]   ;;  %v4868_v43 = vld [vmem:[%s6587_s5 + $0x36c] ss:$16 sps:$4 sm:$0xff]  }
 0x1e0   :  { %3193 = vmatprep.subr.bf16.mxu0 %v4787_v45  ;;  %3357 = vmatprep.subr.bf16.mxu1 %v4790_v46  ;;  %v4863_v45 = vld [vmem:[%s6587_s5 + $0x360] ss:$16 sps:$4 sm:$0xff]   ;;  %v4866_v46 = vld [vmem:[%s6587_s5 + $0x368] ss:$16 sps:$4 sm:$0xff]  }
 0x1e3   :  { %3194 = vmatpush1.bf16.msra.mxu0 %v4785_v47  ;;  %3358 = vmatpush1.bf16.msra.mxu1 %v4788_v48  ;;  %v4871_v47 = vld [vmem:[%s6587_s5 + $0x384] ss:$16 sps:$4 sm:$0xff]   ;;  %v4874_v48 = vld [vmem:[%s6587_s5 + $0x38c] ss:$16 sps:$4 sm:$0xff]  }
 0x1e4   :  { %3195 = vmatprep.subr.bf16.mxu0 %v4793_v49  ;;  %3359 = vmatprep.subr.bf16.mxu1 %v4796_v50  ;;  %v4869_v49 = vld [vmem:[%s6587_s5 + $0x380] ss:$16 sps:$4 sm:$0xff]   ;;  %v4872_v50 = vld [vmem:[%s6587_s5 + $0x388] ss:$16 sps:$4 sm:$0xff]  }
 0x1e7   :  { %3196 = vmatpush1.bf16.msra.mxu0 %v4791_v51  ;;  %3360 = vmatpush1.bf16.msra.mxu1 %v4794_v52  ;;  %v4877_v51 = vld [vmem:[%s6587_s5 + $0x3a4] ss:$16 sps:$4 sm:$0xff]   ;;  %v4880_v52 = vld [vmem:[%s6587_s5 + $0x3ac] ss:$16 sps:$4 sm:$0xff]  }
 0x1e8   :  { %3206 = vmatprep.subr.bf16.mxu0 %v4799_v53  ;;  %3370 = vmatprep.subr.bf16.mxu1 %v4802_v60  ;;  %v4875_v53 = vld [vmem:[%s6587_s5 + $0x3a0] ss:$16 sps:$4 sm:$0xff]   ;;  %v4878_v60 = vld [vmem:[%s6587_s5 + $0x3a8] ss:$16 sps:$4 sm:$0xff]  }
 0x1ea   :  { %3198 = vmatmul.mubr.bf16.vlgmr.msra.gmra.mrb[8].mxu0 %v5314_v16  ;;  %3362 = vmatmul.mubr.bf16.vlgmr.msra.gmra.mrb[8].mxu1 %v5314_v16  ;;  %v4814_v16 = vld [vmem:[%s6587_s5 + $0x24c] ss:$16 sps:$4 sm:$0xff]  }
 0x1eb   :  { %3207 = vmatpush1.bf16.msra.mxu0 %v4797_v54  ;;  %3371 = vmatpush1.bf16.msra.mxu1 %v4800_v55  ;;  %v4883_v54 = vld [vmem:[%s6587_s5 + $0x3c4] ss:$16 sps:$4 sm:$0xff]   ;;  %v4886_v55 = vld [vmem:[%s6587_s5 + $0x3cc] ss:$16 sps:$4 sm:$0xff]  }
 0x1ec   :  { %3208 = vmatprep.subr.bf16.mxu0 %v4805_v56  ;;  %3372 = vmatprep.subr.bf16.mxu1 %v4808_v57  ;;  %v4881_v56 = vld [vmem:[%s6587_s5 + $0x3c0] ss:$16 sps:$4 sm:$0xff]   ;;  %v4884_v57 = vld [vmem:[%s6587_s5 + $0x3c8] ss:$16 sps:$4 sm:$0xff]  }
 0x1ed   :  { %3238 = vmatprep.mubr.bf16.mxu0 %v5331_v22  ;;  %3402 = vmatprep.mubr.bf16.mxu1 %v5331_v22  ;;  %v4820_v22 = vld [vmem:[%s6587_s5 + $0x26c] ss:$16 sps:$4 sm:$0xff]  }
 0x1ef   :  { %3209 = vmatpush1.bf16.msra.mxu0 %v4803_v58  ;;  %3373 = vmatpush1.bf16.msra.mxu1 %v4806_v59  ;;  %v4889_v58 = vld [vmem:[%s6587_s5 + $0x3e4] ss:$16 sps:$4 sm:$0xff]   ;;  %v4892_v59 = vld [vmem:[%s6587_s5 + $0x3ec] ss:$16 sps:$4 sm:$0xff]  }
 0x1f0   :  { %3210 = vmatprep.subr.bf16.mxu0 %v4811_v61  ;;  %3374 = vmatprep.subr.bf16.mxu1 %v4814_v16  ;;  %v4887_v61 = vld [vmem:[%s6587_s5 + $0x3e0] ss:$16 sps:$4 sm:$0xff]   ;;  %v4890_v16 = vld [vmem:[%s6587_s5 + $0x3e8] ss:$16 sps:$4 sm:$0xff]  }
 0x1f3   :  { %3211 = vmatpush1.bf16.msra.mxu0 %v4809_v62  ;;  %3375 = vmatpush1.bf16.msra.mxu1 %v4812_v63  ;;  %v4895_v62 = vld [vmem:[%s6587_s5 + $0x404] ss:$16 sps:$4 sm:$0xff]   ;;  %v4898_v63 = vld [vmem:[%s6587_s5 + $0x40c] ss:$16 sps:$4 sm:$0xff]  }
 0x1f4   :  { %3212 = vmatprep.subr.bf16.mxu0 %v4817_v0  ;;  %3376 = vmatprep.subr.bf16.mxu1 %v4820_v22  ;;  %v4893_v0 = vld [vmem:[%s6587_s5 + $0x400] ss:$16 sps:$4 sm:$0xff]   ;;  %v4896_v22 = vld [vmem:[%s6587_s5 + $0x408] ss:$16 sps:$4 sm:$0xff]  }
 0x1f7   :  { %3213 = vmatpush1.bf16.msra.mxu0 %v4815_v1  ;;  %3377 = vmatpush1.bf16.msra.mxu1 %v4818_v2  ;;  %v4901_v1 = vld [vmem:[%s6587_s5 + $0x424] ss:$16 sps:$4 sm:$0xff]   ;;  %v4904_v2 = vld [vmem:[%s6587_s5 + $0x42c] ss:$16 sps:$4 sm:$0xff]  }
 0x1f8   :  { %3214 = vmatprep.subr.bf16.mxu0 %v4823_v3  ;;  %3378 = vmatprep.subr.bf16.mxu1 %v4826_v4  ;;  %v4899_v3 = vld [vmem:[%s6587_s5 + $0x420] ss:$16 sps:$4 sm:$0xff]   ;;  %v4902_v4 = vld [vmem:[%s6587_s5 + $0x428] ss:$16 sps:$4 sm:$0xff]  }
 0x1fb   :  { %3215 = vmatpush1.bf16.msra.mxu0 %v4821_v5  ;;  %3379 = vmatpush1.bf16.msra.mxu1 %v4824_v8  ;;  %v4907_v5 = vld [vmem:[%s6587_s5 + $0x444] ss:$16 sps:$4 sm:$0xff]   ;;  %v4905_v8 = vld [vmem:[%s6587_s5 + $0x440] ss:$16 sps:$4 sm:$0xff]  }
 0x1fc   :  { %3216 = vmatprep.subr.bf16.mxu0 %v4829_v11  ;;  %3380 = vmatprep.subr.bf16.mxu1 %v4832_v12  ;;  %v4908_v11 = vld [vmem:[%s6587_s5 + $0x448] ss:$16 sps:$4 sm:$0xff]   ;;  %v4913_v12 = vld [vmem:[%s6587_s5 + $0x464] ss:$16 sps:$4 sm:$0xff]  }
 0x1ff   :  { %3217 = vmatpush1.bf16.msra.mxu0 %v4827_v13  ;;  %3381 = vmatpush1.bf16.msra.mxu1 %v4830_v14  ;;  %v4911_v13 = vld [vmem:[%s6587_s5 + $0x460] ss:$16 sps:$4 sm:$0xff]   ;;  %v4914_v14 = vld [vmem:[%s6587_s5 + $0x468] ss:$16 sps:$4 sm:$0xff]  }
 0x200   :  { %3218 = vmatprep.subr.bf16.mxu0 %v4835_v15  ;;  %3382 = vmatprep.subr.bf16.mxu1 %v4838_v17  ;;  %v4919_v15 = vld [vmem:[%s6587_s5 + $0x484] ss:$16 sps:$4 sm:$0xff]   ;;  %v4922_v17 = vld [vmem:[%s6587_s5 + $0x48c] ss:$16 sps:$4 sm:$0xff]  }
 0x203   :  { %3219 = vmatpush1.bf16.msra.mxu0 %v4833_v20  ;;  %3383 = vmatpush1.bf16.msra.mxu1 %v4836_v21  ;;  %v4917_v20 = vld [vmem:[%s6587_s5 + $0x480] ss:$16 sps:$4 sm:$0xff]   ;;  %v4920_v21 = vld [vmem:[%s6587_s5 + $0x488] ss:$16 sps:$4 sm:$0xff]  }
 0x204   :  { %3220 = vmatprep.subr.bf16.mxu0 %v4841_v23  ;;  %3384 = vmatprep.subr.bf16.mxu1 %v4844_v24  ;;  %v4925_v23 = vld [vmem:[%s6587_s5 + $0x4a4] ss:$16 sps:$4 sm:$0xff]   ;;  %v4928_v24 = vld [vmem:[%s6587_s5 + $0x4ac] ss:$16 sps:$4 sm:$0xff]  }
 0x207   :  { %3221 = vmatpush1.bf16.msra.mxu0 %v4839_v25  ;;  %3385 = vmatpush1.bf16.msra.mxu1 %v4842_v27  ;;  %v4923_v25 = vld [vmem:[%s6587_s5 + $0x4a0] ss:$16 sps:$4 sm:$0xff]   ;;  %v4926_v27 = vld [vmem:[%s6587_s5 + $0x4a8] ss:$16 sps:$4 sm:$0xff]  }
 0x208   :  { %3222 = vmatprep.subr.bf16.mxu0 %v4847_v28  ;;  %3386 = vmatprep.subr.bf16.mxu1 %v4850_v29  ;;  %v4931_v28 = vld [vmem:[%s6587_s5 + $0x4c4] ss:$16 sps:$4 sm:$0xff]   ;;  %v4934_v29 = vld [vmem:[%s6587_s5 + $0x4cc] ss:$16 sps:$4 sm:$0xff]  }
 0x20b   :  { %3223 = vmatpush1.bf16.msra.mxu0 %v4845_v30  ;;  %3387 = vmatpush1.bf16.msra.mxu1 %v4848_v31  ;;  %v4929_v30 = vld [vmem:[%s6587_s5 + $0x4c0] ss:$16 sps:$4 sm:$0xff]   ;;  %v4932_v31 = vld [vmem:[%s6587_s5 + $0x4c8] ss:$16 sps:$4 sm:$0xff]  }
 0x20c   :  { %3224 = vmatprep.subr.bf16.mxu0 %v4853_v32  ;;  %3388 = vmatprep.subr.bf16.mxu1 %v4856_v33  ;;  %v4937_v32 = vld [vmem:[%s6587_s5 + $0x4e4] ss:$16 sps:$4 sm:$0xff]   ;;  %v4940_v33 = vld [vmem:[%s6587_s5 + $0x4ec] ss:$16 sps:$4 sm:$0xff]  }
 0x20f   :  { %3225 = vmatpush1.bf16.msra.mxu0 %v4851_v34  ;;  %3389 = vmatpush1.bf16.msra.mxu1 %v4854_v35  ;;  %v4935_v34 = vld [vmem:[%s6587_s5 + $0x4e0] ss:$16 sps:$4 sm:$0xff]   ;;  %v4938_v35 = vld [vmem:[%s6587_s5 + $0x4e8] ss:$16 sps:$4 sm:$0xff]  }
 0x210   :  { %3226 = vmatprep.subr.bf16.mxu0 %v4859_v36  ;;  %3390 = vmatprep.subr.bf16.mxu1 %v4862_v37  ;;  %v4943_v36 = vld [vmem:[%s6587_s5 + $0x504] ss:$16 sps:$4 sm:$0xff]   ;;  %v4946_v37 = vld [vmem:[%s6587_s5 + $0x50c] ss:$16 sps:$4 sm:$0xff]  }
 0x213   :  { %3227 = vmatpush1.bf16.msra.mxu0 %v4857_v38  ;;  %3391 = vmatpush1.bf16.msra.mxu1 %v4860_v39  ;;  %v4941_v38 = vld [vmem:[%s6587_s5 + $0x500] ss:$16 sps:$4 sm:$0xff]   ;;  %v4944_v39 = vld [vmem:[%s6587_s5 + $0x508] ss:$16 sps:$4 sm:$0xff]  }
 0x214   :  { %3228 = vmatprep.subr.bf16.mxu0 %v4865_v41  ;;  %3392 = vmatprep.subr.bf16.mxu1 %v4868_v43  ;;  %v4949_v41 = vld [vmem:[%s6587_s5 + $0x524] ss:$16 sps:$4 sm:$0xff]   ;;  %v4952_v43 = vld [vmem:[%s6587_s5 + $0x52c] ss:$16 sps:$4 sm:$0xff]  }
 0x217   :  { %3229 = vmatpush1.bf16.msra.mxu0 %v4863_v45  ;;  %3393 = vmatpush1.bf16.msra.mxu1 %v4866_v46  ;;  %v4947_v45 = vld [vmem:[%s6587_s5 + $0x520] ss:$16 sps:$4 sm:$0xff]   ;;  %v4950_v46 = vld [vmem:[%s6587_s5 + $0x528] ss:$16 sps:$4 sm:$0xff]  }
 0x218   :  { %3230 = vmatprep.subr.bf16.mxu0 %v4871_v47  ;;  %3394 = vmatprep.subr.bf16.mxu1 %v4874_v48  ;;  %v4955_v47 = vld [vmem:[%s6587_s5 + $0x544] ss:$16 sps:$4 sm:$0xff]   ;;  %v4958_v48 = vld [vmem:[%s6587_s5 + $0x54c] ss:$16 sps:$4 sm:$0xff]  }
 0x21b   :  { %3231 = vmatpush1.bf16.msra.mxu0 %v4869_v49  ;;  %3395 = vmatpush1.bf16.msra.mxu1 %v4872_v50  ;;  %v4953_v49 = vld [vmem:[%s6587_s5 + $0x540] ss:$16 sps:$4 sm:$0xff]   ;;  %v4956_v50 = vld [vmem:[%s6587_s5 + $0x548] ss:$16 sps:$4 sm:$0xff]  }
 0x21c   :  { %3232 = vmatprep.subr.bf16.mxu0 %v4877_v51  ;;  %3396 = vmatprep.subr.bf16.mxu1 %v4880_v52  ;;  %v4961_v51 = vld [vmem:[%s6587_s5 + $0x564] ss:$16 sps:$4 sm:$0xff]   ;;  %v4964_v52 = vld [vmem:[%s6587_s5 + $0x56c] ss:$16 sps:$4 sm:$0xff]  }
 0x21f   :  { %3233 = vmatpush1.bf16.msra.mxu0 %v4875_v53  ;;  %3397 = vmatpush1.bf16.msra.mxu1 %v4878_v60  ;;  %v4959_v53 = vld [vmem:[%s6587_s5 + $0x560] ss:$16 sps:$4 sm:$0xff]   ;;  %v4962_v60 = vld [vmem:[%s6587_s5 + $0x568] ss:$16 sps:$4 sm:$0xff]  }
 0x220   :  { %3234 = vmatprep.subr.bf16.mxu0 %v4883_v54  ;;  %3398 = vmatprep.subr.bf16.mxu1 %v4886_v55  ;;  %v4967_v54 = vld [vmem:[%s6587_s5 + $0x584] ss:$16 sps:$4 sm:$0xff]   ;;  %v4970_v55 = vld [vmem:[%s6587_s5 + $0x58c] ss:$16 sps:$4 sm:$0xff]  }
 0x223   :  { %3235 = vmatpush1.bf16.msra.mxu0 %v4881_v56  ;;  %3399 = vmatpush1.bf16.msra.mxu1 %v4884_v57  ;;  %v4965_v56 = vld [vmem:[%s6587_s5 + $0x580] ss:$16 sps:$4 sm:$0xff]   ;;  %v4968_v57 = vld [vmem:[%s6587_s5 + $0x588] ss:$16 sps:$4 sm:$0xff]  }
 0x224   :  { %3236 = vmatprep.subr.bf16.mxu0 %v4889_v58  ;;  %3400 = vmatprep.subr.bf16.mxu1 %v4892_v59  ;;  %v4973_v58 = vld [vmem:[%s6587_s5 + $0x5a4] ss:$16 sps:$4 sm:$0xff]   ;;  %v4976_v59 = vld [vmem:[%s6587_s5 + $0x5ac] ss:$16 sps:$4 sm:$0xff]  }
 0x227   :  { %3237 = vmatpush1.bf16.msra.mxu0 %v4887_v61  ;;  %3401 = vmatpush1.bf16.msra.mxu1 %v4890_v16  ;;  %v4971_v61 = vld [vmem:[%s6587_s5 + $0x5a0] ss:$16 sps:$4 sm:$0xff]   ;;  %v4974_v16 = vld [vmem:[%s6587_s5 + $0x5a8] ss:$16 sps:$4 sm:$0xff]  }
 0x228   :  { %3247 = vmatprep.subr.bf16.mxu0 %v4895_v62  ;;  %3411 = vmatprep.subr.bf16.mxu1 %v4898_v63  ;;  %v4979_v62 = vld [vmem:[%s6587_s5 + $0x5c4] ss:$16 sps:$4 sm:$0xff]   ;;  %v4982_v63 = vld [vmem:[%s6587_s5 + $0x5cc] ss:$16 sps:$4 sm:$0xff]  }
 0x22a   :  { %3239 = vmatmul.mubr.bf16.vlgmr.msra.gmra.mrb[8].mxu0 %v5522_v26  ;;  %3403 = vmatmul.mubr.bf16.vlgmr.msra.gmra.mrb[8].mxu1 %v5522_v26  ;;  %v4910_v26 = vld [vmem:[%s6587_s5 + $0x44c] ss:$16 sps:$4 sm:$0xff]  }
 0x22b   :  { %3248 = vmatpush1.bf16.msra.mxu0 %v4893_v0  ;;  %3412 = vmatpush1.bf16.msra.mxu1 %v4896_v22  ;;  %v4977_v0 = vld [vmem:[%s6587_s5 + $0x5c0] ss:$16 sps:$4 sm:$0xff]   ;;  %v4980_v22 = vld [vmem:[%s6587_s5 + $0x5c8] ss:$16 sps:$4 sm:$0xff]  }
 0x22c   :  { %3249 = vmatprep.subr.bf16.mxu0 %v4901_v1  ;;  %3413 = vmatprep.subr.bf16.mxu1 %v4904_v2  ;;  %v4985_v1 = vld [vmem:[%s6587_s5 + $0x5e4] ss:$16 sps:$4 sm:$0xff]   ;;  %v4988_v2 = vld [vmem:[%s6587_s5 + $0x5ec] ss:$16 sps:$4 sm:$0xff]  }
 0x22d   :  { %3279 = vmatprep.mubr.bf16.mxu0 %v5319_v18  ;;  %3443 = vmatprep.mubr.bf16.mxu1 %v5319_v18  ;;  %v4916_v18 = vld [vmem:[%s6587_s5 + $0x46c] ss:$16 sps:$4 sm:$0xff]  }
 0x22f   :  { %3250 = vmatpush1.bf16.msra.mxu0 %v4899_v3  ;;  %3414 = vmatpush1.bf16.msra.mxu1 %v4902_v4  ;;  %v4983_v3 = vld [vmem:[%s6587_s5 + $0x5e0] ss:$16 sps:$4 sm:$0xff]   ;;  %v4986_v4 = vld [vmem:[%s6587_s5 + $0x5e8] ss:$16 sps:$4 sm:$0xff]  }
 0x230   :  { %3251 = vmatprep.subr.bf16.mxu0 %v4907_v5  ;;  %3415 = vmatprep.subr.bf16.mxu1 %v4910_v26  ;;  %v4991_v5 = vld [vmem:[%s6587_s5 + $0x604] ss:$16 sps:$4 sm:$0xff]   ;;  %v4994_v26 = vld [vmem:[%s6587_s5 + $0x60c] ss:$16 sps:$4 sm:$0xff]  }
 0x233   :  { %3252 = vmatpush1.bf16.msra.mxu0 %v4905_v8  ;;  %3416 = vmatpush1.bf16.msra.mxu1 %v4908_v11  ;;  %v4989_v8 = vld [vmem:[%s6587_s5 + $0x600] ss:$16 sps:$4 sm:$0xff]   ;;  %v4992_v11 = vld [vmem:[%s6587_s5 + $0x608] ss:$16 sps:$4 sm:$0xff]  }
 0x234   :  { %3253 = vmatprep.subr.bf16.mxu0 %v4913_v12  ;;  %3417 = vmatprep.subr.bf16.mxu1 %v4916_v18  ;;  %v4997_v12 = vld [vmem:[%s6587_s5 + $0x624] ss:$16 sps:$4 sm:$0xff]   ;;  %v5000_v18 = vld [vmem:[%s6587_s5 + $0x62c] ss:$16 sps:$4 sm:$0xff]  }
 0x237   :  { %3254 = vmatpush1.bf16.msra.mxu0 %v4911_v13  ;;  %3418 = vmatpush1.bf16.msra.mxu1 %v4914_v14  ;;  %v4995_v13 = vld [vmem:[%s6587_s5 + $0x620] ss:$16 sps:$4 sm:$0xff]   ;;  %v4998_v14 = vld [vmem:[%s6587_s5 + $0x628] ss:$16 sps:$4 sm:$0xff]  }
 0x238   :  { %3255 = vmatprep.subr.bf16.mxu0 %v4919_v15  ;;  %3419 = vmatprep.subr.bf16.mxu1 %v4922_v17  ;;  %v5002_v15 = vld [vmem:[%s6589_s7 + $0x40] sm:$0xff]  }
 0x239   :  { %v5003_v17 = vld [vmem:[%s6589_s7] sm:$0xff]  }
 0x23b   :  { %3256 = vmatpush1.bf16.msra.mxu0 %v4917_v20  ;;  %3420 = vmatpush1.bf16.msra.mxu1 %v4920_v21  ;;  %v5005_v20 = vld [vmem:[%s6589_s7 + $0x48] sm:$0xff]  }
 0x23c   :  { %3257 = vmatprep.subr.bf16.mxu0 %v4925_v23  ;;  %3421 = vmatprep.subr.bf16.mxu1 %v4928_v24  ;;  %v5004_v21 = vld [vmem:[%s6589_s7 + $0x88] sm:$0xff]   ;;  %v5008_v24 = vld [vmem:[%s6589_s7 + $0x50] sm:$0xff]  }
 0x23d   :  { %v5006_v23 = vld [vmem:[%s6589_s7 + $0x8] sm:$0xff]  }
 0x23f   :  { %3258 = vmatpush1.bf16.msra.mxu0 %v4923_v25  ;;  %3422 = vmatpush1.bf16.msra.mxu1 %v4926_v27  ;;  %v5009_v25 = vld [vmem:[%s6589_s7 + $0x10] sm:$0xff]   ;;  %v5011_v27 = vld [vmem:[%s6589_s7 + $0x58] sm:$0xff]  }
 0x240   :  { %3259 = vmatprep.subr.bf16.mxu0 %v4931_v28  ;;  %3423 = vmatprep.subr.bf16.mxu1 %v4934_v29 }
 0x243   :  { %3260 = vmatpush1.bf16.msra.mxu0 %v4929_v30  ;;  %3424 = vmatpush1.bf16.msra.mxu1 %v4932_v31  ;;  %v4016_v30 = vld [vmem:[%s6586_s4] ss:$0 sm:$0xff] }
 0x244   :  { %3261 = vmatprep.subr.bf16.mxu0 %v4937_v32  ;;  %3425 = vmatprep.subr.bf16.mxu1 %v4940_v33 }
 0x247   :  { %3262 = vmatpush1.bf16.msra.mxu0 %v4935_v34  ;;  %3426 = vmatpush1.bf16.msra.mxu1 %v4938_v35 }
 0x248   :  { %3263 = vmatprep.subr.bf16.mxu0 %v4943_v36  ;;  %3427 = vmatprep.subr.bf16.mxu1 %v4946_v37  ;;  %v5010_v36 = vld [vmem:[%s6589_s7 + $0x98] sm:$0xff]  }
 0x249   :  { %v5012_v37 = vld [vmem:[%s6589_s7 + $0x18] sm:$0xff]  }
 0x24b   :  { %3264 = vmatpush1.bf16.msra.mxu0 %v4941_v38  ;;  %3428 = vmatpush1.bf16.msra.mxu1 %v4944_v39 }
 0x24c   :  { %3265 = vmatprep.subr.bf16.mxu0 %v4949_v41  ;;  %3429 = vmatprep.subr.bf16.mxu1 %v4952_v43  ;;  %v5014_v41 = vld [vmem:[%s6589_s7 + $0x60] sm:$0xff]  }
 0x24f   :  { %3266 = vmatpush1.bf16.msra.mxu0 %v4947_v45  ;;  %3430 = vmatpush1.bf16.msra.mxu1 %v4950_v46  ;;  %v5013_v46 = vld [vmem:[%s6589_s7 + $0xa0] sm:$0xff]  }
 0x250   :  { %3267 = vmatprep.subr.bf16.mxu0 %v4955_v47  ;;  %3431 = vmatprep.subr.bf16.mxu1 %v4958_v48  ;;  %v5015_v47 = vld [vmem:[%s6589_s7 + $0x20] sm:$0xff]   ;;  %v5017_v48 = vld [vmem:[%s6589_s7 + $0x68] sm:$0xff]  }
 0x253   :  { %3268 = vmatpush1.bf16.msra.mxu0 %v4953_v49  ;;  %3432 = vmatpush1.bf16.msra.mxu1 %v4956_v50  ;;  %v5016_v49 = vld [vmem:[%s6589_s7 + $0xa8] sm:$0xff]  }
 0x254   :  { %3269 = vmatprep.subr.bf16.mxu0 %v4961_v51  ;;  %3433 = vmatprep.subr.bf16.mxu1 %v4964_v52  ;;  %v5018_v50 = vld [vmem:[%s6589_s7 + $0x28] sm:$0xff]   ;;  %v5019_v51 = vld [vmem:[%s6589_s7 + $0xb0] sm:$0xff]  }
 0x255   :  { %v5020_v52 = vld [vmem:[%s6589_s7 + $0x70] sm:$0xff]  }
 0x257   :  { %3270 = vmatpush1.bf16.msra.mxu0 %v4959_v53  ;;  %3434 = vmatpush1.bf16.msra.mxu1 %v4962_v60  ;;  %v5021_v53 = vld [vmem:[%s6589_s7 + $0x30] sm:$0xff]   ;;  %v5022_v60 = vld [vmem:[%s6589_s7 + $0xb8] sm:$0xff]  }
 0x258   :  { %3271 = vmatprep.subr.bf16.mxu0 %v4967_v54  ;;  %3435 = vmatprep.subr.bf16.mxu1 %v4970_v55  ;;  %v5023_v54 = vld [vmem:[%s6589_s7 + $0x78] sm:$0xff]  }
 0x259   :  { %v5024_v55 = vld [vmem:[%s6589_s7 + $0x38] sm:$0xff]  }
 0x25b   :  { %3272 = vmatpush1.bf16.msra.mxu0 %v4965_v56  ;;  %3436 = vmatpush1.bf16.msra.mxu1 %v4968_v57  ;;  %v5025_v56 = vld [vmem:[%s6589_s7 + $0xc0] sm:$0xff]  }
 0x25c   :  { %3273 = vmatprep.subr.bf16.mxu0 %v4973_v58  ;;  %3437 = vmatprep.subr.bf16.mxu1 %v4976_v59  ;;  %v2143_v57 = vld [vmem:[%s6588_s6] sm:$0xf] }
 0x25d   :  { %v2148_v58 = vrot.slane %v2143_v57, %v239_v6  ;;  %v2152_v59 = vrot.slane %v2143_v57, %v243_v9 }
 0x25f   :  { %3274 = vmatpush1.bf16.msra.mxu0 %v4971_v61  ;;  %3438 = vmatpush1.bf16.msra.mxu1 %v4974_v16  ;;  %v2160_v61 = vrot.slane %v2143_v57, %v251_v10 }
 0x260   :  { %3275 = vmatprep.subr.bf16.mxu0 %v4979_v62  ;;  %3439 = vmatprep.subr.bf16.mxu1 %v4982_v63 }
 0x263   :  { %3276 = vmatpush1.bf16.msra.mxu0 %v4977_v0  ;;  %3440 = vmatpush1.bf16.msra.mxu1 %v4980_v22 }
 0x264   :  { %3277 = vmatprep.subr.bf16.mxu0 %v4985_v1  ;;  %3441 = vmatprep.subr.bf16.mxu1 %v4988_v2 }
 0x267   :  { %3278 = vmatpush1.bf16.msra.mxu0 %v4983_v3  ;;  %3442 = vmatpush1.bf16.msra.mxu1 %v4986_v4 }
 0x268   :  { %3288 = vmatprep.subr.bf16.mxu0 %v4991_v5  ;;  %3452 = vmatprep.subr.bf16.mxu1 %v4994_v26 }
 0x26a   :  { %3280 = vmatmul.mubr.bf16.vlgmr.msra.gmra.mrb[8].mxu0 %v5321_v19  ;;  %3444 = vmatmul.mubr.bf16.vlgmr.msra.gmra.mrb[8].mxu1 %v5321_v19  ;;  %v5001_v19 = vld [vmem:[%s6589_s7 + $0x80] sm:$0xff]  }
 0x26b   :  { %3289 = vmatpush1.bf16.msra.mxu0 %v4989_v8  ;;  %3453 = vmatpush1.bf16.msra.mxu1 %v4992_v11 }
 0x26c   :  { %3290 = vmatprep.subr.bf16.mxu0 %v4997_v12  ;;  %3454 = vmatprep.subr.bf16.mxu1 %v5000_v18 }
 0x26d   :  { %3320 = vmatprep.mubr.bf16.mxu0 %v5051_v40  ;;  %3484 = vmatprep.mubr.bf16.mxu1 %v5051_v40 }
 0x26f   :  { %3291 = vmatpush1.bf16.msra.mxu0 %v4995_v13  ;;  %3455 = vmatpush1.bf16.msra.mxu1 %v4998_v14 }
 0x270   :  { %3751 = vmatprep.subr.bf16.mxu1 %v5051_v40  ;;  %4294 = vmatprep.subr.bf16.mxu0 %v5002_v15  ;;  %v4245_v15 = vld [vmem:[%s6590_s8] ss:$0 sm:$0xff]  ;;  %s5026_s8 = scalar_lea.vmem %s3807_s25, 32 }
 0x271   :  { %p5027_p0 = scmp.ne.s32.totalorder %s3807_s25, %s5026_s8  ;;  %p5032_p2 = scmp.lt.s32.totalorder %s5026_s8, %s5026_s8 }
 0x273   :  { %p5033_p3 = por %p5032_p2, %p5031_p1 }
 0x275   :  { %p5034_p4 = pnand %p5033_p3, %p5027_p0 }
 0x276   :  { %4243 = vmatmul.mubr.msk.bf16.vlgmr.msra.gmra.mrb[8].mxu0 %vm1312_vm0, %v5751_v44  ;;  %4244 = vmatmul.mubr.msk.bf16.vlgmr.msra.gmra.mrb[8].mxu1 %vm1312_vm0, %v5751_v44  ;;  %v5007_v44 = vld [vmem:[%s6589_s7 + $0x90] sm:$0xff]  }
 0x277   :  { %3752 = vmatpush1.bf16.msra.mxu1 %v5001_v19  ;;  %4295 = vmatpush3.bf16.msra.mxu0 %v5003_v17 }
 0x278   :  { %3753 = vmatprep.subr.bf16.mxu1 %v5051_v40  ;;  %4296 = vmatprep.subr.bf16.mxu0 %v5005_v20 }
 0x27b   :  { %3754 = vmatpush1.bf16.msra.mxu1 %v5004_v21  ;;  %4297 = vmatpush3.bf16.msra.mxu0 %v5006_v23 }
 0x27c   :  { %3755 = vmatprep.subr.bf16.mxu1 %v5051_v40  ;;  %4298 = vmatprep.subr.bf16.mxu0 %v5008_v24 }
 0x27d   :  { %v4288_v28 = vpop.f32.mrb[4].mxu0  ;;  %v1937_v29 = vpop.f32.mrb[4].mxu1 }
 0x27e   :  { %v4289_v31 = vpop.f32.mrb[5].mxu0  ;;  %v1939_v32 = vpop.f32.mrb[5].mxu1 }
 0x27f   :  { %v4290_v33 = vadd.f32 %v4289_v31, %v4288_v28  ;;  %v4291_v34 = vpop.f32.mrb[6].mxu0  ;;  %v1940_v35 = vpop.f32.mrb[6].mxu1  ;;  %3756 = vmatpush1.bf16.msra.mxu1 %v5007_v44  ;;  %4299 = vmatpush3.bf16.msra.mxu0 %v5009_v25 }
 0x280   :  { %v4292_v38 = vpop.f32.mrb[7].mxu0  ;;  %v1941_v39 = vpop.f32.mrb[7].mxu1  ;;  %3757 = vmatprep.subr.bf16.mxu1 %v5051_v40  ;;  %4300 = vmatprep.subr.bf16.mxu0 %v5011_v27 }
 0x281   :  { %v1898_v43 = vadd.f32 %v4290_v33, %v4016_v30 }
 0x283   :  { %v6511_v45 = vadd.f32 %v1937_v29, %v1898_v43  ;;  %3758 = vmatpush1.bf16.msra.mxu1 %v5010_v36  ;;  %4301 = vmatpush3.bf16.msra.mxu0 %v5012_v37 }
 0x284   :  { %3759 = vmatprep.subr.bf16.mxu1 %v5051_v40  ;;  %4302 = vmatprep.subr.bf16.mxu0 %v5014_v41 }
 0x287   :  { %3760 = vmatpush1.bf16.msra.mxu1 %v5013_v46  ;;  %4303 = vmatpush3.bf16.msra.mxu0 %v5015_v47 }
 0x288   :  { %3761 = vmatprep.subr.bf16.mxu1 %v5051_v40  ;;  %4304 = vmatprep.subr.bf16.mxu0 %v5017_v48 }
 0x28b   :  { %3762 = vmatpush1.bf16.msra.mxu1 %v5016_v49  ;;  %4305 = vmatpush3.bf16.msra.mxu0 %v5018_v50 }
 0x28c   :  { %3763 = vmatprep.subr.bf16.mxu1 %v5051_v40  ;;  %4306 = vmatprep.subr.bf16.mxu0 %v5020_v52 }
 0x28f   :  { %3764 = vmatpush1.bf16.msra.mxu1 %v5019_v51  ;;  %4307 = vmatpush3.bf16.msra.mxu0 %v5021_v53 }
 0x290   :  { %3765 = vmatprep.subr.bf16.mxu1 %v5051_v40  ;;  %4308 = vmatprep.subr.bf16.mxu0 %v5023_v54 }
 0x293   :  { %3766 = vmatpush1.bf16.msra.mxu1 %v5022_v60  ;;  %4309 = vmatpush3.bf16.msra.mxu0 %v5024_v55 }
 0x294   :  { %3767 = vmatprep.subr.bf16.mxu1 %v5051_v40  ;;  %v2156_v40 = vrot.slane %v2143_v57, %v247_v7 }
 0x297   :  { %3768 = vmatpush1.bf16.msra.mxu1 %v5025_v56 }
 0x349   :  { %v3322_v16 = vpop.f32.mrb[8].mxu0  ;;  %v3486_v62 = vpop.f32.mrb[8].mxu1 }
 0x34a   :  { %v4320_v63 = vadd.f32 %v3322_v16, %v2148_v58  ;;  %v4322_v0 = vadd.f32 %v3486_v62, %v2156_v40  ;;  %v3324_v22 = vpop.f32.mrb[9].mxu0  ;;  %v3488_v1 = vpop.f32.mrb[9].mxu1 }
 0x34b   :  { %v4321_v2 = vadd.f32 %v3324_v22, %v2152_v59  ;;  %v4323_v3 = vadd.f32 %v3488_v1, %v2160_v61  ;;  %v3326_v4 = vpop.f32.mrb[10].mxu0  ;;  %v3490_v5 = vpop.f32.mrb[10].mxu1 }
 0x34c   :  { %v3493_v6 = vmax.f32 %v4320_v63, 0.0  ;;  %v3495_v26 = vmax.f32 %v4322_v0, 0.0  ;;  %v3327_v8 = vpop.f32.mrb[11].mxu0  ;;  %v3491_v7 = vpop.f32.mrb[11].mxu1 }
 0x34d   :  { %v3494_v11 = vmax.f32 %v4321_v2, 0.0  ;;  %v3496_v12 = vmax.f32 %v4323_v3, 0.0 }
 0x34e   :  { %v3497_v42 = vpack.c.bf16 %v3493_v6, %v3493_v6  ;;  %v3499_v10 = vpack.c.bf16 %v3495_v26, %v3495_v26 }
 0x34f   :  { %v3498_v9 = vpack.c.bf16 %v3494_v11, %v3494_v11  ;;  %v3500_v18 = vpack.c.bf16 %v3496_v12, %v3496_v12 }
 0x351   :  { %3743 = vmatprep.mubr.bf16.mxu0 %v3498_v9  ;;  %4271 = vmatprep.mubr.msk.bf16.mxu1 %vm1859_vm1, %v3500_v18 }
 0x352   :  { %3744 = vmatmul.mubr.bf16.vlgmr.msra.gmra.mrb[12].mxu0 %v3497_v42  ;;  %3784 = vmatmul.mubr.bf16.vlgmr.msra.gmra.mrb[12].mxu1 %v3499_v10 }
 0x425   :  { %v4310_v13 = vpop.f32.mrb[12].mxu0  ;;  %v3785_v14 = vpop.f32.mrb[12].mxu1 }
 0x426   :  { %v4311_v19 = vpop.f32.mrb[13].mxu0  ;;  %v3787_v17 = vpop.f32.mrb[13].mxu1 }
 0x427   :  { %v4312_v20 = vadd.f32 %v4311_v19, %v4310_v13  ;;  %v4313_v21 = vpop.f32.mrb[14].mxu0  ;;  %v3788_v23 = vpop.f32.mrb[14].mxu1 }
 0x428   :  { %v4314_v24 = vpop.f32.mrb[15].mxu0  ;;  %v3789_v44 = vpop.f32.mrb[15].mxu1 }
 0x429   :  { %v3746_v25 = vadd.f32 %v4312_v20, %v4245_v15 }
 0x42b   :  { %v3786_v27 = vadd.f32 %v3785_v14, %v3746_v25 }
 0x42d   :  { %v3793_v28 = vsel %vm3792_vm2, %v3786_v27, 0.0  ;;  %v3791_v29 = vadd.f32 %v3786_v27, %v6511_v45 }
 0x42e   :  { %3794 = vadd.xlane.f32.xlu0 %v3793_v28 }
 0x4bb   :  { %v3795_v30 = vpop.xlane.xlu0 %3794 }
 0x4bc   :  { %v3797_v31 = vmul.f32 0.16666667, %v3795_v30 }
 0x4be   :  { %v3798_v32 = vsub.f32 %v3791_v29, %v3797_v31 }
 0x4c0   :  { %3799 = vst.msk [vmem:[#allocation2] sm:$0x3] %vm3792_vm2, %v3798_v32 }
 0x4c1   :  { %5037 = shalt.err (!%p5034_p4)
}
 0x4c2   :  { %s5038_s5 = scalar_lea.hbm %s6591_s9, 32 }
 0x4c3   :  { %p5039_p5 = scmp.ne.s32.totalorder %s6591_s9, %s5038_s5  ;;  %p5042_p6 = scmp.lt.u32.totalorder %s5038_s5, %s6591_s9 }
 0x4c5   :  { %p5044_p7 = pnand %p5042_p6, %p5039_p5 }
 0x4c7   :  { %5047 = shalt.err (!%p5044_p7)
}
 0x4c8   :  { %3809 = dma.vmem_to_hbm [thread:$0]  %s3807_s25, 32, %s6591_s9, [#allocation3]  }
 0x4c9   :  { %5048 = dma.done.wait [#allocation3], 32  }
 0x4ca   :  { %5049 = vsyncadd [#allocation3], 4294967264 }
 0x4cb   :  { %3813 = vsyncpa [#allocation3], 1 }

</bundles_post_ra>
